<compile_context>
chip_gen: v5e
topology: v5e:2x2
jax: 0.10.0
libtpu: 0.0.40
codegen_flags: <defaults>
</compile_context>

<pallas_src>
import jax
import jax.numpy as jnp
from jax.experimental import pallas as pl
from jax.experimental.pallas import tpu as pltpu

LN_EPS = 1e-5  # PyTorch nn.LayerNorm default


def _round_up(a, b):
    return (a + b - 1) // b * b


def _vmem_budget():
    """Per-generation VMEM budget with headroom for Mosaic internal scratch."""
    try:
        cap = int(pltpu.get_tpu_info().vmem_capacity_bytes)
    except Exception:
        cap = 64 * 1024 * 1024  # conservative (v7x-sized) fallback
    return int(cap * 0.85)


def _pick_tm(N, budget, fixed_bytes, per_row_bytes, tm_target):
    """Largest row tile that fits the remaining VMEM budget, MXU-aligned."""
    avail = max(0, budget - fixed_bytes)
    tm_cap = max(8, avail // max(1, per_row_bytes))
    tm = int(min(tm_target, tm_cap, _round_up(N, 8)))
    if tm >= 256:
        tm = (tm // 256) * 256        # 256-aligned for the 2x256^2 MXU
    else:
        tm = _round_up(tm, 8)
    # Keep >= 2 row tiles when there are enough rows so v7x's two TensorCores
    # both get work (v5e/v6e: harmless).
    if N >= 512 and tm >= N:
        tm = min(tm, _round_up(pl.cdiv(N, 2), 256))
    return max(8, tm)


# --------------------------------------------------------------------------
# Kernel A: weights fully resident in VMEM (single step per row tile).
# --------------------------------------------------------------------------
def ff_residual_kernel_resident(x_ref, gamma_ref, beta_ref, w1_ref, b1_ref,
                                w2_ref, b2_ref, o_ref):
    # ---- LayerNorm in f32 ----
    x = x_ref[...].astype(jnp.float32)                  # (tm, D)
    mu = jnp.mean(x, axis=-1, keepdims=True)
    xc = x - mu
    var = jnp.mean(xc * xc, axis=-1, keepdims=True)     # biased, as torch
    inv = jax.lax.rsqrt(var + LN_EPS)                   # EUP
    xn = (xc * inv * gamma_ref[...] + beta_ref[...]).astype(w1_ref.dtype)

    # ---- FFN on the MXU (bf16 operands, f32 accumulation) ----
    h = jnp.dot(xn, w1_ref[...], preferred_element_type=jnp.float32)
    h = jnp.maximum(h + b1_ref[...], 0.0)
    ff = jnp.dot(h.astype(w2_ref.dtype), w2_ref[...],
                 preferred_element_type=jnp.float32) + b2_ref[...]

    # ---- Dropout (eval => identity) + residual ----
    # TODO(synk): training-mode dropout would use pltpu.prng_seed / prng_random_bits.
    o_ref[...] = (x + ff).astype(o_ref.dtype)


# --------------------------------------------------------------------------
# Kernel B: hidden dim chunked on grid axis 1 (weights too big for VMEM).
# --------------------------------------------------------------------------
def ff_residual_kernel_chunked(x_ref, gamma_ref, beta_ref, w1_ref, b1_ref,
                               w2_ref, b2_ref, o_ref, acc_ref, xn_ref):
    hk = pl.program_id(1)

    # LayerNorm once per row tile, cached as bf16 for the MXU.
    @pl.when(hk == 0)
    def _():
        x = x_ref[...].astype(jnp.float32)
        mu = jnp.mean(x, axis=-1, keepdims=True)
        xc = x - mu
        var = jnp.mean(xc * xc, axis=-1, keepdims=True)
        inv = jax.lax.rsqrt(var + LN_EPS)
        xn = xc * inv * gamma_ref[...] + beta_ref[...]
        xn_ref[...] = xn.astype(xn_ref.dtype)

    # Chunk contribution: ReLU(xn @ W1[:, hk] + b1[hk]) @ W2[hk, :]
    h = jnp.dot(xn_ref[...], w1_ref[...], preferred_element_type=jnp.float32)
    h = jnp.maximum(h + b1_ref[...], 0.0)
    contrib = jnp.dot(h.astype(w2_ref.dtype), w2_ref[...],
                      preferred_element_type=jnp.float32)

    # First chunk assigns, later chunks accumulate (no separate zero-fill).
    @pl.when(hk == 0)
    def _():
        acc_ref[...] = contrib

    @pl.when(hk > 0)
    def _():
        acc_ref[...] += contrib

    # Last chunk: bias, dropout (eval => identity), residual, store.
    @pl.when(hk == pl.num_programs(1) - 1)
    def _():
        ff = acc_ref[...] + b2_ref[...]
        o_ref[...] = (x_ref[...].astype(jnp.float32) + ff).astype(o_ref.dtype)


def ff_residual(x, gamma, beta, w1, b1, w2, b2, *, tm_target=None, hk_target=512):
    """x: (B, S, D). gamma/beta/b2: (1, D). w1: (D, H), b1: (1, H), w2: (H, D)."""
    B, S, D = x.shape
    H = w1.shape[1]
    N = B * S
    x2 = x.reshape(N, D)

    xi = x.dtype.itemsize
    oi = x.dtype.itemsize
    budget = _vmem_budget()

    # ---- Decide: full weight residency (nk = 1) vs. hidden-dim chunking ----
    Hp = _round_up(H, 256)                               # MXU-aligned hidden dim
    # W1 + W2 bf16, double-buffered by the pipeline; b1; LN params/b2.
    fixed_res = 8 * D * Hp + 2 * Hp * 4 + 6 * D * 4
    # x/out tiles (double-buffered) + live (tm, Hp) f32 `h` intermediate.
    per_row_res = 2 * D * xi + 2 * D * oi + Hp * 4
    min_tile_rows = min(_round_up(N, 8), 256)
    resident = fixed_res + per_row_res * min_tile_rows <= budget

    if resident:
        th = Hp
        nk = 1
        h_pad = Hp
        tm = _pick_tm(N, budget, fixed_res, per_row_res,
                      tm_target if tm_target is not None else 512)
        est = fixed_res + per_row_res * tm
    else:
        # Cap th at ~512 (keeps the live (tm, th) intermediate bounded); grow
        # tm instead to amortize the re-streamed weight DMA.
        th = min(_round_up(min(hk_target, 512), 256), Hp)
        nk = pl.cdiv(H, th)
        h_pad = nk * th
        fixed_ch = 8 * D * th + 2 * th * 4 + 6 * D * 4
        # x/out tiles + f32 acc + bf16 xn scratch + live (tm, th) intermediate.
        per_row_ch = 2 * D * xi + 2 * D * oi + D * 4 + D * 2 + th * 4
        tm = _pick_tm(N, budget, fixed_ch, per_row_ch,
                      tm_target if tm_target is not None else 768)
        est = fixed_ch + per_row_ch * tm

    vmem_limit = int(min(budget, max(32 * 1024 * 1024, int(est * 1.25))))

    # ---- Row padding (zero rows are inert through LN + FFN and sliced off) ----
    n_pad = _round_up(N, tm)
    if n_pad != N:
        x2 = jnp.pad(x2, ((0, n_pad - N), (0, 0)))
    n_rows = n_pad // tm

    # ---- Hidden-dim padding (zero cols of W1 / rows of W2 contribute 0) ----
    if h_pad != H:
        w1 = jnp.pad(w1, ((0, 0), (0, h_pad - H)))
        b1 = jnp.pad(b1, ((0, 0), (0, h_pad - H)))
        w2 = jnp.pad(w2, ((0, h_pad - H), (0, 0)))

    # bf16 weight operands for the MXU; LN / biases / residual stay f32.
    w1_b = w1.astype(jnp.bfloat16)
    w2_b = w2.astype(jnp.bfloat16)

    if resident:
        grid_spec = pltpu.PrefetchScalarGridSpec(
            num_scalar_prefetch=0,
            grid=(n_rows,),
            in_specs=[
                pl.BlockSpec((tm, D), lambda i: (i, 0)),    # x rows
                pl.BlockSpec((1, D), lambda i: (0, 0)),     # gamma
                pl.BlockSpec((1, D), lambda i: (0, 0)),     # beta
                pl.BlockSpec((D, th), lambda i: (0, 0)),    # W1 (resident)
                pl.BlockSpec((1, th), lambda i: (0, 0)),    # b1
                pl.BlockSpec((th, D), lambda i: (0, 0)),    # W2 (resident)
                pl.BlockSpec((1, D), lambda i: (0, 0)),     # b2
            ],
            out_specs=pl.BlockSpec((tm, D), lambda i: (i, 0)),
        )
        kernel = ff_residual_kernel_resident
        dim_sem = ("parallel",)
    else:
        grid_spec = pltpu.PrefetchScalarGridSpec(
            num_scalar_prefetch=0,
            grid=(n_rows, nk),                              # reduction axis last
            in_specs=[
                pl.BlockSpec((tm, D), lambda i, k: (i, 0)),  # x rows
                pl.BlockSpec((1, D), lambda i, k: (0, 0)),   # gamma
                pl.BlockSpec((1, D), lambda i, k: (0, 0)),   # beta
                pl.BlockSpec((D, th), lambda i, k: (0, k)),  # W1 chunk
                pl.BlockSpec((1, th), lambda i, k: (0, k)),  # b1 chunk
                pl.BlockSpec((th, D), lambda i, k: (k, 0)),  # W2 chunk
                pl.BlockSpec((1, D), lambda i, k: (0, 0)),   # b2
            ],
            out_specs=pl.BlockSpec((tm, D), lambda i, k: (i, 0)),
            scratch_shapes=[
                pltpu.VMEM((tm, D), jnp.float32),            # f32 accumulator
                pltpu.VMEM((tm, D), jnp.bfloat16),           # cached x_norm
            ],
        )
        kernel = ff_residual_kernel_chunked
        dim_sem = ("parallel", "arbitrary")

    out = pl.pallas_call(
        kernel,
        out_shape=jax.ShapeDtypeStruct((n_pad, D), x.dtype),
        grid_spec=grid_spec,
        compiler_params=pltpu.CompilerParams(
            dimension_semantics=dim_sem,
            vmem_limit_bytes=vmem_limit,
        ),
    )(x2, gamma, beta, w1_b, b1, w2_b, b2)

    return out[:N].reshape(B, S, D)


def reference(x, gamma, beta, w1, b1, w2, b2):
    mu = jnp.mean(x, axis=-1, keepdims=True)
    var = jnp.mean((x - mu) ** 2, axis=-1, keepdims=True)
    xn = (x - mu) * jax.lax.rsqrt(var + LN_EPS) * gamma[0] + beta[0]
    h = jnp.maximum(xn @ w1 + b1[0], 0.0)
    ff = h @ w2 + b2[0]
    return x + ff


if __name__ == "__main__":
    # 512 rows -> 2 row tiles of 256 (both v7x TCs get work), weights resident
    # in VMEM (single H block), D=128 -> lane-dense stores.
    B, S, D, H = 2, 256, 128, 1024
    key = jax.random.PRNGKey(0)
    kx, kg, kb, k1, k2, k3, k4 = jax.random.split(key, 7)

    x = jax.random.normal(kx, (B, S, D), dtype=jnp.float32)

    gamma = 1.0 + 0.1 * jax.random.normal(kg, (1, D), jnp.float32)
    beta = 0.05 * jax.random.normal(kb, (1, D), jnp.float32)
    w1 = jax.random.normal(k1, (D, H), jnp.float32) * 0.05
    b1 = jax.random.normal(k2, (1, H), jnp.float32) * 0.01
    w2 = jax.random.normal(k3, (H, D), jnp.float32) * 0.05
    b2 = jax.random.normal(k4, (1, D), jnp.float32) * 0.01

    out = ff_residual(x, gamma, beta, w1, b1, w2, b2)
    out = jax.block_until_ready(out)

    ref = reference(x, gamma, beta, w1, b1, w2, b2)
    assert out.shape == (B, S, D)
    # bf16 MXU operands (f32 accumulation) => loosened tolerance vs f32 reference.
    assert jnp.allclose(out, ref, atol=2e-2, rtol=2e-2), (
        float(jnp.max(jnp.abs(out - ref))))

    print("KERNEL_OK")
</pallas_src>

<mosaic_0001>
module attributes {stable_mosaic.version = 11 : i64} {
  func.func @ff_residual_kernel_resident(%arg0: i32, %arg1: memref<256x128xf32, #tpu.memory_space<vmem>>, %arg2: memref<1x128xf32, #tpu.memory_space<vmem>>, %arg3: memref<1x128xf32, #tpu.memory_space<vmem>>, %arg4: memref<128x1024xbf16, #tpu.memory_space<vmem>>, %arg5: memref<1x1024xf32, #tpu.memory_space<vmem>>, %arg6: memref<1024x128xbf16, #tpu.memory_space<vmem>>, %arg7: memref<1x128xf32, #tpu.memory_space<vmem>>, %arg8: memref<256x128xf32, #tpu.memory_space<vmem>>) attributes {dimension_semantics = [#tpu.dimension_semantics<parallel>], iteration_bounds = array<i64: 2>, scalar_prefetch = 0 : i64, scratch_operands = 0 : i64, tpu.core_type = #tpu.core_type<tc>, window_params = [{transform_indices = @transform_0, window_bounds = array<i64: 256, 128>}, {pipeline_mode = #tpu.pipeline_mode<synchronous>, transform_indices = @transform_1, window_bounds = array<i64: 1, 128>}, {pipeline_mode = #tpu.pipeline_mode<synchronous>, transform_indices = @transform_2, window_bounds = array<i64: 1, 128>}, {pipeline_mode = #tpu.pipeline_mode<synchronous>, transform_indices = @transform_3, window_bounds = array<i64: 128, 1024>}, {pipeline_mode = #tpu.pipeline_mode<synchronous>, transform_indices = @transform_4, window_bounds = array<i64: 1, 1024>}, {pipeline_mode = #tpu.pipeline_mode<synchronous>, transform_indices = @transform_5, window_bounds = array<i64: 1024, 128>}, {pipeline_mode = #tpu.pipeline_mode<synchronous>, transform_indices = @transform_6, window_bounds = array<i64: 1, 128>}, {transform_indices = @transform_7, window_bounds = array<i64: 256, 128>}]} {
    %c0 = arith.constant 0 : index
    %c0_0 = arith.constant 0 : index
    %0 = vector.load %arg1[%c0, %c0_0] : memref<256x128xf32, #tpu.memory_space<vmem>>, vector<256x128xf32>
    %cst = arith.constant dense<0.000000e+00> : vector<256xf32>
    %1 = vector.multi_reduction <add>, %0, %cst [1] : vector<256x128xf32> to vector<256xf32>
    %2 = vector.shape_cast %1 : vector<256xf32> to vector<256x1xf32>
    %cst_1 = arith.constant 1.280000e+02 : f32
    %3 = vector.broadcast %cst_1 : f32 to vector<256x1xf32>
    %4 = arith.divf %2, %3 : vector<256x1xf32>
    %5 = vector.broadcast %4 : vector<256x1xf32> to vector<256x128xf32>
    %6 = arith.subf %0, %5 : vector<256x128xf32>
    %7 = arith.mulf %6, %6 : vector<256x128xf32>
    %cst_2 = arith.constant dense<0.000000e+00> : vector<256xf32>
    %8 = vector.multi_reduction <add>, %7, %cst_2 [1] : vector<256x128xf32> to vector<256xf32>
    %9 = vector.shape_cast %8 : vector<256xf32> to vector<256x1xf32>
    %cst_3 = arith.constant 1.280000e+02 : f32
    %10 = vector.broadcast %cst_3 : f32 to vector<256x1xf32>
    %11 = arith.divf %9, %10 : vector<256x1xf32>
    %cst_4 = arith.constant 9.99999974E-6 : f32
    %12 = vector.broadcast %cst_4 : f32 to vector<256x1xf32>
    %13 = arith.addf %11, %12 : vector<256x1xf32>
    %14 = math.rsqrt %13 : vector<256x1xf32>
    %15 = vector.broadcast %14 : vector<256x1xf32> to vector<256x128xf32>
    %16 = arith.mulf %6, %15 : vector<256x128xf32>
    %c0_5 = arith.constant 0 : index
    %c0_6 = arith.constant 0 : index
    %17 = vector.load %arg2[%c0_5, %c0_6] : memref<1x128xf32, #tpu.memory_space<vmem>>, vector<1x128xf32>
    %18 = vector.broadcast %17 : vector<1x128xf32> to vector<256x128xf32>
    %19 = arith.mulf %16, %18 : vector<256x128xf32>
    %c0_7 = arith.constant 0 : index
    %c0_8 = arith.constant 0 : index
    %20 = vector.load %arg3[%c0_7, %c0_8] : memref<1x128xf32, #tpu.memory_space<vmem>>, vector<1x128xf32>
    %21 = vector.broadcast %20 : vector<1x128xf32> to vector<256x128xf32>
    %22 = arith.addf %19, %21 : vector<256x128xf32>
    %23 = arith.truncf %22 : vector<256x128xf32> to vector<256x128xbf16>
    %c0_9 = arith.constant 0 : index
    %c0_10 = arith.constant 0 : index
    %24 = vector.load %arg4[%c0_9, %c0_10] : memref<128x1024xbf16, #tpu.memory_space<vmem>>, vector<128x1024xbf16>
    %cst_11 = arith.constant dense<0.000000e+00> : vector<256x1024xf32>
    %25 = tpu.matmul %23, %24, %cst_11 {dimension_numbers = #tpu.dot_dimension_numbers<[1], [0], [0], [1], [0, 0, 1, 1], [], []>} : vector<256x128xbf16>, vector<128x1024xbf16>, vector<256x1024xf32> -> vector<256x1024xf32>
    %c0_12 = arith.constant 0 : index
    %c0_13 = arith.constant 0 : index
    %26 = vector.load %arg5[%c0_12, %c0_13] : memref<1x1024xf32, #tpu.memory_space<vmem>>, vector<1x1024xf32>
    %27 = vector.broadcast %26 : vector<1x1024xf32> to vector<256x1024xf32>
    %28 = arith.addf %25, %27 : vector<256x1024xf32>
    %cst_14 = arith.constant 0.000000e+00 : f32
    %29 = vector.broadcast %cst_14 : f32 to vector<256x1024xf32>
    %30 = arith.maximumf %28, %29 : vector<256x1024xf32>
    %31 = arith.truncf %30 : vector<256x1024xf32> to vector<256x1024xbf16>
    %c0_15 = arith.constant 0 : index
    %c0_16 = arith.constant 0 : index
    %32 = vector.load %arg6[%c0_15, %c0_16] : memref<1024x128xbf16, #tpu.memory_space<vmem>>, vector<1024x128xbf16>
    %cst_17 = arith.constant dense<0.000000e+00> : vector<256x128xf32>
    %33 = tpu.matmul %31, %32, %cst_17 {dimension_numbers = #tpu.dot_dimension_numbers<[1], [0], [0], [1], [0, 0, 1, 1], [], []>} : vector<256x1024xbf16>, vector<1024x128xbf16>, vector<256x128xf32> -> vector<256x128xf32>
    %c0_18 = arith.constant 0 : index
    %c0_19 = arith.constant 0 : index
    %34 = vector.load %arg7[%c0_18, %c0_19] : memref<1x128xf32, #tpu.memory_space<vmem>>, vector<1x128xf32>
    %35 = vector.broadcast %34 : vector<1x128xf32> to vector<256x128xf32>
    %36 = arith.addf %33, %35 : vector<256x128xf32>
    %37 = arith.addf %0, %36 : vector<256x128xf32>
    %c0_20 = arith.constant 0 : index
    %c0_21 = arith.constant 0 : index
    %38 = vector.load %arg8[%c0_20, %c0_21] : memref<256x128xf32, #tpu.memory_space<vmem>>, vector<256x128xf32>
    tpu.vector_store %arg8[%c0_20, %c0_21], %37 {strides = array<i32>} : memref<256x128xf32, #tpu.memory_space<vmem>>, vector<256x128xf32>,
    return
  }
  func.func @transform_0(%arg0: i32) -> (i32, i32) {
    %c0_i32 = arith.constant 0 : i32
    %c0_i32_0 = arith.constant 0 : i32
    return %arg0, %c0_i32 : i32, i32
  }
  func.func @transform_1(%arg0: i32) -> (i32, i32) {
    %c0_i32 = arith.constant 0 : i32
    %c0_i32_0 = arith.constant 0 : i32
    %c0_i32_1 = arith.constant 0 : i32
    return %c0_i32, %c0_i32_0 : i32, i32
  }
  func.func @transform_2(%arg0: i32) -> (i32, i32) {
    %c0_i32 = arith.constant 0 : i32
    %c0_i32_0 = arith.constant 0 : i32
    %c0_i32_1 = arith.constant 0 : i32
    return %c0_i32, %c0_i32_0 : i32, i32
  }
  func.func @transform_3(%arg0: i32) -> (i32, i32) {
    %c0_i32 = arith.constant 0 : i32
    %c0_i32_0 = arith.constant 0 : i32
    %c0_i32_1 = arith.constant 0 : i32
    return %c0_i32, %c0_i32_0 : i32, i32
  }
  func.func @transform_4(%arg0: i32) -> (i32, i32) {
    %c0_i32 = arith.constant 0 : i32
    %c0_i32_0 = arith.constant 0 : i32
    %c0_i32_1 = arith.constant 0 : i32
    return %c0_i32, %c0_i32_0 : i32, i32
  }
  func.func @transform_5(%arg0: i32) -> (i32, i32) {
    %c0_i32 = arith.constant 0 : i32
    %c0_i32_0 = arith.constant 0 : i32
    %c0_i32_1 = arith.constant 0 : i32
    return %c0_i32, %c0_i32_0 : i32, i32
  }
  func.func @transform_6(%arg0: i32) -> (i32, i32) {
    %c0_i32 = arith.constant 0 : i32
    %c0_i32_0 = arith.constant 0 : i32
    %c0_i32_1 = arith.constant 0 : i32
    return %c0_i32, %c0_i32_0 : i32, i32
  }
  func.func @transform_7(%arg0: i32) -> (i32, i32) {
    %c0_i32 = arith.constant 0 : i32
    %c0_i32_0 = arith.constant 0 : i32
    return %arg0, %c0_i32 : i32, i32
  }
}

</mosaic_0001>

<bundles_post_ra>
// kernel: tpu_custom_call.1
= control target key start
LH: loop header
LB: loop body
LE: loop exit
PB: predicated region body
PF: predicated region fallthrough
CT: control target
= control target key end

     0   :  { %s7284_s0 = inlined_call_operand.hbm [shape: f32[512,128], index: 0, kind: input, shape index: {}]   ;;  %s7285_s1 = inlined_call_operand.hbm [shape: f32[1,128], index: 1, kind: input, shape index: {}]   ;;  %s7286_s2 = inlined_call_operand.vmem [shape: f32[1,128], index: 2, kind: input, shape index: {}]   ;;  %s7287_s3 = inlined_call_operand.hbm [shape: bf16[128,1024], index: 3, kind: input, shape index: {}]   ;;  %s7288_s4 = inlined_call_operand.hbm [shape: f32[1,1024], index: 4, kind: input, shape index: {}]   ;;  %s7289_s5 = inlined_call_operand.hbm [shape: bf16[1024,128], index: 5, kind: input, shape index: {}]   ;;  %s7290_s6 = inlined_call_operand.vmem [shape: f32[1,128], index: 6, kind: input, shape index: {}]   ;;  %s7291_s7 = inlined_call_operand.hbm [shape: f32[512,128], index: 7, kind: output, shape index: {}]  }
   0x1   :  { %7292 = sst [smem:[#allocation135_spill]] %s7285_s1 }
   0x2   :  { %12 = vsyncpa [#allocation3], 0 }
   0x3   :  { %14 = vsyncpa [#allocation3 + $0x1], 0 }
   0x4   :  { %15 = vsyncpa [#allocation6], 0 }
   0x5   :  { %16 = vsyncpa [#allocation9], 0 }
   0x6   :  { %17 = vsyncpa [#allocation4], 0 }
   0x7   :  { %19 = vsyncpa [#allocation4 + $0x1], 0  ;;  %s5189_s24 = smov 0   ;;  %s5191_s25 = smov 0  }
   0x8   :  { %s5193_s26 = smov 0   ;;  %s5195_s27 = smov 0  }
   0x9 LB: > { %s5210_s28 = sadd.s32 4294967295, %s5134_s27   ;;  %s4047_s29 = sadd.s32 4294967294, %s5134_s27   ;;  %s5134_s27 = sphi %s5195_s27, %s7606_s27   ;;  %s5130_s26 = sphi %s5193_s26, %s7605_s26   ;;  %s5126_s25 = sphi %s5191_s25, %s7604_s25   ;;  %s5122_s24 = sphi %s5189_s24, %s7603_s24  }
   0xa   : > { %p45_p0 = scmp.ne.s32.totalorder %s5126_s25, %s5122_s24  ;;  %p46_p1 = scmp.eq.s32.totalorder %s5210_s28, 0 }
   0xb   : > { %p195_p2 = scmp.eq.s32.totalorder %s5210_s28, 1  ;;  %p201_p3 = scmp.eq.s32.totalorder %s4047_s29, 1 }
   0xc   : > { %p5219_p4 = por %p46_p1, %p45_p0  ;;  %p4048_p5 = scmp.ge.s32.totalorder %s5134_s27, 1 }
   0xd   : > { %p5224_p6 = por %p201_p3, %p45_p0  ;;  %p208_p7 = scmp.lt.s32.totalorder %s5134_s27, 3 }
   0xe   : > { %s7295_s1 = sld [smem:[#allocation135_spill]]  ;;  %s5136_s13 = smov [#allocation5]  }
   0xf   : > { %p5232_p8 = pnand %p4048_p5, %p208_p7  ;;  %s222_s14 = sshll.u32 %s5136_s13, 4  ;;  %s223_s14 = int_to_ptr.vmem [resolvable:$true] %s222_s14 }
  0x10   : > { %s249_s17 = sshll.u32 %s7288_s4, 4  ;;  %s234_s21 = sshll.u32 %s7287_s3, 4  ;;  %s250_s17 = int_to_ptr.hbm [resolvable:$true] %s249_s17  ;;  %s235_s21 = int_to_ptr.hbm [resolvable:$true] %s234_s21 }
  0x11   : > { %p4731_p10 = pneg %p5232_p8  ;;  %s5137_s22 = smov [#allocation8]  }
  0x12   : > { %s251_s23 = sshll.u32 %s5137_s22, 4  ;;  %s5138_s29 = smov [#allocation7]   ;;  %s252_s23 = int_to_ptr.vmem [resolvable:$true] %s251_s23 }
  0x13   : > { %p5244_p11 = pnand %p4731_p10, %p46_p1  ;;  %s236_s9 = sshll.u32 %s5138_s29, 4  ;;  %s237_s9 = int_to_ptr.vmem [resolvable:$true] %s236_s9 }
  0x14   : > { %s220_s11 = sshll.u32 %s7295_s1, 4  ;;  %s260_s15 = sshll.u32 %s7289_s5, 4  ;;  %s221_s11 = int_to_ptr.hbm [resolvable:$true] %s220_s11  ;;  %s261_s15 = int_to_ptr.hbm [resolvable:$true] %s260_s15 }
  0x15   : > { %4734 = dma.hbm_to_vmem [thread:$0]  (!%p5244_p11), %s221_s11, 16, %s223_s14, [#allocation6]  }
  0x16   : > { %4740 = dma.hbm_to_vmem [thread:$0]  (!%p5244_p11), %s250_s17, 128, %s252_s23, [#allocation9]  }
  0x17   : > { %s5139_s16 = smov 512   ;;  %s5140_s11 = smov 32  }
  0x18   : > { %4737 = dma.hbm_to_vmem [thread:$0]  (!%p5244_p11), %s235_s21, 8192, %s237_s9, [#allocation6], %s5139_s16, %s5139_s16, %s5140_s11  }
  0x19   : > { %s5141_s14 = smov [#allocation10]   ;;  %s5142_s19 = smov 64  }
  0x1a   : > { %s262_s17 = sshll.u32 %s5141_s14, 4  ;;  %s5143_s20 = smov 4   ;;  %s263_s17 = int_to_ptr.vmem [resolvable:$true] %s262_s17 }
  0x1b   : > { %4743 = dma.hbm_to_vmem [thread:$0]  (!%p5244_p11), %s261_s15, 8192, %s263_s17, [#allocation9], %s5142_s19, %s5142_s19, %s5143_s20  }
  0x1c   : > { %s5263_s22 = sadd.s32 1, %s5134_s27   ;;  %s32_s29 = sadd.s32 1, %s5130_s26 }
  0x1d   : > { %s29_s23 = ssub.s32 %s5134_s27, %s5263_s22  ;;  %p39_p13 = scmp.ne.s32.totalorder %s5130_s26, %s5126_s25 }
  0x1e   : > { %p30_p12 = scmp.eq.s32.totalorder %s29_s23, 0  ;;  %p40_p0 = scmp.eq.s32.totalorder %s5134_s27, 0 }
  0x1f   : > { %p5276_p5 = por %p195_p2, %p39_p13  ;;  %p4756_p7 = scmp.lt.s32.totalorder %s5134_s27, 2 }
  0x20   : > { %s5272_s21 = scalar_select %p30_p12, %s5130_s26, %s32_s29  }
  0x21   : > { %p41_p3 = por %p40_p0, %p39_p13  ;;  %s279_s10 = sand.u32 1, %s5130_s26  }
  0x22   : > { %s4054_s18 = sshll.u32 %s279_s10, 8  ;;  %s4581_s13 = sshll.u32 %s5134_s27, 8 }
  0x23   : > { %s288_s11 = scalar_lea.hbm %s7284_s0, %s4581_s13  ;;  %s283_s14 = scalar_lea.vmem [#allocation2], %s4054_s18 }
  0x24   : > { %s291_s17 = sshll.u32 %s283_s14, 4  ;;  %s289_s19 = sshll.u32 %s288_s11, 4  ;;  %s292_s17 = int_to_ptr.vmem [resolvable:$true] %s291_s17  ;;  %s290_s19 = int_to_ptr.hbm [resolvable:$true] %s289_s19 }
  0x25   : > { %p5286_p10 = pnand %p4756_p7, %p41_p3  ;;  %s280_s23 = scalar_lea.sflag [#allocation3], %s279_s10 }
  0x26   : > { %s5030_s29 = sshra.s32 %s290_s19, 4  ;;  %s5037_s15 = scalar_lea.hbm %s7284_s0, 512  ;;  %s5031_s29 = int_to_ptr.hbm [resolvable:$true] %s5030_s29 }
  0x27   : > { %s5032_s1 = scalar_lea.hbm %s5031_s29, 256  ;;  %p5034_p11 = pneg %p5286_p10 }
  0x28   : > { %p5033_p2 = scmp.ne.s32.totalorder %s5031_s29, %s5032_s1  ;;  %p5038_p0 = scmp.lt.s32.totalorder %s5031_s29, %s7284_s0 }
  0x29   : > { %p5039_p3 = scmp.lt.s32.totalorder %s5037_s15, %s5032_s1 }
  0x2a   : > { %p5035_p12 = pnand %p5034_p11, %p5033_p2 }
  0x2b   : > { %p5040_p7 = por %p5039_p3, %p5038_p0 }
  0x2c   : > { %p5036_p13 = pneg %p5035_p12 }
  0x2e   : > { %p5041_p9 = pnand %p5040_p7, %p5036_p13 }
  0x30   : > { %5044 = shalt.err (!%p5041_p9)
}
  0x31   : > { %s5144_s10 = smov 128   ;;  %s5145_s14 = smov 8  }
  0x32   : > { %4747 = dma.hbm_to_vmem [thread:$0]  (!%p5286_p10), %s290_s19, 4096, %s292_s17, %s280_s23, %s5144_s10, %s5144_s10, %s5145_s14  }
  0x33   : > { %303 = sbr.rel (%p5232_p8) target bundleno = 1799 (0x707), region = 48 }
  0x38   : > { %s5303_s13 = sand.u32 1, %s5126_s25  }
  0x39   : > { %s4058_s29 = sshll.u32 %s5303_s13, 8  ;;  %s306_s1 = scalar_lea.sflag [#allocation3], %s5303_s13 }
  0x3a   : > { %s5309_s18 = scalar_lea.vmem [#allocation2], %s4058_s29 }
  0x3b   : > { %5105 = dma.done.wait (%p5219_p4), %s306_s1, 4096  }
  0x3c   : > { %5107 = vsyncadd (%p5219_p4), %s306_s1, 4294963200 }
  0x3d   : > { %5109 = dma.done.wait (%p46_p1), [#allocation6], 8208  }
  0x3e   : > { %5111 = vsyncadd (%p46_p1), [#allocation6], 4294959088 }
  0x3f   : > { %5113 = dma.done.wait (%p46_p1), [#allocation9], 8320  }
  0x40   : > { %5115 = vsyncadd (%p46_p1), [#allocation9], 4294958976  ;;  %v365_v0 = vld [vmem:[%s5309_s18 + $0x10] sm:$0xff]  ;;  %v363_v1 = vld [vmem:[%s5309_s18] sm:$0xff]  ;;  %v5146_v7 = vmov 128.0   ;;  %s7127_s15 = scalar_lea.vmem [#allocation11], %s4058_s29 }
  0x41   : > { %399 = vadd.xlane.f32.xlu1 %v365_v0  ;;  %395 = vadd.xlane.f32.xlu0 %v363_v1  ;;  %v367_v2 = vld [vmem:[%s5309_s18 + $0x20] sm:$0xff]  ;;  %v366_v3 = vld [vmem:[%s5309_s18 + $0x18] sm:$0xff]  ;;  %v364_v4 = vld [vmem:[%s5309_s18 + $0x8] sm:$0xff]  ;;  %4810 = vrcp.f32 %v5146_v7  ;;  %s4710_s16 = sshll.u32 %s5210_s28, 8  ;;  %s3933_s29 = sshll.u32 %s7127_s15, 4  ;;  %s3934_s29 = int_to_ptr.vmem [resolvable:$true] %s3933_s29 }
  0x42   : > { %403 = vadd.xlane.f32.xlu2 %v367_v2  ;;  %v368_v5 = vld [vmem:[%s5309_s18 + $0x28] sm:$0xff]  ;;  %v369_v6 = vld [vmem:[%s5309_s18 + $0x30] sm:$0xff]  ;;  %v5346_v28 = vld [vmem:[%s5309_s18 + $0x38] sm:$0xff]  ;;  %s3932_s14 = scalar_lea.hbm %s7291_s7, %s4710_s16  ;;  %s3921_s28 = scalar_lea.sflag [#allocation4], %s5303_s13 }
  0x43   : > { %v5361_v36 = vld [vmem:[%s5309_s18 + $0x40] sm:$0xff]  ;;  %v5372_v42 = vld [vmem:[%s5309_s18 + $0x58] sm:$0xff]  ;;  %v5375_v43 = vld [vmem:[%s5309_s18 + $0x48] sm:$0xff]  ;;  %s3935_s1 = sshll.u32 %s3932_s14, 4  ;;  %s5080_s20 = scalar_lea.hbm %s7291_s7, 512  ;;  %s3936_s1 = int_to_ptr.hbm [resolvable:$true] %s3935_s1 }
  0x44   : > { %v5384_v46 = vld [vmem:[%s5309_s18 + $0x60] sm:$0xff]  ;;  %v5387_v47 = vld [vmem:[%s5309_s18 + $0x50] sm:$0xff]  ;;  %v5392_v48 = vld [vmem:[%s5309_s18 + $0x68] sm:$0xff]  ;;  %s5074_s30 = sshra.s32 %s3936_s1, 4  ;;  %s5075_s30 = int_to_ptr.hbm [resolvable:$true] %s5074_s30 }
  0x45   : > { %v5396_v49 = vld [vmem:[%s5309_s18 + $0x70] sm:$0xff]  ;;  %v4290_v50 = vld [vmem:[#allocation7 + $0x1c0] sm:$0xf]  ;;  %v4638_v52 = vld [vmem:[#allocation7 + $0x1c4] sm:$0xf]  ;;  %s5076_s12 = scalar_lea.hbm %s5075_s30, 256  ;;  %p5081_p9 = scmp.lt.s32.totalorder %s5075_s30, %s7291_s7 }
  0x46   : > { %v4642_v51 = vld [vmem:[#allocation7 + $0x1dc] sm:$0xf0]  ;;  %v4292_v54 = vld [vmem:[#allocation7 + $0x1e0] sm:$0xf0]  ;;  %v4298_v55 = vld [vmem:[#allocation7 + $0x1c8] sm:$0xf]  ;;  %p5077_p1 = scmp.ne.s32.totalorder %s5075_s30, %s5076_s12  ;;  %p5082_p10 = scmp.lt.s32.totalorder %s5080_s20, %s5076_s12 }
  0x47   : > { %v4811_v8 = vpop.eup %4810  ;;  %v4291_v53 = vor.u32 %v4642_v51, %v4290_v50  ;;  %v4643_v56 = vld [vmem:[#allocation7 + $0x1e4] sm:$0xf0]  ;;  %v4295_v57 = vor.u32 %v4638_v52, %v4292_v54  ;;  %v4639_v59 = vld [vmem:[#allocation7 + $0x1cc] sm:$0xf]  ;;  %v4258_v62 = vld [vmem:[#allocation7 + $0x180] sm:$0xf] }
  0x48   : > { %v460_v9 = vmul.f32 128.0, %v4811_v8  ;;  %vm464_vm0 = vweird.f32 %v4811_v8  ;;  %v4299_v58 = vor.u32 %v4643_v56, %v4298_v55  ;;  %v4300_v60 = vld [vmem:[#allocation7 + $0x1e8] sm:$0xf0]  ;;  %v4634_v63 = vld [vmem:[#allocation7 + $0x19c] sm:$0xf0]  ;;  %p5078_p4 = pnand %p5077_p1, %p5276_p5  ;;  %p5083_p2 = por %p5082_p10, %p5081_p9 }
  0x49   : > { %401 = vadd.xlane.f32.xlu1 %v366_v3  ;;  %397 = vadd.xlane.f32.xlu0 %v364_v4  ;;  %v4303_v61 = vor.u32 %v4639_v59, %v4300_v60  ;;  %v4631_v7 = vld [vmem:[#allocation7 + $0x18c] sm:$0xf]  ;;  %v4162_v50 = vld [vmem:[#allocation7 + $0xc0] sm:$0xf]  ;;  %v4606_v52 = vld [vmem:[#allocation7 + $0xc4] sm:$0xf] }
  0x4a   : > { %405 = vadd.xlane.f32.xlu2 %v368_v5  ;;  %v461_v10 = vsub.f32 1.0, %v460_v9  ;;  %1532 = vmatpush.bf16.msra.mxu0 %v4291_v53  ;;  %v4610_v51 = vld [vmem:[#allocation7 + $0xdc] sm:$0xf0]  ;;  %v4164_v54 = vld [vmem:[#allocation7 + $0xe0] sm:$0xf0]  ;;  %p5079_p8 = pneg %p5078_p4 }
  0x4b   : > { %1621 = vmatpush.bf16.msra.mxu1 %v4295_v57  ;;  %1710 = vmatpush.bf16.msra.mxu2 %v4299_v58  ;;  %v4163_v53 = vor.u32 %v4610_v51, %v4162_v50  ;;  %v4170_v55 = vld [vmem:[#allocation7 + $0xc8] sm:$0xf]  ;;  %v4167_v57 = vor.u32 %v4606_v52, %v4164_v54  ;;  %v4607_v59 = vld [vmem:[#allocation7 + $0xcc] sm:$0xf] }
  0x4c   : > { %v462_v11 = vmul.f32 %v4811_v8, %v461_v10  ;;  %1799 = vmatpush.bf16.msra.mxu3 %v4303_v61  ;;  %v4226_v10 = vld [vmem:[#allocation7 + $0x140] sm:$0xf]  ;;  %v4611_v56 = vld [vmem:[#allocation7 + $0xe4] sm:$0xf0]  ;;  %v4172_v60 = vld [vmem:[#allocation7 + $0xe8] sm:$0xf0]  ;;  %p5084_p11 = pnand %p5083_p2, %p5079_p8 }
  0x4d   : > { %v4171_v58 = vor.u32 %v4611_v56, %v4170_v55  ;;  %v4175_v61 = vor.u32 %v4607_v59, %v4172_v60  ;;  %v4076_v50 = vld [vmem:[#allocation7 + $0x28] sm:$0xf0] }
  0x4e   : > { %v463_v12 = vadd.f32 %v4811_v8, %v462_v11  ;;  %v4626_v11 = vld [vmem:[#allocation7 + $0x15c] sm:$0xf0] }
  0x50   : > { %v5330_v13 = vsel %vm464_vm0, %v4811_v8, %v463_v12  ;;  %v4268_v8 = vld [vmem:[#allocation7 + $0x1a8] sm:$0xf0]  ;;  %v4622_v12 = vld [vmem:[#allocation7 + $0x144] sm:$0xf] }
  0x51   : > { %v4271_v9 = vor.u32 %v4631_v7, %v4268_v8  ;;  %v4599_v7 = vld [vmem:[#allocation7 + $0x8c] sm:$0xf] }
  0x52   : > { %407 = vadd.xlane.f32.xlu2 %v369_v6  ;;  %v4140_v8 = vld [vmem:[#allocation7 + $0xa8] sm:$0xf0] }
  0x53   : > { %1800 = vmatpush.bf16.msra.mxu3 %v4271_v9  ;;  %v4143_v9 = vor.u32 %v4599_v7, %v4140_v8 }
  0xb4   : > { %v400_v14 = vpop.xlane.xlu1 %399  ;;  %v396_v15 = vpop.xlane.xlu0 %395 }
  0xb5   : > { %v466_v16 = vmul.f32 %v5330_v13, %v396_v15  ;;  %v404_v18 = vpop.xlane.xlu2 %403  ;;  %v468_v27 = vmul.f32 %v5330_v13, %v400_v14  ;;  %v4227_v14 = vor.u32 %v4626_v11, %v4226_v10  ;;  %v4228_v15 = vld [vmem:[#allocation7 + $0x160] sm:$0xf0]  ;;  %v4098_v10 = vld [vmem:[#allocation7 + $0x40] sm:$0xf] }
  0xb6   : > { %v470_v26 = vmul.f32 %v5330_v13, %v404_v18  ;;  %v4627_v18 = vld [vmem:[#allocation7 + $0x164] sm:$0xf0]  ;;  %v4594_v11 = vld [vmem:[#allocation7 + $0x5c] sm:$0xf0] }
  0xb7   : > { %v5333_v17 = vsub.f32 %v363_v1, %v466_v16  ;;  %v5355_v33 = vsub.f32 %v365_v0, %v468_v27  ;;  %v4630_v0 = vld [vmem:[#allocation7 + $0x184] sm:$0xf]  ;;  %v4259_v1 = vor.u32 %v4634_v63, %v4258_v62  ;;  %v4234_v16 = vld [vmem:[#allocation7 + $0x148] sm:$0xf]  ;;  %v4618_v27 = vld [vmem:[#allocation7 + $0x11c] sm:$0xf0] }
  0xb8   : > { %v5353_v32 = vsub.f32 %v367_v2, %v470_v26  ;;  %v4260_v2 = vld [vmem:[#allocation7 + $0x1a0] sm:$0xf0]  ;;  %v4194_v26 = vld [vmem:[#allocation7 + $0x100] sm:$0xf] }
  0xb9   : > { %v530_v19 = vmul.f32 %v5333_v17, %v5333_v17  ;;  %v532_v37 = vmul.f32 %v5355_v33, %v5355_v33  ;;  %1533 = vmatpush.bf16.msra.mxu0 %v4259_v1  ;;  %v4130_v62 = vld [vmem:[#allocation7 + $0x80] sm:$0xf] }
  0xba   : > { %v534_v34 = vmul.f32 %v5353_v32, %v5353_v32  ;;  %v4602_v63 = vld [vmem:[#allocation7 + $0x9c] sm:$0xf0] }
  0xbb   : > { %562 = vadd.xlane.f32.xlu0 %v530_v19  ;;  %v4231_v19 = vor.u32 %v4622_v12, %v4228_v15  ;;  %v4131_v1 = vor.u32 %v4602_v63, %v4130_v62  ;;  %v4590_v12 = vld [vmem:[#allocation7 + $0x44] sm:$0xf]  ;;  %v4099_v15 = vor.u32 %v4594_v11, %v4098_v10 }
  0xbc   : > { %v402_v20 = vpop.xlane.xlu1 %401  ;;  %v398_v21 = vpop.xlane.xlu0 %397 }
  0xbd   : > { %v469_v22 = vmul.f32 %v5330_v13, %v402_v20  ;;  %v467_v23 = vmul.f32 %v5330_v13, %v398_v21  ;;  %v406_v31 = vpop.xlane.xlu2 %405  ;;  %v4235_v20 = vor.u32 %v4627_v18, %v4234_v16  ;;  %v4623_v21 = vld [vmem:[#allocation7 + $0x14c] sm:$0xf]  ;;  %1534 = vmatpush.bf16.msra.mxu0 %v4227_v14  ;;  %v4100_v16 = vld [vmem:[#allocation7 + $0x60] sm:$0xf0]  ;;  %v4106_v18 = vld [vmem:[#allocation7 + $0x48] sm:$0xf] }
  0xbe   : > { %v471_v35 = vmul.f32 %v5330_v13, %v406_v31  ;;  %v4196_v31 = vld [vmem:[#allocation7 + $0x120] sm:$0xf0] }
  0xbf   : > { %v5339_v24 = vsub.f32 %v366_v3, %v469_v22  ;;  %v5341_v25 = vsub.f32 %v364_v4, %v467_v23  ;;  %v4266_v3 = vld [vmem:[#allocation7 + $0x188] sm:$0xf]  ;;  %v4236_v22 = vld [vmem:[#allocation7 + $0x168] sm:$0xf0] }
  0xc0   : > { %v5366_v38 = vsub.f32 %v368_v5, %v471_v35  ;;  %v4635_v4 = vld [vmem:[#allocation7 + $0x1a4] sm:$0xf0]  ;;  %v4263_v5 = vor.u32 %v4630_v0, %v4260_v2  ;;  %v4239_v23 = vor.u32 %v4623_v21, %v4236_v22  ;;  %v4598_v0 = vld [vmem:[#allocation7 + $0x84] sm:$0xf]  ;;  %v4591_v22 = vld [vmem:[#allocation7 + $0x4c] sm:$0xf] }
  0xc1   : > { %v533_v29 = vmul.f32 %v5339_v24, %v5339_v24  ;;  %v531_v30 = vmul.f32 %v5341_v25, %v5341_v25  ;;  %v4619_v35 = vld [vmem:[#allocation7 + $0x124] sm:$0xf0]  ;;  %v4132_v2 = vld [vmem:[#allocation7 + $0xa0] sm:$0xf0] }
  0xc2   : > { %v535_v40 = vmul.f32 %v5366_v38, %v5366_v38  ;;  %1622 = vmatpush.bf16.msra.mxu1 %v4263_v5  ;;  %1801 = vmatpush.bf16.msra.mxu3 %v4239_v23  ;;  %v4135_v5 = vor.u32 %v4598_v0, %v4132_v2  ;;  %v4595_v21 = vld [vmem:[#allocation7 + $0x64] sm:$0xf0]  ;;  %v4108_v23 = vld [vmem:[#allocation7 + $0x68] sm:$0xf0] }
  0xc3   : > { %568 = vadd.xlane.f32.xlu2 %v533_v29  ;;  %409 = vadd.xlane.f32.xlu0 %v5346_v28  ;;  %v4614_v29 = vld [vmem:[#allocation7 + $0x104] sm:$0xf] }
  0xc4   : > { %564 = vadd.xlane.f32.xlu1 %v531_v30  ;;  %v4195_v30 = vor.u32 %v4618_v27, %v4194_v26  ;;  %v4107_v26 = vor.u32 %v4595_v21, %v4106_v18  ;;  %v4111_v27 = vor.u32 %v4591_v22, %v4108_v23 }
  0xc5   : > { %v408_v39 = vpop.xlane.xlu2 %407 }
  0xc6   : > { %v472_v41 = vmul.f32 %v5330_v13, %v408_v39  ;;  %1623 = vmatpush.bf16.msra.mxu1 %v4231_v19  ;;  %1535 = vmatpush.bf16.msra.mxu0 %v4195_v30  ;;  %v4066_v30 = vld [vmem:[#allocation7] sm:$0xf] }
  0xc8   : > { %v5378_v44 = vsub.f32 %v369_v6, %v472_v41  ;;  %v4267_v6 = vor.u32 %v4635_v4, %v4266_v3  ;;  %v4204_v41 = vld [vmem:[#allocation7 + $0x128] sm:$0xf0]  ;;  %v4138_v3 = vld [vmem:[#allocation7 + $0x88] sm:$0xf] }
  0xc9   : > { %v4603_v4 = vld [vmem:[#allocation7 + $0xa4] sm:$0xf0] }
  0xca   : > { %v536_v45 = vmul.f32 %v5378_v44, %v5378_v44  ;;  %1711 = vmatpush.bf16.msra.mxu2 %v4267_v6  ;;  %1536 = vmatpush.bf16.msra.mxu0 %v4163_v53  ;;  %v4139_v6 = vor.u32 %v4603_v4, %v4138_v3 }
  0xcb   : > { %570 = vadd.xlane.f32.xlu2 %v534_v34  ;;  %411 = vadd.xlane.f32.xlu0 %v5361_v36  ;;  %v4202_v34 = vld [vmem:[#allocation7 + $0x108] sm:$0xf] }
  0xcc   : > { %566 = vadd.xlane.f32.xlu1 %v532_v37  ;;  %v4199_v37 = vor.u32 %v4614_v29, %v4196_v31  ;;  %v4203_v39 = vor.u32 %v4619_v35, %v4202_v34  ;;  %v4586_v31 = vld [vmem:[#allocation7 + $0x1c] sm:$0xf0]  ;;  %v4582_v35 = vld [vmem:[#allocation7 + $0x4] sm:$0xf] }
  0xcd   : > { %v4067_v34 = vor.u32 %v4586_v31, %v4066_v30 }
  0xce   : > { %1712 = vmatpush.bf16.msra.mxu2 %v4235_v20  ;;  %1624 = vmatpush.bf16.msra.mxu1 %v4199_v37  ;;  %v4103_v20 = vor.u32 %v4590_v12, %v4100_v16  ;;  %v4068_v37 = vld [vmem:[#allocation7 + $0x20] sm:$0xf0] }
  0xcf   : > { %1537 = vmatpush.bf16.msra.mxu0 %v4131_v1 }
  0xd2   : > { %1713 = vmatpush.bf16.msra.mxu2 %v4203_v39  ;;  %1625 = vmatpush.bf16.msra.mxu1 %v4167_v57  ;;  %v4074_v39 = vld [vmem:[#allocation7 + $0x8] sm:$0xf] }
  0xd3   : > { %417 = vadd.xlane.f32.xlu2 %v5372_v42  ;;  %572 = vadd.xlane.f32.xlu0 %v535_v40  ;;  %v4615_v40 = vld [vmem:[#allocation7 + $0x10c] sm:$0xf] }
  0xd4   : > { %413 = vadd.xlane.f32.xlu1 %v5375_v43  ;;  %1538 = vmatpush.bf16.msra.mxu0 %v4099_v15 }
  0xd6   : > { %1714 = vmatpush.bf16.msra.mxu2 %v4171_v58  ;;  %1626 = vmatpush.bf16.msra.mxu1 %v4135_v5 }
  0xd8   : > { %1539 = vmatpush.bf16.msra.mxu0 %v4067_v34 }
  0xda   : > { %1715 = vmatpush.bf16.msra.mxu2 %v4139_v6  ;;  %1627 = vmatpush.bf16.msra.mxu1 %v4103_v20 }
  0xdb   : > { %419 = vadd.xlane.f32.xlu2 %v5384_v46  ;;  %574 = vadd.xlane.f32.xlu0 %v536_v45  ;;  %v4207_v45 = vor.u32 %v4615_v40, %v4204_v41  ;;  %v4071_v40 = vor.u32 %v4582_v35, %v4068_v37  ;;  %v4587_v41 = vld [vmem:[#allocation7 + $0x24] sm:$0xf0] }
  0xdc   : > { %415 = vadd.xlane.f32.xlu1 %v5387_v47  ;;  %v4075_v51 = vor.u32 %v4587_v41, %v4074_v39  ;;  %v5443_v41 = vld [vmem:[#allocation5] ss:$0 sm:$0xff] }
  0xdd   : > { %1802 = vmatpush.bf16.msra.mxu3 %v4207_v45  ;;  %v4583_v45 = vld [vmem:[#allocation7 + $0xc] sm:$0xf] }
  0xde   : > { %1716 = vmatpush.bf16.msra.mxu2 %v4107_v26  ;;  %v4079_v52 = vor.u32 %v4583_v45, %v4076_v50  ;;  %1628 = vmatpush.bf16.msra.mxu1 %v4071_v40 }
  0xe1   : > { %1803 = vmatpush.bf16.msra.mxu3 %v4175_v61 }
  0xe2   : > { %1717 = vmatpush.bf16.msra.mxu2 %v4075_v51 }
  0xe3   : > { %421 = vadd.xlane.f32.xlu0 %v5392_v48 }
  0xe5   : > { %1804 = vmatpush.bf16.msra.mxu3 %v4143_v9 }
  0xe9   : > { %1805 = vmatpush.bf16.msra.mxu3 %v4111_v27 }
  0xeb   : > { %423 = vadd.xlane.f32.xlu0 %v5396_v49 }
  0xed   : > { %1806 = vmatpush.bf16.msra.mxu3 %v4079_v52 }
 0x12e   : > { %v563_v14 = vpop.xlane.xlu0 %562 }
 0x12f   : > { %v626_v19 = vmul.f32 %v563_v14, %v5330_v13 }
 0x131   : > { %v658_v29 = vadd.f32 1e-05, %v626_v19 }
 0x133   : > { %4812 = vrsqrt.f32 %v658_v29  ;;  %vm696_vm2 = vweird.f32 %v658_v29 }
 0x136   : > { %v569_v53 = vpop.xlane.xlu2 %568  ;;  %v410_v54 = vpop.xlane.xlu0 %409 }
 0x137   : > { %v629_v55 = vmul.f32 %v569_v53, %v5330_v13  ;;  %v565_v56 = vpop.xlane.xlu1 %564  ;;  %v473_v57 = vmul.f32 %v5330_v13, %v410_v54  ;;  %v5457_v54 = vld [vmem:[%s5309_s18 + $0x78] sm:$0xff] }
 0x138   : > { %v627_v58 = vmul.f32 %v565_v56, %v5330_v13 }
 0x139   : > { %v4813_v59 = vpop.eup %4812  ;;  %v5403_v60 = vadd.f32 1e-05, %v629_v55  ;;  %v5406_v61 = vsub.f32 %v5346_v28, %v473_v57 }
 0x13a   : > { %v691_v62 = vmul.f32 %v4813_v59, %v658_v29  ;;  %v659_v63 = vadd.f32 1e-05, %v627_v58  ;;  %vm697_vm1 = vweird.f32 %v4813_v59 }
 0x13b   : > { %4814 = vrsqrt.f32 %v5403_v60  ;;  %v537_v0 = vmul.f32 %v5406_v61, %v5406_v61  ;;  %vm5424_vm3 = vmor %vm696_vm2, %vm697_vm1  ;;  %vm726_vm9 = vweird.f32 %v5403_v60 }
 0x13c   : > { %v692_v1 = vmul.f32 %v4813_v59, %v691_v62  ;;  %4816 = vrsqrt.f32 %v659_v63  ;;  %vm706_vm4 = vweird.f32 %v659_v63 }
 0x13d   : > { %576 = vadd.xlane.f32.xlu1 %v537_v0 }
 0x13e   : > { %v693_v2 = vmul.f32 0.5, %v692_v1  ;;  %v571_v3 = vpop.xlane.xlu2 %570  ;;  %v412_v4 = vpop.xlane.xlu0 %411 }
 0x13f   : > { %v567_v5 = vpop.xlane.xlu1 %566  ;;  %v474_v6 = vmul.f32 %v5330_v13, %v412_v4  ;;  %v630_v12 = vmul.f32 %v571_v3, %v5330_v13 }
 0x140   : > { %v694_v7 = vsub.f32 1.5, %v693_v2  ;;  %v628_v28 = vmul.f32 %v567_v5, %v5330_v13 }
 0x141   : > { %v5413_v8 = vpop.eup %4814  ;;  %v5416_v9 = vsub.f32 %v5361_v36, %v474_v6  ;;  %v5432_v21 = vadd.f32 1e-05, %v630_v12 }
 0x142   : > { %v4817_v10 = vpop.eup %4816  ;;  %v695_v11 = vmul.f32 %v4813_v59, %v694_v7  ;;  %v5419_v14 = vadd.f32 1e-05, %v628_v28  ;;  %v721_v15 = vmul.f32 %v5413_v8, %v5403_v60  ;;  %vm727_vm10 = vweird.f32 %v5413_v8 }
 0x143   : > { %v701_v16 = vmul.f32 %v4817_v10, %v659_v63  ;;  %v538_v19 = vmul.f32 %v5416_v9, %v5416_v9  ;;  %vm707_vm5 = vweird.f32 %v4817_v10  ;;  %vm5501_vm12 = vmor %vm726_vm9, %vm727_vm10  ;;  %vm736_vm15 = vweird.f32 %v5432_v21 }
 0x144   : > { %4818 = vrsqrt.f32 %v5419_v14  ;;  %v699_v20 = vsel %vm5424_vm3, %v4813_v59, %v695_v11  ;;  %v722_v26 = vmul.f32 %v5413_v8, %v721_v15  ;;  %vm708_vm6 = vmor %vm706_vm4, %vm707_vm5  ;;  %vm716_vm7 = vweird.f32 %v5419_v14 }
 0x145   : > { %v702_v36 = vmul.f32 %v4817_v10, %v701_v16  ;;  %578 = vadd.xlane.f32.xlu1 %v538_v19  ;;  %v1010_v45 = vmul.f32 %v699_v20, %v5333_v17  ;;  %4820 = vrsqrt.f32 %v5432_v21 }
 0x146   : > { %v418_v22 = vpop.xlane.xlu2 %417  ;;  %v573_v23 = vpop.xlane.xlu0 %572  ;;  %v723_v51 = vmul.f32 0.5, %v722_v26 }
 0x147   : > { %v703_v27 = vmul.f32 0.5, %v702_v36  ;;  %v477_v29 = vmul.f32 %v5330_v13, %v418_v22  ;;  %v414_v30 = vpop.xlane.xlu1 %413  ;;  %v631_v31 = vmul.f32 %v573_v23, %v5330_v13  ;;  %v1046_v57 = vmul.f32 %v5443_v41, %v1010_v45 }
 0x148   : > { %v475_v34 = vmul.f32 %v5330_v13, %v414_v30  ;;  %v724_v63 = vsub.f32 1.5, %v723_v51  ;;  %v5537_v51 = vld [vmem:[%s5309_s18 + $0x88] sm:$0xff] }
 0x149   : > { %v704_v35 = vsub.f32 1.5, %v703_v27  ;;  %v5439_v37 = vsub.f32 %v5372_v42, %v477_v29  ;;  %v5441_v39 = vadd.f32 1e-05, %v631_v31 }
 0x14a   : > { %v4819_v40 = vpop.eup %4818  ;;  %v5450_v50 = vsub.f32 %v5375_v43, %v475_v34  ;;  %v5464_v43 = vld [vmem:[%s7286_s2] ss:$0 sm:$0xff]  ;;  %v725_v12 = vmul.f32 %v5413_v8, %v724_v63 }
 0x14b   : > { %v705_v52 = vmul.f32 %v4817_v10, %v704_v35  ;;  %v711_v42 = vmul.f32 %v4819_v40, %v5419_v14  ;;  %4822 = vrsqrt.f32 %v5441_v39  ;;  %v541_v53 = vmul.f32 %v5439_v37, %v5439_v37  ;;  %v5473_v3 = vpop.eup %4820 }
 0x14c   : > { %v539_v56 = vmul.f32 %v5450_v50, %v5450_v50  ;;  %vm717_vm8 = vweird.f32 %v4819_v40  ;;  %v1082_v28 = vadd.f32 %v5464_v43, %v1046_v57  ;;  %v729_v26 = vsel %vm5501_vm12, %v5413_v8, %v725_v12 }
 0x14d   : > { %v709_v17 = vsel %vm708_vm6, %v4817_v10, %v705_v52  ;;  %v712_v55 = vmul.f32 %v4819_v40, %v711_v42  ;;  %584 = vadd.xlane.f32.xlu0 %v541_v53  ;;  %425 = vadd.xlane.f32.xlu1 %v5457_v54  ;;  %vm5489_vm11 = vmor %vm716_vm7, %vm717_vm8  ;;  %v1013_v8 = vmul.f32 %v729_v26, %v5339_v24  ;;  %vm746_vm13 = vweird.f32 %v5441_v39 }
 0x14e   : > { %v1011_v58 = vmul.f32 %v709_v17, %v5341_v25  ;;  %v420_v59 = vpop.xlane.xlu2 %419  ;;  %v5469_v62 = vpop.xlane.xlu0 %574  ;;  %580 = vadd.xlane.f32.xlu2 %v539_v56  ;;  %vm737_vm0 = vweird.f32 %v5473_v3 }
 0x14f   : > { %v713_v0 = vmul.f32 0.5, %v712_v55  ;;  %v478_v1 = vmul.f32 %v5330_v13, %v420_v59  ;;  %v416_v2 = vpop.xlane.xlu1 %415  ;;  %v1049_v42 = vmul.f32 %v5443_v41, %v1013_v8  ;;  %vm738_vm2 = vmor %vm736_vm15, %vm737_vm0 }
 0x150   : > { %v1047_v4 = vmul.f32 %v5443_v41, %v1011_v58  ;;  %v476_v25 = vmul.f32 %v5330_v13, %v416_v2  ;;  %v5557_v58 = vld [vmem:[%s5309_s18 + $0xa0] sm:$0xff] }
 0x151   : > { %v5477_v5 = vpop.eup %4822  ;;  %v714_v6 = vsub.f32 1.5, %v713_v0  ;;  %v5482_v7 = vsub.f32 %v5384_v46, %v478_v1  ;;  %v731_v46 = vmul.f32 %v5473_v3, %v5432_v21  ;;  %v5562_v21 = vld [vmem:[%s5309_s18 + $0x90] sm:$0xff] }
 0x152   : > { %v1083_v10 = vadd.f32 %v5464_v43, %v1047_v4  ;;  %v741_v60 = vmul.f32 %v5477_v5, %v5441_v39  ;;  %v5499_v16 = vsub.f32 %v5387_v47, %v476_v25  ;;  %v5516_v47 = vld [vmem:[%s5309_s18 + $0x80] sm:$0xff]  ;;  %vm747_vm14 = vweird.f32 %v5477_v5 }
 0x153   : > { %v715_v15 = vmul.f32 %v4819_v40, %v714_v6  ;;  %v542_v36 = vmul.f32 %v5482_v7, %v5482_v7  ;;  %v732_v27 = vmul.f32 %v5473_v3, %v731_v46  ;;  %v1085_v39 = vadd.f32 %v5464_v43, %v1049_v42  ;;  %vm748_vm1 = vmor %vm746_vm13, %vm747_vm14 }
 0x154   : > { %v5505_v14 = vpack.c.bf16 %v1083_v10, %v1082_v28  ;;  %v742_v20 = vmul.f32 %v5477_v5, %v741_v60  ;;  %v540_v22 = vmul.f32 %v5499_v16, %v5499_v16  ;;  %v5588_v28 = vld [vmem:[%s5309_s18 + $0xb0] sm:$0xff] }
 0x155   : > { %v719_v19 = vsel %vm5489_vm11, %v4819_v40, %v715_v15  ;;  %586 = vadd.xlane.f32.xlu0 %v542_v36  ;;  %427 = vadd.xlane.f32.xlu1 %v5516_v47  ;;  %v733_v35 = vmul.f32 0.5, %v732_v27  ;;  %v5533_v40 = vld [vmem:[%s5309_s18 + $0x98] sm:$0xff] }
 0x156   : > { %1540 = vmatmul.bf16.vlgmr.msra.gmra.mxu0 %v5505_v14  ;;  %v422_v23 = vpop.xlane.xlu0 %421  ;;  %582 = vadd.xlane.f32.xlu2 %v540_v22  ;;  %v1012_v30 = vmul.f32 %v719_v19, %v5355_v33  ;;  %v743_v31 = vmul.f32 0.5, %v742_v20 }
 0x157   : > { %1629 = vmatmul.bf16.vlgmr.msra.gmra.mxu1 %v5505_v14  ;;  %v479_v29 = vmul.f32 %v5330_v13, %v422_v23  ;;  %1718 = vmatmul.bf16.vlgmr.msra.gmra.mxu2 %v5505_v14  ;;  %v734_v53 = vsub.f32 1.5, %v733_v35 }
 0x158   : > { %1807 = vmatmul.bf16.vlgmr.msra.gmra.mxu3 %v5505_v14  ;;  %v1048_v45 = vmul.f32 %v5443_v41, %v1012_v30  ;;  %v744_v33 = vsub.f32 1.5, %v743_v31 }
 0x159   : > { %v5529_v34 = vsub.f32 %v5392_v48, %v479_v29  ;;  %v735_v57 = vmul.f32 %v5473_v3, %v734_v53 }
 0x15a   : > { %v1084_v17 = vadd.f32 %v5464_v43, %v1048_v45  ;;  %v745_v55 = vmul.f32 %v5477_v5, %v744_v33 }
 0x15b   : > { %v543_v52 = vmul.f32 %v5529_v34, %v5529_v34 }
 0x15c   : > { %v5559_v59 = vpack.c.bf16 %v1085_v39, %v1084_v17  ;;  %v749_v63 = vsel %vm748_vm1, %v5477_v5, %v745_v55  ;;  %v5579_v5 = vld [vmem:[%s5309_s18 + $0xa8] sm:$0xff] }
 0x15d   : > { %433 = vadd.xlane.f32.xlu0 %v5533_v40  ;;  %588 = vadd.xlane.f32.xlu1 %v543_v52  ;;  %v1015_v1 = vmul.f32 %v749_v63, %v5366_v38 }
 0x15e   : > { %v424_v48 = vpop.xlane.xlu0 %423  ;;  %429 = vadd.xlane.f32.xlu2 %v5537_v51 }
 0x15f   : > { %v480_v24 = vmul.f32 %v5330_v13, %v424_v48  ;;  %v1051_v4 = vmul.f32 %v5443_v41, %v1015_v1 }
 0x161   : > { %v5552_v56 = vsub.f32 %v5396_v49, %v480_v24  ;;  %v739_v49 = vsel %vm738_vm2, %v5473_v3, %v735_v57  ;;  %v1087_v3 = vadd.f32 %v5464_v43, %v1051_v4 }
 0x162   : > { %v1014_v2 = vmul.f32 %v739_v49, %v5353_v32  ;;  %v632_v32 = vmul.f32 %v5469_v62, %v5330_v13 }
 0x163   : > { %v544_v0 = vmul.f32 %v5552_v56, %v5552_v56 }
 0x164   : > { %v1050_v25 = vmul.f32 %v5443_v41, %v1014_v2  ;;  %v664_v10 = vadd.f32 1e-05, %v632_v32 }
 0x165   : > { %435 = vadd.xlane.f32.xlu0 %v5557_v58  ;;  %590 = vadd.xlane.f32.xlu1 %v544_v0 }
 0x166   : > { %1545 = vmatmul.bf16.gmra.mxu0 %v5559_v59  ;;  %431 = vadd.xlane.f32.xlu2 %v5562_v21  ;;  %v1086_v6 = vadd.f32 %v5464_v43, %v1050_v25  ;;  %4824 = vrsqrt.f32 %v664_v10  ;;  %vm756_vm3 = vweird.f32 %v664_v10 }
 0x167   : > { %1634 = vmatmul.bf16.gmra.mxu1 %v5559_v59  ;;  %1723 = vmatmul.bf16.gmra.mxu2 %v5559_v59 }
 0x168   : > { %1812 = vmatmul.bf16.gmra.mxu3 %v5559_v59  ;;  %v5584_v38 = vpack.c.bf16 %v1087_v3, %v1086_v6 }
 0x16c   : > { %v4825_v11 = vpop.eup %4824 }
 0x16d   : > { %437 = vadd.xlane.f32.xlu1 %v5579_v5  ;;  %v751_v60 = vmul.f32 %v4825_v11, %v664_v10  ;;  %vm757_vm4 = vweird.f32 %v4825_v11 }
 0x16e   : > { %vm758_vm5 = vmor %vm756_vm3, %vm757_vm4 }
 0x16f   : > { %v752_v12 = vmul.f32 %v4825_v11, %v751_v60 }
 0x171   : > { %v753_v36 = vmul.f32 0.5, %v752_v12 }
 0x173   : > { %v754_v19 = vsub.f32 1.5, %v753_v36 }
 0x175   : > { %439 = vadd.xlane.f32.xlu1 %v5588_v28  ;;  %v755_v26 = vmul.f32 %v4825_v11, %v754_v19 }
 0x176   : > { %1550 = vmatmul.bf16.gmra.mxu0 %v5584_v38 }
 0x177   : > { %1639 = vmatmul.bf16.gmra.mxu1 %v5584_v38  ;;  %1728 = vmatmul.bf16.gmra.mxu2 %v5584_v38  ;;  %v759_v30 = vsel %vm758_vm5, %v4825_v11, %v755_v26 }
 0x178   : > { %1817 = vmatmul.bf16.gmra.mxu3 %v5584_v38  ;;  %v1016_v42 = vmul.f32 %v759_v30, %v5378_v44 }
 0x17a   : > { %v1052_v44 = vmul.f32 %v5443_v41, %v1016_v42 }
 0x17c   : > { %v1088_v6 = vadd.f32 %v5464_v43, %v1052_v44 }
 0x1b0   : > { %v577_v46 = vpop.xlane.xlu1 %576 }
 0x1b1   : > { %v633_v15 = vmul.f32 %v577_v46, %v5330_v13 }
 0x1b3   : > { %v665_v18 = vadd.f32 1e-05, %v633_v15 }
 0x1b5   : > { %4826 = vrsqrt.f32 %v665_v18  ;;  %vm766_vm7 = vweird.f32 %v665_v18 }
 0x1b8   : > { %v579_v20 = vpop.xlane.xlu1 %578 }
 0x1b9   : > { %v634_v23 = vmul.f32 %v579_v20, %v5330_v13 }
 0x1bb   : > { %v4827_v22 = vpop.eup %4826  ;;  %v666_v27 = vadd.f32 1e-05, %v634_v23 }
 0x1bc   : > { %v761_v62 = vmul.f32 %v4827_v22, %v665_v18  ;;  %vm767_vm6 = vweird.f32 %v4827_v22 }
 0x1bd   : > { %4828 = vrsqrt.f32 %v666_v27  ;;  %vm768_vm8 = vmor %vm766_vm7, %vm767_vm6  ;;  %vm776_vm10 = vweird.f32 %v666_v27 }
 0x1be   : > { %v762_v29 = vmul.f32 %v4827_v22, %v761_v62 }
 0x1c0   : > { %v763_v31 = vmul.f32 0.5, %v762_v29  ;;  %v585_v8 = vpop.xlane.xlu0 %584  ;;  %v426_v33 = vpop.xlane.xlu1 %425 }
 0x1c1   : > { %v581_v45 = vpop.xlane.xlu2 %580  ;;  %v637_v52 = vmul.f32 %v585_v8, %v5330_v13  ;;  %v481_v53 = vmul.f32 %v5330_v13, %v426_v33 }
 0x1c2   : > { %v764_v35 = vsub.f32 1.5, %v763_v31  ;;  %v635_v48 = vmul.f32 %v581_v45, %v5330_v13 }
 0x1c3   : > { %v5602_v17 = vadd.f32 1e-05, %v637_v52  ;;  %v4829_v55 = vpop.eup %4828  ;;  %v5605_v57 = vsub.f32 %v5457_v54, %v481_v53 }
 0x1c4   : > { %v765_v24 = vmul.f32 %v4827_v22, %v764_v35  ;;  %v667_v39 = vadd.f32 1e-05, %v635_v48  ;;  %v771_v0 = vmul.f32 %v4829_v55, %v666_v27  ;;  %vm777_vm9 = vweird.f32 %v4829_v55 }
 0x1c5   : > { %4830 = vrsqrt.f32 %v5602_v17  ;;  %v545_v2 = vmul.f32 %v5605_v57, %v5605_v57  ;;  %vm5635_vm11 = vmor %vm776_vm10, %vm777_vm9  ;;  %vm806_vm1 = vweird.f32 %v5602_v17 }
 0x1c6   : > { %v769_v63 = vsel %vm768_vm8, %v4827_v22, %v765_v24  ;;  %4832 = vrsqrt.f32 %v667_v39  ;;  %v772_v1 = vmul.f32 %v4829_v55, %v771_v0  ;;  %vm786_vm12 = vweird.f32 %v667_v39 }
 0x1c7   : > { %v1017_v49 = vmul.f32 %v769_v63, %v5406_v61  ;;  %592 = vadd.xlane.f32.xlu2 %v545_v2 }
 0x1c8   : > { %v587_v25 = vpop.xlane.xlu0 %586  ;;  %v773_v3 = vmul.f32 0.5, %v772_v1  ;;  %v428_v60 = vpop.xlane.xlu1 %427 }
 0x1c9   : > { %v1053_v4 = vmul.f32 %v5443_v41, %v1017_v49  ;;  %v583_v54 = vpop.xlane.xlu2 %582  ;;  %v638_v18 = vmul.f32 %v587_v25, %v5330_v13  ;;  %v482_v22 = vmul.f32 %v5330_v13, %v428_v60  ;;  %v5667_v25 = vld [vmem:[%s5309_s18 + $0xb8] sm:$0xff] }
 0x1ca   : > { %v636_v10 = vmul.f32 %v583_v54, %v5330_v13  ;;  %v774_v61 = vsub.f32 1.5, %v773_v3 }
 0x1cb   : > { %v1089_v32 = vadd.f32 %v5464_v43, %v1053_v4  ;;  %v5616_v11 = vpop.eup %4830  ;;  %v5630_v26 = vsub.f32 %v5516_v47, %v482_v22  ;;  %v5639_v29 = vadd.f32 1e-05, %v638_v18 }
 0x1cc   : > { %v4833_v12 = vpop.eup %4832  ;;  %v5620_v15 = vadd.f32 1e-05, %v636_v10  ;;  %v775_v36 = vmul.f32 %v4829_v55, %v774_v61  ;;  %v801_v20 = vmul.f32 %v5616_v11, %v5602_v17  ;;  %vm807_vm2 = vweird.f32 %v5616_v11 }
 0x1cd   : > { %v5618_v46 = vpack.c.bf16 %v1089_v32, %v1088_v6  ;;  %v781_v19 = vmul.f32 %v4833_v12, %v667_v39  ;;  %vm787_vm13 = vweird.f32 %v4833_v12  ;;  %v546_v8 = vmul.f32 %v5630_v26, %v5630_v26  ;;  %vm5701_vm4 = vmor %vm806_vm1, %vm807_vm2 }
 0x1ce   : > { %4834 = vrsqrt.f32 %v5620_v15  ;;  %v779_v27 = vsel %vm5635_vm11, %v4829_v55, %v775_v36  ;;  %v802_v47 = vmul.f32 %v5616_v11, %v801_v20  ;;  %vm788_vm14 = vmor %vm786_vm12, %vm787_vm13  ;;  %vm796_vm15 = vweird.f32 %v5620_v15 }
 0x1cf   : > { %1555 = vmatmul.bf16.gmra.mxu0 %v5618_v46  ;;  %1644 = vmatmul.bf16.gmra.mxu1 %v5618_v46  ;;  %v782_v23 = vmul.f32 %v4833_v12, %v781_v19  ;;  %v1018_v53 = vmul.f32 %v779_v27, %v5416_v9  ;;  %4836 = vrsqrt.f32 %v5639_v29  ;;  %vm816_vm7 = vweird.f32 %v5639_v29 }
 0x1d0   : > { %1733 = vmatmul.bf16.gmra.mxu2 %v5618_v46  ;;  %1822 = vmatmul.bf16.gmra.mxu3 %v5618_v46  ;;  %v434_v30 = vpop.xlane.xlu0 %433  ;;  %v589_v42 = vpop.xlane.xlu1 %588  ;;  %v803_v63 = vmul.f32 0.5, %v802_v47 }
 0x1d1   : > { %v783_v31 = vmul.f32 0.5, %v782_v23  ;;  %v430_v35 = vpop.xlane.xlu2 %429  ;;  %v485_v33 = vmul.f32 %v5330_v13, %v434_v30  ;;  %594 = vadd.xlane.f32.xlu2 %v546_v8  ;;  %v639_v24 = vmul.f32 %v589_v42, %v5330_v13  ;;  %v1054_v2 = vmul.f32 %v5443_v41, %v1018_v53 }
 0x1d2   : > { %v483_v45 = vmul.f32 %v5330_v13, %v430_v35  ;;  %v804_v3 = vsub.f32 1.5, %v803_v63 }
 0x1d3   : > { %v784_v52 = vsub.f32 1.5, %v783_v31  ;;  %v5657_v49 = vadd.f32 1e-05, %v639_v24  ;;  %v5660_v1 = vsub.f32 %v5533_v40, %v485_v33  ;;  %v1090_v18 = vadd.f32 %v5464_v43, %v1054_v2  ;;  %v5740_v2 = vld [vmem:[%s5309_s18 + $0xc8] sm:$0xff] }
 0x1d4   : > { %v4835_v48 = vpop.eup %4834  ;;  %v5655_v44 = vsub.f32 %v5537_v51, %v483_v45  ;;  %v805_v20 = vmul.f32 %v5616_v11, %v804_v3  ;;  %v5715_v45 = vld [vmem:[%s5309_s18 + $0xc0] sm:$0xff] }
 0x1d5   : > { %v785_v55 = vmul.f32 %v4833_v12, %v784_v52  ;;  %v791_v0 = vmul.f32 %v4835_v48, %v5620_v15  ;;  %4838 = vrsqrt.f32 %v5657_v49  ;;  %vm797_vm0 = vweird.f32 %v4835_v48  ;;  %v5671_v6 = vpop.eup %4836 }
 0x1d6   : > { %v547_v54 = vmul.f32 %v5655_v44, %v5655_v44  ;;  %vm5687_vm3 = vmor %vm796_vm15, %vm797_vm0  ;;  %v811_v23 = vmul.f32 %v5671_v6, %v5639_v29  ;;  %v809_v17 = vsel %vm5701_vm4, %v5616_v11, %v805_v20  ;;  %vm826_vm5 = vweird.f32 %v5657_v49 }
 0x1d7   : > { %v789_v9 = vsel %vm788_vm14, %v4833_v12, %v785_v55  ;;  %v792_v39 = vmul.f32 %v4835_v48, %v791_v0  ;;  %v1021_v53 = vmul.f32 %v809_v17, %v5439_v37  ;;  %vm817_vm8 = vweird.f32 %v5671_v6 }
 0x1d8   : > { %v1019_v4 = vmul.f32 %v789_v9, %v5450_v50  ;;  %v549_v50 = vmul.f32 %v5660_v1, %v5660_v1  ;;  %v436_v61 = vpop.xlane.xlu0 %435  ;;  %596 = vadd.xlane.f32.xlu0 %v547_v54  ;;  %v5680_v12 = vpop.xlane.xlu1 %590  ;;  %vm818_vm10 = vmor %vm816_vm7, %vm817_vm8 }
 0x1d9   : > { %v793_v51 = vmul.f32 0.5, %v792_v39  ;;  %v432_v40 = vpop.xlane.xlu2 %431  ;;  %441 = vadd.xlane.f32.xlu2 %v5667_v25  ;;  %v486_v62 = vmul.f32 %v5330_v13, %v436_v61  ;;  %v1057_v9 = vmul.f32 %v5443_v41, %v1021_v53 }
 0x1da   : > { %v1055_v32 = vmul.f32 %v5443_v41, %v1019_v4  ;;  %v484_v10 = vmul.f32 %v5330_v13, %v432_v40  ;;  %600 = vadd.xlane.f32.xlu1 %v549_v50  ;;  %v5745_v4 = vld [vmem:[%s5309_s18 + $0xd8] sm:$0xff] }
 0x1db   : > { %v794_v60 = vsub.f32 1.5, %v793_v51  ;;  %v4839_v30 = vpop.eup %4838  ;;  %v5712_v35 = vsub.f32 %v5557_v58, %v486_v62 }
 0x1dc   : > { %v1091_v36 = vadd.f32 %v5464_v43, %v1055_v32  ;;  %v5706_v31 = vsub.f32 %v5562_v21, %v484_v10  ;;  %v821_v8 = vmul.f32 %v4839_v30, %v5657_v49  ;;  %v812_v21 = vmul.f32 %v5671_v6, %v811_v23 }
 0x1dd   : > { %v795_v22 = vmul.f32 %v4835_v48, %v794_v60  ;;  %v550_v42 = vmul.f32 %v5712_v35, %v5712_v35  ;;  %vm827_vm6 = vweird.f32 %v4839_v30  ;;  %v1093_v49 = vadd.f32 %v5464_v43, %v1057_v9 }
 0x1de   : > { %v5695_v27 = vpack.c.bf16 %v1091_v36, %v1090_v18  ;;  %v822_v33 = vmul.f32 %v4839_v30, %v821_v8  ;;  %v548_v52 = vmul.f32 %v5706_v31, %v5706_v31  ;;  %v813_v24 = vmul.f32 0.5, %v812_v21  ;;  %vm5751_vm9 = vmor %vm826_vm5, %vm827_vm6  ;;  %v5772_v18 = vld [vmem:[%s5309_s18 + $0xd0] sm:$0xff] }
 0x1df   : > { %v799_v47 = vsel %vm5687_vm3, %v4835_v48, %v795_v22  ;;  %v5786_v22 = vld [vmem:[%s5309_s18 + $0xe8] sm:$0xff] }
 0x1e0   : > { %1560 = vmatmul.bf16.gmra.mxu0 %v5695_v27  ;;  %1649 = vmatmul.bf16.gmra.mxu1 %v5695_v27  ;;  %v1020_v58 = vmul.f32 %v799_v47, %v5499_v16  ;;  %v823_v48 = vmul.f32 0.5, %v822_v33  ;;  %v438_v11 = vpop.xlane.xlu1 %437  ;;  %v814_v39 = vsub.f32 1.5, %v813_v24 }
 0x1e1   : > { %1738 = vmatmul.bf16.gmra.mxu2 %v5695_v27  ;;  %1827 = vmatmul.bf16.gmra.mxu3 %v5695_v27  ;;  %v487_v55 = vmul.f32 %v5330_v13, %v438_v11 }
 0x1e2   : > { %443 = vadd.xlane.f32.xlu2 %v5715_v45  ;;  %598 = vadd.xlane.f32.xlu0 %v548_v52  ;;  %v1056_v16 = vmul.f32 %v5443_v41, %v1020_v58  ;;  %v824_v63 = vsub.f32 1.5, %v823_v48  ;;  %v815_v29 = vmul.f32 %v5671_v6, %v814_v39 }
 0x1e3   : > { %602 = vadd.xlane.f32.xlu1 %v550_v42  ;;  %v5735_v0 = vsub.f32 %v5579_v5, %v487_v55 }
 0x1e4   : > { %v1092_v3 = vadd.f32 %v5464_v43, %v1056_v16  ;;  %v825_v5 = vmul.f32 %v4839_v30, %v824_v63  ;;  %v819_v60 = vsel %vm818_vm10, %v5671_v6, %v815_v29 }
 0x1e5   : > { %v551_v37 = vmul.f32 %v5735_v0, %v5735_v0  ;;  %v1022_v19 = vmul.f32 %v819_v60, %v5482_v7  ;;  %v640_v7 = vmul.f32 %v5680_v12, %v5330_v13 }
 0x1e6   : > { %v5759_v32 = vpack.c.bf16 %v1093_v49, %v1092_v3  ;;  %v829_v10 = vsel %vm5751_vm9, %v4839_v30, %v825_v5  ;;  %v5794_v30 = vld [vmem:[%s5309_s18 + $0xf0] sm:$0xff] }
 0x1e7   : > { %v1023_v36 = vmul.f32 %v829_v10, %v5529_v34  ;;  %v1058_v20 = vmul.f32 %v5443_v41, %v1022_v19  ;;  %v672_v15 = vadd.f32 1e-05, %v640_v7 }
 0x1e8   : > { %v440_v51 = vpop.xlane.xlu1 %439 }
 0x1e9   : > { %v488_v40 = vmul.f32 %v5330_v13, %v440_v51  ;;  %v1059_v6 = vmul.f32 %v5443_v41, %v1023_v36  ;;  %v1094_v62 = vadd.f32 %v5464_v43, %v1058_v20  ;;  %4840 = vrsqrt.f32 %v672_v15 }
 0x1ea   : > { %604 = vadd.xlane.f32.xlu2 %v551_v37  ;;  %445 = vadd.xlane.f32.xlu0 %v5740_v2  ;;  %vm836_vm11 = vweird.f32 %v672_v15 }
 0x1eb   : > { %449 = vadd.xlane.f32.xlu1 %v5745_v4  ;;  %v5762_v50 = vsub.f32 %v5588_v28, %v488_v40  ;;  %v5777_v28 = vld [vmem:[%s5309_s18 + $0xe0] sm:$0xff]  ;;  %v1095_v23 = vadd.f32 %v5464_v43, %v1059_v6 }
 0x1ed   : > { %v552_v61 = vmul.f32 %v5762_v50, %v5762_v50  ;;  %v5791_v34 = vpack.c.bf16 %v1095_v23, %v1094_v62 }
 0x1ef   : > { %v4841_v47 = vpop.eup %4840 }
 0x1f0   : > { %1565 = vmatmul.bf16.gmra.mxu0 %v5759_v32  ;;  %1654 = vmatmul.bf16.gmra.mxu1 %v5759_v32  ;;  %v831_v8 = vmul.f32 %v4841_v47, %v672_v15  ;;  %vm837_vm12 = vweird.f32 %v4841_v47 }
 0x1f1   : > { %1743 = vmatmul.bf16.gmra.mxu2 %v5759_v32  ;;  %1832 = vmatmul.bf16.gmra.mxu3 %v5759_v32  ;;  %vm838_vm13 = vmor %vm836_vm11, %vm837_vm12 }
 0x1f2   : > { %606 = vadd.xlane.f32.xlu2 %v552_v61  ;;  %447 = vadd.xlane.f32.xlu0 %v5772_v18  ;;  %v832_v17 = vmul.f32 %v4841_v47, %v831_v8 }
 0x1f3   : > { %451 = vadd.xlane.f32.xlu1 %v5777_v28 }
 0x1f4   : > { %v833_v52 = vmul.f32 0.5, %v832_v17 }
 0x1f6   : > { %v834_v42 = vsub.f32 1.5, %v833_v52 }
 0x1f8   : > { %v835_v24 = vmul.f32 %v4841_v47, %v834_v42 }
 0x1fa   : > { %453 = vadd.xlane.f32.xlu2 %v5786_v22  ;;  %v839_v63 = vsel %vm838_vm13, %v4841_v47, %v835_v24 }
 0x1fb   : > { %v1024_v5 = vmul.f32 %v839_v63, %v5552_v56 }
 0x1fd   : > { %v1060_v56 = vmul.f32 %v5443_v41, %v1024_v5 }
 0x1ff   : > { %v1096_v47 = vadd.f32 %v5464_v43, %v1060_v56 }
 0x200   : > { %1570 = vmatmul.bf16.gmra.mxu0 %v5791_v34  ;;  %1659 = vmatmul.bf16.gmra.mxu1 %v5791_v34 }
 0x201   : > { %1748 = vmatmul.bf16.gmra.mxu2 %v5791_v34  ;;  %1837 = vmatmul.bf16.gmra.mxu3 %v5791_v34 }
 0x202   : > { %455 = vadd.xlane.f32.xlu2 %v5794_v30 }
 0x23a   : > { %v593_v21 = vpop.xlane.xlu2 %592 }
 0x23b   : > { %v641_v33 = vmul.f32 %v593_v21, %v5330_v13 }
 0x23d   : > { %v673_v58 = vadd.f32 1e-05, %v641_v33 }
 0x23f   : > { %4842 = vrsqrt.f32 %v673_v58  ;;  %vm846_vm15 = vweird.f32 %v673_v58 }
 0x244   : > { %v595_v48 = vpop.xlane.xlu2 %594 }
 0x245   : > { %v4843_v11 = vpop.eup %4842  ;;  %v642_v53 = vmul.f32 %v595_v48, %v5330_v13 }
 0x246   : > { %v841_v12 = vmul.f32 %v4843_v11, %v673_v58  ;;  %vm847_vm14 = vweird.f32 %v4843_v11 }
 0x247   : > { %v674_v55 = vadd.f32 1e-05, %v642_v53  ;;  %vm848_vm0 = vmor %vm846_vm15, %vm847_vm14 }
 0x248   : > { %v842_v16 = vmul.f32 %v4843_v11, %v841_v12 }
 0x249   : > { %4844 = vrsqrt.f32 %v674_v55  ;;  %vm856_vm2 = vweird.f32 %v674_v55 }
 0x24a   : > { %v843_v9 = vmul.f32 0.5, %v842_v16 }
 0x24b   : > { %v597_v3 = vpop.xlane.xlu0 %596 }
 0x24c   : > { %v844_v39 = vsub.f32 1.5, %v843_v9  ;;  %v442_v37 = vpop.xlane.xlu2 %441  ;;  %v643_v54 = vmul.f32 %v597_v3, %v5330_v13 }
 0x24d   : > { %v489_v51 = vmul.f32 %v5330_v13, %v442_v37  ;;  %v601_v49 = vpop.xlane.xlu1 %600 }
 0x24e   : > { %v845_v40 = vmul.f32 %v4843_v11, %v844_v39  ;;  %v645_v29 = vmul.f32 %v601_v49, %v5330_v13  ;;  %v675_v60 = vadd.f32 1e-05, %v643_v54 }
 0x24f   : > { %v4845_v10 = vpop.eup %4844  ;;  %v5810_v61 = vsub.f32 %v5667_v25, %v489_v51 }
 0x250   : > { %v849_v36 = vsel %vm848_vm0, %v4843_v11, %v845_v40  ;;  %v851_v19 = vmul.f32 %v4845_v10, %v674_v55  ;;  %v5812_v6 = vadd.f32 1e-05, %v645_v29  ;;  %4846 = vrsqrt.f32 %v675_v60 }
 0x251   : > { %v1025_v20 = vmul.f32 %v849_v36, %v5605_v57  ;;  %v553_v23 = vmul.f32 %v5810_v61, %v5810_v61  ;;  %vm857_vm1 = vweird.f32 %v4845_v10  ;;  %vm866_vm4 = vweird.f32 %v675_v60 }
 0x252   : > { %v852_v62 = vmul.f32 %v4845_v10, %v851_v19  ;;  %4848 = vrsqrt.f32 %v5812_v6  ;;  %vm858_vm3 = vmor %vm856_vm2, %vm857_vm1  ;;  %vm886_vm7 = vweird.f32 %v5812_v6 }
 0x253   : > { %v1061_v7 = vmul.f32 %v5443_v41, %v1025_v20  ;;  %608 = vadd.xlane.f32.xlu0 %v553_v23  ;;  %v5857_v23 = vld [vmem:[%s5309_s18 + $0xf8] sm:$0xff] }
 0x254   : > { %v853_v25 = vmul.f32 0.5, %v852_v62 }
 0x255   : > { %v444_v15 = vpop.xlane.xlu2 %443  ;;  %v1097_v8 = vadd.f32 %v5464_v43, %v1061_v7  ;;  %v599_v57 = vpop.xlane.xlu0 %598 }
 0x256   : > { %v490_v17 = vmul.f32 %v5330_v13, %v444_v15  ;;  %v603_v21 = vpop.xlane.xlu1 %602  ;;  %v854_v33 = vsub.f32 1.5, %v853_v25  ;;  %v644_v52 = vmul.f32 %v599_v57, %v5330_v13  ;;  %v4847_v42 = vpop.eup %4846 }
 0x257   : > { %v646_v58 = vmul.f32 %v603_v21, %v5330_v13  ;;  %v5825_v48 = vpack.c.bf16 %v1097_v8, %v1096_v47  ;;  %v861_v12 = vmul.f32 %v4847_v42, %v675_v60  ;;  %vm867_vm5 = vweird.f32 %v4847_v42 }
 0x258   : > { %v5828_v11 = vsub.f32 %v5715_v45, %v490_v17  ;;  %v5830_v53 = vpop.eup %4848  ;;  %v855_v24 = vmul.f32 %v4845_v10, %v854_v33  ;;  %v5834_v63 = vadd.f32 1e-05, %v644_v52  ;;  %vm868_vm6 = vmor %vm866_vm4, %vm867_vm5 }
 0x259   : > { %v881_v16 = vmul.f32 %v5830_v53, %v5812_v6  ;;  %1575 = vmatmul.bf16.gmra.mxu0 %v5825_v48  ;;  %1664 = vmatmul.bf16.gmra.mxu1 %v5825_v48  ;;  %v862_v45 = vmul.f32 %v4847_v42, %v861_v12  ;;  %v5840_v39 = vadd.f32 1e-05, %v646_v58  ;;  %vm887_vm8 = vweird.f32 %v5830_v53 }
 0x25a   : > { %v554_v9 = vmul.f32 %v5828_v11, %v5828_v11  ;;  %1753 = vmatmul.bf16.gmra.mxu2 %v5825_v48  ;;  %1842 = vmatmul.bf16.gmra.mxu3 %v5825_v48  ;;  %4850 = vrsqrt.f32 %v5834_v63  ;;  %v859_v3 = vsel %vm858_vm3, %v4845_v10, %v855_v24  ;;  %vm876_vm9 = vweird.f32 %v5834_v63  ;;  %vm5889_vm11 = vmor %vm886_vm7, %vm887_vm8 }
 0x25b   : > { %v882_v37 = vmul.f32 %v5830_v53, %v881_v16  ;;  %v863_v5 = vmul.f32 0.5, %v862_v45  ;;  %4852 = vrsqrt.f32 %v5840_v39  ;;  %v1026_v36 = vmul.f32 %v859_v3, %v5630_v26  ;;  %v4282_v45 = vld [vmem:[#allocation7 + $0x198] sm:$0xf] }
 0x25c   : > { %610 = vadd.xlane.f32.xlu0 %v554_v9  ;;  %vm896_vm0 = vweird.f32 %v5840_v39 }
 0x25d   : > { %v605_v51 = vpop.xlane.xlu2 %604  ;;  %v446_v54 = vpop.xlane.xlu0 %445  ;;  %v864_v40 = vsub.f32 1.5, %v863_v5  ;;  %v883_v19 = vmul.f32 0.5, %v882_v37  ;;  %v1062_v26 = vmul.f32 %v5443_v41, %v1026_v36 }
 0x25e   : > { %v647_v55 = vmul.f32 %v605_v51, %v5330_v13  ;;  %v450_v49 = vpop.xlane.xlu1 %449  ;;  %v491_v10 = vmul.f32 %v5330_v13, %v446_v54 }
 0x25f   : > { %v493_v29 = vmul.f32 %v5330_v13, %v450_v49  ;;  %v865_v60 = vmul.f32 %v4847_v42, %v864_v40  ;;  %v884_v15 = vsub.f32 1.5, %v883_v19 }
 0x260   : > { %v5850_v56 = vadd.f32 1e-05, %v647_v55  ;;  %v4851_v62 = vpop.eup %4850  ;;  %v5864_v8 = vsub.f32 %v5740_v2, %v491_v10 }
 0x261   : > { %v5854_v20 = vsub.f32 %v5745_v4, %v493_v29  ;;  %v869_v7 = vsel %vm868_vm6, %v4847_v42, %v865_v60  ;;  %v871_v25 = vmul.f32 %v4851_v62, %v5834_v63  ;;  %v5867_v4 = vpop.eup %4852  ;;  %vm877_vm10 = vweird.f32 %v4851_v62 }
 0x262   : > { %4854 = vrsqrt.f32 %v5850_v56  ;;  %v1027_v47 = vmul.f32 %v869_v7, %v5655_v44  ;;  %v555_v44 = vmul.f32 %v5864_v8, %v5864_v8  ;;  %v1098_v42 = vadd.f32 %v5464_v43, %v1062_v26  ;;  %vm878_vm12 = vmor %vm876_vm9, %vm877_vm10 }
 0x263   : > { %v872_v17 = vmul.f32 %v4851_v62, %v871_v25  ;;  %v557_v21 = vmul.f32 %v5854_v20, %v5854_v20  ;;  %v885_v24 = vmul.f32 %v5830_v53, %v884_v15  ;;  %v891_v37 = vmul.f32 %v5867_v4, %v5840_v39  ;;  %v4314_v15 = vld [vmem:[#allocation7 + $0x1d8] sm:$0xf] }
 0x264   : > { %457 = vadd.xlane.f32.xlu0 %v5857_v23  ;;  %v1063_v33 = vmul.f32 %v5443_v41, %v1027_v47  ;;  %612 = vadd.xlane.f32.xlu1 %v555_v44  ;;  %vm906_vm13 = vweird.f32 %v5850_v56  ;;  %v4645_v47 = vld [vmem:[#allocation7 + $0x1f4] sm:$0xf0]  ;;  %vm897_vm1 = vweird.f32 %v5867_v4 }
 0x265   : > { %v5871_v57 = vpop.xlane.xlu2 %606  ;;  %v873_v58 = vmul.f32 0.5, %v872_v17  ;;  %616 = vadd.xlane.f32.xlu2 %v557_v21  ;;  %v448_v9 = vpop.xlane.xlu0 %447  ;;  %v889_v40 = vsel %vm5889_vm11, %v5830_v53, %v885_v24  ;;  %v892_v29 = vmul.f32 %v5867_v4, %v891_v37  ;;  %v4644_v21 = vld [vmem:[#allocation7 + $0x1ec] sm:$0xf0]  ;;  %v4637_v37 = vld [vmem:[#allocation7 + $0x1b4] sm:$0xf0]  ;;  %vm5951_vm2 = vmor %vm896_vm0, %vm897_vm1 }
 0x266   : > { %v452_v2 = vpop.xlane.xlu1 %451  ;;  %v1099_v12 = vadd.f32 %v5464_v43, %v1063_v33  ;;  %v492_v54 = vmul.f32 %v5330_v13, %v448_v9  ;;  %v1029_v7 = vmul.f32 %v889_v40, %v5660_v1  ;;  %v4306_v1 = vld [vmem:[#allocation7 + $0x1d0] sm:$0xf]  ;;  %v4250_v39 = vld [vmem:[#allocation7 + $0x158] sm:$0xf] }
 0x267   : > { %v494_v16 = vmul.f32 %v5330_v13, %v452_v2  ;;  %v874_v3 = vsub.f32 1.5, %v873_v58  ;;  %v4641_v58 = vld [vmem:[#allocation7 + $0x1dc] sm:$0xf]  ;;  %v4636_v40 = vld [vmem:[#allocation7 + $0x1ac] sm:$0xf0] }
 0x268   : > { %v5879_v52 = vpop.eup %4854  ;;  %v5897_v51 = vpack.c.bf16 %v1099_v12, %v1098_v42  ;;  %v5913_v36 = vsub.f32 %v5772_v18, %v492_v54  ;;  %v1065_v17 = vmul.f32 %v5443_v41, %v1029_v7  ;;  %v4316_v42 = vld [vmem:[#allocation7 + $0x1f8] sm:$0xf0]  ;;  %v4315_v12 = vor.u32 %v4645_v47, %v4314_v15  ;;  %v4242_v15 = vld [vmem:[#allocation7 + $0x150] sm:$0xf] }
 0x269   : > { %v901_v5 = vmul.f32 %v5879_v52, %v5850_v56  ;;  %v5902_v55 = vsub.f32 %v5777_v28, %v494_v16  ;;  %v875_v6 = vmul.f32 %v4851_v62, %v874_v3  ;;  %vm907_vm14 = vweird.f32 %v5879_v52  ;;  %v4640_v16 = vld [vmem:[#allocation7 + $0x1d4] sm:$0xf]  ;;  %v4274_v3 = vld [vmem:[#allocation7 + $0x190] sm:$0xf] }
 0x26a   : > { %1580 = vmatmul.bf16.gmra.mxu0 %v5897_v51  ;;  %1669 = vmatmul.bf16.gmra.mxu1 %v5897_v51  ;;  %v556_v60 = vmul.f32 %v5913_v36, %v5913_v36  ;;  %vm5934_vm15 = vmor %vm906_vm13, %vm907_vm14  ;;  %v4319_v54 = vor.u32 %v4641_v58, %v4316_v42  ;;  %v4283_v7 = vor.u32 %v4637_v37, %v4282_v45 }
 0x26b   : > { %v902_v49 = vmul.f32 %v5879_v52, %v901_v5  ;;  %v879_v63 = vsel %vm878_vm12, %v4851_v62, %v875_v6  ;;  %1758 = vmatmul.bf16.gmra.mxu2 %v5897_v51  ;;  %1847 = vmatmul.bf16.gmra.mxu3 %v5897_v51  ;;  %v558_v53 = vmul.f32 %v5902_v55, %v5902_v55  ;;  %v893_v62 = vmul.f32 0.5, %v892_v29  ;;  %v4633_v29 = vld [vmem:[#allocation7 + $0x19c] sm:$0xf] }
 0x26c   : > { %v1028_v19 = vmul.f32 %v879_v63, %v5706_v31  ;;  %614 = vadd.xlane.f32.xlu1 %v556_v60  ;;  %v1101_v5 = vadd.f32 %v5464_v43, %v1065_v17  ;;  %2066 = vmatpush.bf16.msrb.mxu2 %v4315_v12  ;;  %v4284_v63 = vld [vmem:[#allocation7 + $0x1b8] sm:$0xf0]  ;;  %v4628_v17 = vld [vmem:[#allocation7 + $0x16c] sm:$0xf0]  ;;  %v648_v45 = vmul.f32 %v5871_v57, %v5330_v13  ;;  %v5997_v57 = vpop.f32.mrf.mxu3 }
 0x26d   : > { %v454_v28 = vpop.xlane.xlu2 %453  ;;  %v903_v10 = vmul.f32 0.5, %v902_v49  ;;  %618 = vadd.xlane.f32.xlu0 %v558_v53  ;;  %v894_v33 = vsub.f32 1.5, %v893_v62  ;;  %v4307_v49 = vor.u32 %v4644_v21, %v4306_v1  ;;  %v4632_v53 = vld [vmem:[#allocation7 + $0x194] sm:$0xf]  ;;  %2155 = vmatpush.bf16.msrb.mxu3 %v4319_v54  ;;  %v4275_v62 = vor.u32 %v4636_v40, %v4274_v3  ;;  %v4625_v1 = vld [vmem:[#allocation7 + $0x15c] sm:$0xf]  ;;  %v5990_v40 = vpop.f32.mrf.mxu0 }
 0x26e   : > { %v495_v18 = vmul.f32 %v5330_v13, %v454_v28  ;;  %v1064_v25 = vmul.f32 %v5443_v41, %v1028_v19  ;;  %v4308_v41 = vld [vmem:[#allocation7 + $0x1f0] sm:$0xf0]  ;;  %v4252_v21 = vld [vmem:[#allocation7 + $0x178] sm:$0xf0]  ;;  %v4243_v42 = vor.u32 %v4628_v17, %v4242_v15  ;;  %v680_v37 = vadd.f32 1e-05, %v648_v45 }
 0x26f   : > { %v904_v31 = vsub.f32 1.5, %v903_v10  ;;  %v895_v28 = vmul.f32 %v5867_v4, %v894_v33  ;;  %v4311_v19 = vor.u32 %v4640_v16, %v4308_v41  ;;  %v4276_v10 = vld [vmem:[#allocation7 + $0x1b0] sm:$0xf0]  ;;  %1888 = vmatpush.bf16.msrb.mxu0 %v4307_v49  ;;  %v5978_v16 = vld [vmem:[%s7286_s2] ss:$0 sm:$0xff] }
 0x270   : > { %v5926_v26 = vsub.f32 %v5786_v22, %v495_v18  ;;  %v1100_v22 = vadd.f32 %v5464_v43, %v1064_v25  ;;  %v4287_v25 = vor.u32 %v4633_v29, %v4284_v63  ;;  %v4279_v47 = vor.u32 %v4632_v53, %v4276_v10  ;;  %2067 = vmatpush.bf16.msrb.mxu2 %v4283_v7  ;;  %v5993_v63 = vpop.f32.mrf.mxu1  ;;  %v5995_v53 = vpop.f32.mrf.mxu2 }
 0x271   : > { %v905_v9 = vmul.f32 %v5879_v52, %v904_v31  ;;  %1977 = vmatpush.bf16.msrb.mxu1 %v4311_v19  ;;  %v4629_v31 = vld [vmem:[#allocation7 + $0x174] sm:$0xf0]  ;;  %v899_v33 = vsel %vm5951_vm2, %v5867_v4, %v895_v28  ;;  %4856 = vrsqrt.f32 %v680_v37  ;;  %vm916_vm3 = vweird.f32 %v680_v37 }
 0x272   : > { %v559_v44 = vmul.f32 %v5926_v26, %v5926_v26  ;;  %v4251_v58 = vor.u32 %v4629_v31, %v4250_v39  ;;  %2156 = vmatpush.bf16.msrb.mxu3 %v4287_v25  ;;  %v1030_v24 = vmul.f32 %v899_v33, %v5712_v35 }
 0x273   : > { %v909_v18 = vsel %vm5934_vm15, %v5879_v52, %v905_v9  ;;  %v4624_v52 = vld [vmem:[#allocation7 + $0x154] sm:$0xf]  ;;  %1889 = vmatpush.bf16.msrb.mxu0 %v4275_v62 }
 0x274   : > { %620 = vadd.xlane.f32.xlu1 %v559_v44  ;;  %v4244_v44 = vld [vmem:[#allocation7 + $0x170] sm:$0xf0]  ;;  %2068 = vmatpush.bf16.msrb.mxu2 %v4251_v58 }
 0x275   : > { %v456_v2 = vpop.xlane.xlu2 %455  ;;  %1978 = vmatpush.bf16.msrb.mxu1 %v4279_v47  ;;  %v4247_v4 = vor.u32 %v4624_v52, %v4244_v44 }
 0x276   : > { %v496_v56 = vmul.f32 %v5330_v13, %v456_v2  ;;  %v1031_v2 = vmul.f32 %v909_v18, %v5735_v0  ;;  %v6000_v18 = vpop.f32.mrf.mxu0 }
 0x277   : > { %1890 = vmatpush.bf16.msrb.mxu0 %v4243_v42  ;;  %v4857_v3 = vpop.eup %4856 }
 0x278   : > { %v5944_v6 = vsub.f32 %v5794_v30, %v496_v56  ;;  %v5955_v30 = vpack.c.bf16 %v1101_v5, %v1100_v22  ;;  %v4255_v22 = vor.u32 %v4625_v1, %v4252_v21  ;;  %v5971_v56 = vld [vmem:[#allocation5] ss:$0 sm:$0xff]  ;;  %v911_v5 = vmul.f32 %v4857_v3, %v680_v37  ;;  %v6004_v25 = vpop.f32.mrf.mxu1  ;;  %v6008_v33 = vpop.f32.mrf.mxu2 }
 0x279   : > { %v1067_v12 = vmul.f32 %v5971_v56, %v1031_v2  ;;  %v1066_v0 = vmul.f32 %v5971_v56, %v1030_v24  ;;  %1979 = vmatpush.bf16.msrb.mxu1 %v4247_v4  ;;  %vm917_vm4 = vweird.f32 %v4857_v3  ;;  %v6012_v2 = vpop.f32.mrf.mxu3 }
 0x27a   : > { %v560_v60 = vmul.f32 %v5944_v6, %v5944_v6  ;;  %1585 = vmatmul.bf16.gmra.mxu0 %v5955_v30  ;;  %1674 = vmatmul.bf16.gmra.mxu1 %v5955_v30  ;;  %v912_v49 = vmul.f32 %v4857_v3, %v911_v5  ;;  %vm918_vm5 = vmor %vm916_vm3, %vm917_vm4 }
 0x27b   : > { %1763 = vmatmul.bf16.gmra.mxu2 %v5955_v30  ;;  %1852 = vmatmul.bf16.gmra.mxu3 %v5955_v30  ;;  %v1103_v41 = vadd.f32 %v5978_v16, %v1067_v12  ;;  %v1102_v35 = vadd.f32 %v5978_v16, %v1066_v0 }
 0x27c   : > { %622 = vadd.xlane.f32.xlu2 %v560_v60  ;;  %2157 = vmatpush.bf16.msrb.mxu3 %v4255_v22  ;;  %v913_v19 = vmul.f32 0.5, %v912_v49 }
 0x27d   : > { %v5982_v9 = vpack.c.bf16 %v1103_v41, %v1102_v35 }
 0x27e   : > { %v914_v10 = vsub.f32 1.5, %v913_v19  ;;  %v6021_v41 = vpop.f32.mrf.mxu0  ;;  %v4218_v19 = vld [vmem:[#allocation7 + $0x118] sm:$0xf] }
 0x280   : > { %v915_v39 = vmul.f32 %v4857_v3, %v914_v10  ;;  %v6026_v45 = vpop.f32.mrf.mxu1  ;;  %v4621_v10 = vld [vmem:[#allocation7 + $0x134] sm:$0xf0] }
 0x282   : > { %v919_v47 = vsel %vm918_vm5, %v4857_v3, %v915_v39  ;;  %v4219_v39 = vor.u32 %v4621_v10, %v4218_v19 }
 0x283   : > { %v1032_v58 = vmul.f32 %v919_v47, %v5762_v50 }
 0x284   : > { %2069 = vmatpush.bf16.msrb.mxu2 %v4219_v39 }
 0x285   : > { %v1068_v5 = vmul.f32 %v5971_v56, %v1032_v58 }
 0x28a   : > { %1590 = vmatmul.bf16.gmra.mxu0 %v5982_v9  ;;  %1679 = vmatmul.bf16.gmra.mxu1 %v5982_v9 }
 0x28b   : > { %1768 = vmatmul.bf16.gmra.mxu2 %v5982_v9  ;;  %1857 = vmatmul.bf16.gmra.mxu3 %v5982_v9 }
 0x2c6   : > { %v609_v54 = vpop.xlane.xlu0 %608 }
 0x2c7   : > { %v649_v29 = vmul.f32 %v609_v54, %v5330_v13 }
 0x2c9   : > { %v681_v28 = vadd.f32 1e-05, %v649_v29 }
 0x2cb   : > { %4858 = vrsqrt.f32 %v681_v28  ;;  %vm926_vm7 = vweird.f32 %v681_v28 }
 0x2cf   : > { %v611_v43 = vpop.xlane.xlu0 %610 }
 0x2d0   : > { %v650_v60 = vmul.f32 %v611_v43, %v5330_v13  ;;  %v1104_v43 = vadd.f32 %v5978_v16, %v1068_v5 }
 0x2d1   : > { %v4859_v7 = vpop.eup %4858 }
 0x2d2   : > { %v6002_v62 = vadd.f32 1e-05, %v650_v60  ;;  %v921_v31 = vmul.f32 %v4859_v7, %v681_v28  ;;  %vm927_vm6 = vweird.f32 %v4859_v7 }
 0x2d3   : > { %vm928_vm8 = vmor %vm926_vm7, %vm927_vm6 }
 0x2d4   : > { %4860 = vrsqrt.f32 %v6002_v62  ;;  %v922_v15 = vmul.f32 %v4859_v7, %v921_v31  ;;  %v4210_v31 = vld [vmem:[#allocation7 + $0x110] sm:$0xf]  ;;  %vm936_vm10 = vweird.f32 %v6002_v62 }
 0x2d6   : > { %v923_v17 = vmul.f32 0.5, %v922_v15  ;;  %v6040_v15 = vpop.f32.mrf.mxu2 }
 0x2d7   : > { %v458_v1 = vpop.xlane.xlu0 %457  ;;  %v613_v0 = vpop.xlane.xlu1 %612 }
 0x2d8   : > { %v497_v21 = vmul.f32 %v5330_v13, %v458_v1  ;;  %v924_v52 = vsub.f32 1.5, %v923_v17  ;;  %v617_v42 = vpop.xlane.xlu2 %616  ;;  %v651_v35 = vmul.f32 %v613_v0, %v5330_v13  ;;  %v4617_v1 = vld [vmem:[#allocation7 + $0x11c] sm:$0xf] }
 0x2d9   : > { %v653_v12 = vmul.f32 %v617_v42, %v5330_v13 }
 0x2da   : > { %v6010_v44 = vpop.eup %4860  ;;  %v6016_v22 = vsub.f32 %v5857_v23, %v497_v21  ;;  %v925_v24 = vmul.f32 %v4859_v7, %v924_v52  ;;  %v6033_v54 = vadd.f32 1e-05, %v651_v35  ;;  %v4220_v21 = vld [vmem:[#allocation7 + $0x138] sm:$0xf0]  ;;  %v6042_v52 = vpop.f32.mrf.mxu3 }
 0x2db   : > { %v931_v4 = vmul.f32 %v6010_v44, %v6002_v62  ;;  %v6029_v3 = vadd.f32 1e-05, %v653_v12  ;;  %7320 = vst [vmem:[#allocation16_spill] sm:$0xff] %v6042_v52  ;;  %v4212_v12 = vld [vmem:[#allocation7 + $0x130] sm:$0xf0]  ;;  %vm937_vm9 = vweird.f32 %v6010_v44 }
 0x2dc   : > { %v561_v50 = vmul.f32 %v6016_v22, %v6016_v22  ;;  %v929_v23 = vsel %vm928_vm8, %v4859_v7, %v925_v24  ;;  %v4223_v24 = vor.u32 %v4617_v1, %v4220_v21  ;;  %vm6066_vm11 = vmor %vm936_vm10, %vm937_vm9  ;;  %vm946_vm12 = vweird.f32 %v6033_v54  ;;  %v4186_v62 = vld [vmem:[#allocation7 + $0xd8] sm:$0xf]  ;;  %v4178_v1 = vld [vmem:[#allocation7 + $0xd0] sm:$0xf] }
 0x2dd   : > { %v932_v37 = vmul.f32 %v6010_v44, %v931_v4  ;;  %v1033_v49 = vmul.f32 %v929_v23, %v5810_v61  ;;  %4862 = vrsqrt.f32 %v6029_v3  ;;  %v4620_v61 = vld [vmem:[#allocation7 + $0x12c] sm:$0xf0]  ;;  %v4616_v4 = vld [vmem:[#allocation7 + $0x114] sm:$0xf]  ;;  %vm966_vm1 = vweird.f32 %v6029_v3 }
 0x2de   : > { %624 = vadd.xlane.f32.xlu0 %v561_v50  ;;  %4864 = vrsqrt.f32 %v6033_v54  ;;  %v4211_v17 = vor.u32 %v4620_v61, %v4210_v31  ;;  %v4215_v50 = vor.u32 %v4616_v4, %v4212_v12  ;;  %2158 = vmatpush.bf16.msrb.mxu3 %v4223_v24  ;;  %v4613_v31 = vld [vmem:[#allocation7 + $0xf4] sm:$0xf0]  ;;  %v4612_v21 = vld [vmem:[#allocation7 + $0xec] sm:$0xf0]  ;;  %v4609_v4 = vld [vmem:[#allocation7 + $0xdc] sm:$0xf]  ;;  %v6078_v12 = vpop.f32.mrf.mxu2 }
 0x2df   : > { %v933_v29 = vmul.f32 0.5, %v932_v37  ;;  %v1069_v28 = vmul.f32 %v5971_v56, %v1033_v49  ;;  %v615_v42 = vpop.xlane.xlu1 %614  ;;  %v6049_v37 = vpop.f32.mrf.mxu0  ;;  %v4179_v24 = vor.u32 %v4612_v21, %v4178_v1  ;;  %v4596_v52 = vld [vmem:[#allocation7 + $0x6c] sm:$0xf0] }
 0x2e0   : > { %v619_v47 = vpop.xlane.xlu0 %618  ;;  %v652_v35 = vmul.f32 %v615_v42, %v5330_v13  ;;  %1891 = vmatpush.bf16.msrb.mxu0 %v4211_v17  ;;  %1980 = vmatpush.bf16.msrb.mxu1 %v4215_v50  ;;  %v4187_v17 = vor.u32 %v4613_v31, %v4186_v62  ;;  %v4188_v50 = vld [vmem:[#allocation7 + $0xf8] sm:$0xf0] }
 0x2e1   : > { %v1105_v60 = vadd.f32 %v5978_v16, %v1069_v28  ;;  %v934_v7 = vsub.f32 1.5, %v933_v29  ;;  %v654_v49 = vmul.f32 %v619_v47, %v5330_v13  ;;  %v6055_v29 = vpop.f32.mrf.mxu1 }
 0x2e2   : > { %v6060_v10 = vadd.f32 1e-05, %v652_v35  ;;  %2070 = vmatpush.bf16.msrb.mxu2 %v4187_v17 }
 0x2e3   : > { %v6044_v58 = vpack.c.bf16 %v1105_v60, %v1104_v43  ;;  %v6046_v0 = vpop.eup %4862  ;;  %v935_v5 = vmul.f32 %v6010_v44, %v934_v7  ;;  %v6075_v39 = vadd.f32 1e-05, %v654_v49 }
 0x2e4   : > { %v4865_v23 = vpop.eup %4864  ;;  %v961_v28 = vmul.f32 %v6046_v0, %v6029_v3  ;;  %4866 = vrsqrt.f32 %v6060_v10  ;;  %1892 = vmatpush.bf16.msrb.mxu0 %v4179_v24  ;;  %vm956_vm15 = vweird.f32 %v6060_v10  ;;  %vm967_vm2 = vweird.f32 %v6046_v0 }
 0x2e5   : > { %1595 = vmatmul.bf16.gmra.mxu0 %v6044_v58  ;;  %v941_v19 = vmul.f32 %v4865_v23, %v6033_v54  ;;  %1773 = vmatmul.bf16.gmra.mxu2 %v6044_v58  ;;  %v939_v7 = vsel %vm6066_vm11, %v6010_v44, %v935_v5  ;;  %vm947_vm13 = vweird.f32 %v4865_v23  ;;  %v6081_v5 = vpop.f32.mrf.mxu3  ;;  %4868 = vrsqrt.f32 %v6075_v39  ;;  %vm6118_vm4 = vmor %vm966_vm1, %vm967_vm2 }
 0x2e6   : > { %1684 = vmatmul.bf16.gmra.mxu1 %v6044_v58  ;;  %1862 = vmatmul.bf16.gmra.mxu3 %v6044_v58  ;;  %v962_v61 = vmul.f32 %v6046_v0, %v961_v28  ;;  %v1034_v49 = vmul.f32 %v939_v7, %v5828_v11  ;;  %vm948_vm14 = vmor %vm946_vm12, %vm947_vm13  ;;  %v4191_v28 = vor.u32 %v4609_v4, %v4188_v50  ;;  %v4608_v4 = vld [vmem:[#allocation7 + $0xd4] sm:$0xf]  ;;  %vm976_vm7 = vweird.f32 %v6075_v39 }
 0x2e7   : > { %v942_v60 = vmul.f32 %v4865_v23, %v941_v19  ;;  %v621_v42 = vpop.xlane.xlu1 %620  ;;  %v6089_v31 = vpop.f32.mrf.mxu0 }
 0x2e8   : > { %v655_v44 = vmul.f32 %v621_v42, %v5330_v13  ;;  %v963_v43 = vmul.f32 0.5, %v962_v61  ;;  %7323 = vst [vmem:[#allocation17_spill] sm:$0xff] %v6089_v31  ;;  %2159 = vmatpush.bf16.msrb.mxu3 %v4191_v28  ;;  %v1070_v54 = vmul.f32 %v5971_v56, %v1034_v49  ;;  %v6107_v49 = vpop.f32.mrf.mxu2 }
 0x2e9   : > { %v943_v47 = vmul.f32 0.5, %v942_v60  ;;  %v6092_v17 = vpop.f32.mrf.mxu1  ;;  %7325 = vst [vmem:[#allocation19_spill] sm:$0xff] %v6107_v49  ;;  %v4156_v49 = vld [vmem:[#allocation7 + $0xb8] sm:$0xf0] }
 0x2ea   : > { %v4867_v19 = vpop.eup %4866  ;;  %v6087_v62 = vadd.f32 1e-05, %v655_v44  ;;  %7324 = vst [vmem:[#allocation18_spill] sm:$0xff] %v6092_v17  ;;  %v964_v21 = vsub.f32 1.5, %v963_v43 }
 0x2eb   : > { %v944_v35 = vsub.f32 1.5, %v943_v47  ;;  %v951_v47 = vmul.f32 %v4867_v19, %v6060_v10  ;;  %v6097_v61 = vpop.eup %4868  ;;  %vm957_vm0 = vweird.f32 %v4867_v19 }
 0x2ec   : > { %4870 = vrsqrt.f32 %v6087_v62  ;;  %v965_v28 = vmul.f32 %v6046_v0, %v964_v21  ;;  %vm6110_vm3 = vmor %vm956_vm15, %vm957_vm0  ;;  %v971_v3 = vmul.f32 %v6097_v61, %v6075_v39  ;;  %vm986_vm5 = vweird.f32 %v6087_v62 }
 0x2ed   : > { %v945_v60 = vmul.f32 %v4865_v23, %v944_v35  ;;  %v952_v1 = vmul.f32 %v4867_v19, %v951_v47  ;;  %v4180_v35 = vld [vmem:[#allocation7 + $0xf0] sm:$0xf0]  ;;  %vm977_vm8 = vweird.f32 %v6097_v61 }
 0x2ee   : > { %v4183_v43 = vor.u32 %v4608_v4, %v4180_v35  ;;  %v969_v4 = vsel %vm6118_vm4, %v6046_v0, %v965_v28  ;;  %v972_v35 = vmul.f32 %v6097_v61, %v971_v3  ;;  %v4600_v28 = vld [vmem:[#allocation7 + $0x94] sm:$0xf]  ;;  %vm978_vm10 = vmor %vm976_vm7, %vm977_vm8 }
 0x2ef   : > { %v949_v11 = vsel %vm948_vm14, %v4865_v23, %v945_v60  ;;  %v953_v24 = vmul.f32 0.5, %v952_v1  ;;  %v1106_v23 = vadd.f32 %v5978_v16, %v1070_v54  ;;  %v6116_v60 = vpop.f32.mrf.mxu3  ;;  %v6126_v1 = vpop.f32.mrf.mxu0  ;;  %v4148_v3 = vld [vmem:[#allocation7 + $0xb0] sm:$0xf0] }
 0x2f0   : > { %v1035_v7 = vmul.f32 %v949_v11, %v5864_v8  ;;  %7328 = vst [vmem:[#allocation20_spill] sm:$0xff] %v6116_v60  ;;  %1981 = vmatpush.bf16.msrb.mxu1 %v4183_v43  ;;  %v4146_v43 = vld [vmem:[#allocation7 + $0x90] sm:$0xf]  ;;  %v1037_v60 = vmul.f32 %v969_v4, %v5854_v20  ;;  %v973_v47 = vmul.f32 0.5, %v972_v35  ;;  %v6144_v31 = vpop.f32.mrf.mxu2  ;;  %v4593_v20 = vld [vmem:[#allocation7 + $0x5c] sm:$0xf] }
 0x2f1   : > { %v954_v44 = vsub.f32 1.5, %v953_v24  ;;  %7331 = vst [vmem:[#allocation21_spill] sm:$0xff] %v6126_v1  ;;  %v6133_v24 = vpop.f32.mrf.mxu1 }
 0x2f2   : > { %v1071_v42 = vmul.f32 %v5971_v56, %v1035_v7  ;;  %v6105_v50 = vpop.eup %4870  ;;  %7332 = vst [vmem:[#allocation22_spill] sm:$0xff] %v6133_v24 }
 0x2f3   : > { %v955_v54 = vmul.f32 %v4867_v19, %v954_v44  ;;  %v981_v7 = vmul.f32 %v6105_v50, %v6087_v62  ;;  %v4605_v44 = vld [vmem:[#allocation7 + $0xb4] sm:$0xf0]  ;;  %vm987_vm6 = vweird.f32 %v6105_v50 }
 0x2f4   : > { %v1107_v8 = vadd.f32 %v5978_v16, %v1071_v42  ;;  %vm6160_vm9 = vmor %vm986_vm5, %vm987_vm6 }
 0x2f5   : > { %v959_v21 = vsel %vm6110_vm3, %v4867_v19, %v955_v54  ;;  %v982_v42 = vmul.f32 %v6105_v50, %v981_v7  ;;  %v4604_v54 = vld [vmem:[#allocation7 + $0xac] sm:$0xf0]  ;;  %v4601_v7 = vld [vmem:[#allocation7 + $0x9c] sm:$0xf] }
 0x2f6   : > { %v6122_v11 = vpack.c.bf16 %v1107_v8, %v1106_v23  ;;  %v1036_v19 = vmul.f32 %v959_v21, %v5913_v36  ;;  %v4154_v8 = vld [vmem:[#allocation7 + $0x98] sm:$0xf]  ;;  %v4147_v0 = vor.u32 %v4604_v54, %v4146_v43  ;;  %v4159_v17 = vor.u32 %v4601_v7, %v4156_v49  ;;  %v4592_v49 = vld [vmem:[#allocation7 + $0x54] sm:$0xf] }
 0x2f7   : > { %v983_v23 = vmul.f32 0.5, %v982_v42  ;;  %v4155_v10 = vor.u32 %v4605_v44, %v4154_v8  ;;  %v4151_v36 = vor.u32 %v4600_v28, %v4148_v3  ;;  %v4122_v21 = vld [vmem:[#allocation7 + $0x58] sm:$0xf]  ;;  %v4114_v44 = vld [vmem:[#allocation7 + $0x50] sm:$0xf]  ;;  %v6146_v4 = vpop.f32.mrf.mxu3  ;;  %v6148_v35 = vpop.f32.mrf.mxu0  ;;  %v974_v54 = vsub.f32 1.5, %v973_v47 }
 0x2f8   : > { %1600 = vmatmul.bf16.gmra.mxu0 %v6122_v11  ;;  %1689 = vmatmul.bf16.gmra.mxu1 %v6122_v11  ;;  %v1072_v24 = vmul.f32 %v5971_v56, %v1036_v19  ;;  %v4597_v42 = vld [vmem:[#allocation7 + $0x74] sm:$0xf0]  ;;  %v4124_v19 = vld [vmem:[#allocation7 + $0x78] sm:$0xf0]  ;;  %v6167_v39 = vpop.f32.mrf.mxu2 }
 0x2f9   : > { %1778 = vmatmul.bf16.gmra.mxu2 %v6122_v11  ;;  %1867 = vmatmul.bf16.gmra.mxu3 %v6122_v11  ;;  %v984_v1 = vsub.f32 1.5, %v983_v23  ;;  %v4123_v8 = vor.u32 %v4597_v42, %v4122_v21  ;;  %v4116_v23 = vld [vmem:[#allocation7 + $0x70] sm:$0xf0]  ;;  %v6151_v43 = vpop.f32.mrf.mxu1  ;;  %v4127_v28 = vor.u32 %v4593_v20, %v4124_v19  ;;  %v975_v62 = vmul.f32 %v6097_v61, %v974_v54 }
 0x2fa   : > { %2071 = vmatpush.bf16.msrb.mxu2 %v4155_v10  ;;  %1893 = vmatpush.bf16.msrb.mxu0 %v4147_v0  ;;  %v1073_v10 = vmul.f32 %v5971_v56, %v1037_v60  ;;  %v1108_v7 = vadd.f32 %v5978_v16, %v1072_v24  ;;  %v4115_v0 = vor.u32 %v4596_v52, %v4114_v44 }
 0x2fb   : > { %2160 = vmatpush.bf16.msrb.mxu3 %v4159_v17  ;;  %1982 = vmatpush.bf16.msrb.mxu1 %v4151_v36  ;;  %v985_v17 = vmul.f32 %v6105_v50, %v984_v1  ;;  %v4119_v60 = vor.u32 %v4592_v49, %v4116_v23  ;;  %7335 = vst [vmem:[#allocation23_spill] sm:$0xff] %v6167_v39 }
 0x2fc   : > { %v1109_v3 = vadd.f32 %v5978_v16, %v1073_v10  ;;  %v979_v36 = vsel %vm978_vm10, %v6097_v61, %v975_v62 }
 0x2fd   : > { %v989_v1 = vsel %vm6160_vm9, %v6105_v50, %v985_v17  ;;  %v1038_v50 = vmul.f32 %v979_v36, %v5902_v55 }
 0x2fe   : > { %2072 = vmatpush.bf16.msrb.mxu2 %v4123_v8  ;;  %1894 = vmatpush.bf16.msrb.mxu0 %v4115_v0  ;;  %v6165_v52 = vpack.c.bf16 %v1109_v3, %v1108_v7  ;;  %v1039_v42 = vmul.f32 %v989_v1, %v5926_v26 }
 0x2ff   : > { %2161 = vmatpush.bf16.msrb.mxu3 %v4127_v28  ;;  %1983 = vmatpush.bf16.msrb.mxu1 %v4119_v60  ;;  %v6172_v24 = vpop.f32.mrf.mxu3  ;;  %v6179_v21 = vpop.f32.mrf.mxu0  ;;  %v1074_v20 = vmul.f32 %v5971_v56, %v1038_v50 }
 0x300   : > { %7336 = vst [vmem:[#allocation24_spill] sm:$0xff] %v6172_v24  ;;  %v1075_v44 = vmul.f32 %v5971_v56, %v1039_v42  ;;  %v6187_v10 = vpop.f32.mrf.mxu2  ;;  %v623_v50 = vpop.xlane.xlu2 %622 }
 0x301   : > { %v6182_v8 = vpop.f32.mrf.mxu1  ;;  %v1110_v23 = vadd.f32 %v5978_v16, %v1074_v20 }
 0x302   : > { %v1111_v61 = vadd.f32 %v5978_v16, %v1075_v44 }
 0x304   : > { %v6197_v26 = vpack.c.bf16 %v1111_v61, %v1110_v23  ;;  %v656_v61 = vmul.f32 %v623_v50, %v5330_v13 }
 0x307   : > { %v6189_v19 = vpop.f32.mrf.mxu3  ;;  %v6192_v49 = vpop.f32.mrf.mxu0 }
 0x308   : > { %1605 = vmatmul.bf16.gmra.mxu0 %v6165_v52  ;;  %1694 = vmatmul.bf16.gmra.mxu1 %v6165_v52  ;;  %7337 = vst [vmem:[#allocation25_spill] sm:$0xff] %v6192_v49  ;;  %v6203_v55 = vpop.f32.mrf.mxu2 }
 0x309   : > { %1783 = vmatmul.bf16.gmra.mxu2 %v6165_v52  ;;  %1872 = vmatmul.bf16.gmra.mxu3 %v6165_v52  ;;  %v6195_v54 = vpop.f32.mrf.mxu1  ;;  %7339 = vst [vmem:[#allocation27_spill] sm:$0xff] %v6203_v55  ;;  %v4090_v55 = vld [vmem:[#allocation7 + $0x18] sm:$0xf] }
 0x30a   : > { %7338 = vst [vmem:[#allocation26_spill] sm:$0xff] %v6195_v54  ;;  %v4084_v54 = vld [vmem:[#allocation7 + $0x30] sm:$0xf0] }
 0x30f   : > { %v6205_v7 = vpop.f32.mrf.mxu3  ;;  %v6207_v0 = vpop.f32.mrf.mxu0 }
 0x310   : > { %7340 = vst [vmem:[#allocation28_spill] sm:$0xff] %v6205_v7  ;;  %v6211_v17 = vpop.f32.mrf.mxu2 }
 0x311   : > { %7341 = vst [vmem:[#allocation29_spill] sm:$0xff] %v6207_v0  ;;  %v6209_v28 = vpop.f32.mrf.mxu1 }
 0x312   : > { %7342 = vst [vmem:[#allocation30_spill] sm:$0xff] %v6209_v28 }
 0x313   : > { %7343 = vst [vmem:[#allocation31_spill] sm:$0xff] %v6211_v17  ;;  %v4588_v17 = vld [vmem:[#allocation7 + $0x2c] sm:$0xf0] }
 0x317   : > { %v6213_v60 = vpop.f32.mrf.mxu3  ;;  %v6215_v3 = vpop.f32.mrf.mxu0 }
 0x318   : > { %1610 = vmatmul.bf16.gmra.mxu0 %v6197_v26  ;;  %1699 = vmatmul.bf16.gmra.mxu1 %v6197_v26  ;;  %7344 = vst [vmem:[#allocation32_spill] sm:$0xff] %v6213_v60  ;;  %v6219_v62 = vpop.f32.mrf.mxu2  ;;  %v4082_v60 = vld [vmem:[#allocation7 + $0x10] sm:$0xf] }
 0x319   : > { %1788 = vmatmul.bf16.gmra.mxu2 %v6197_v26  ;;  %1877 = vmatmul.bf16.gmra.mxu3 %v6197_v26  ;;  %7345 = vst [vmem:[#allocation33_spill] sm:$0xff] %v6215_v3  ;;  %v6217_v47 = vpop.f32.mrf.mxu1 }
 0x31a   : > { %7346 = vst [vmem:[#allocation34_spill] sm:$0xff] %v6217_v47  ;;  %v688_v47 = vadd.f32 1e-05, %v656_v61  ;;  %v4092_v61 = vld [vmem:[#allocation7 + $0x38] sm:$0xf0] }
 0x31b   : > { %7347 = vst [vmem:[#allocation35_spill] sm:$0xff] %v6219_v62 }
 0x31c   : > { %4872 = vrsqrt.f32 %v688_v47  ;;  %vm996_vm11 = vweird.f32 %v688_v47 }
 0x31f   : > { %v6221_v1 = vpop.f32.mrf.mxu3  ;;  %v6223_v36 = vpop.f32.mrf.mxu0 }
 0x320   : > { %7348 = vst [vmem:[#allocation36_spill] sm:$0xff] %v6221_v1  ;;  %v6227_v44 = vpop.f32.mrf.mxu2 }
 0x321   : > { %7349 = vst [vmem:[#allocation37_spill] sm:$0xff] %v6223_v36  ;;  %v6225_v42 = vpop.f32.mrf.mxu1 }
 0x322   : > { %7350 = vst [vmem:[#allocation38_spill] sm:$0xff] %v6225_v42  ;;  %v4873_v7 = vpop.eup %4872 }
 0x323   : > { %7351 = vst [vmem:[#allocation39_spill] sm:$0xff] %v6227_v44  ;;  %v991_v44 = vmul.f32 %v4873_v7, %v688_v47  ;;  %vm997_vm12 = vweird.f32 %v4873_v7 }
 0x324   : > { %vm998_vm13 = vmor %vm996_vm11, %vm997_vm12 }
 0x325   : > { %v992_v49 = vmul.f32 %v4873_v7, %v991_v44  ;;  %v4669_v44 = vld [vmem:[#allocation10 + $0xb8] sm:$0xff] }
 0x327   : > { %v6229_v20 = vpop.f32.mrf.mxu3  ;;  %v6232_v23 = vpop.f32.mrf.mxu0 }
 0x328   : > { %7352 = vst [vmem:[#allocation40_spill] sm:$0xff] %v6229_v20  ;;  %v6236_v62 = vpop.f32.mrf.mxu2  ;;  %v4589_v20 = vld [vmem:[#allocation7 + $0x34] sm:$0xf0] }
 0x329   : > { %7353 = vst [vmem:[#allocation41_spill] sm:$0xff] %v6232_v23  ;;  %v6234_v3 = vpop.f32.mrf.mxu1  ;;  %v4091_v23 = vor.u32 %v4589_v20, %v4090_v55  ;;  %v993_v20 = vmul.f32 0.5, %v992_v49 }
 0x32a   : > { %7354 = vst [vmem:[#allocation42_spill] sm:$0xff] %v6234_v3  ;;  %v4585_v3 = vld [vmem:[#allocation7 + $0x1c] sm:$0xf] }
 0x32b   : > { %7355 = vst [vmem:[#allocation43_spill] sm:$0xff] %v6236_v62  ;;  %v4095_v0 = vor.u32 %v4585_v3, %v4092_v61  ;;  %2073 = vmatpush.bf16.msrb.mxu2 %v4091_v23 }
 0x32d   : > { %2162 = vmatpush.bf16.msrb.mxu3 %v4095_v0 }
 0x32f   : > { %v6238_v1 = vpop.f32.mrf.mxu3  ;;  %v6240_v36 = vpop.f32.mrf.mxu0  ;;  %3322 = vmatpush.bf16.msra.mxu2 %v4669_v44 }
 0x330   : > { %7356 = vst [vmem:[#allocation44_spill] sm:$0xff] %v6238_v1  ;;  %v6244_v50 = vpop.f32.mrf.mxu2  ;;  %v4083_v1 = vor.u32 %v4588_v17, %v4082_v60  ;;  %v994_v60 = vsub.f32 1.5, %v993_v20 }
 0x331   : > { %7357 = vst [vmem:[#allocation45_spill] sm:$0xff] %v6240_v36  ;;  %v6242_v42 = vpop.f32.mrf.mxu1  ;;  %v4584_v36 = vld [vmem:[#allocation7 + $0x14] sm:$0xf] }
 0x332   : > { %7358 = vst [vmem:[#allocation46_spill] sm:$0xff] %v6242_v42  ;;  %v4087_v39 = vor.u32 %v4584_v36, %v4084_v54  ;;  %1895 = vmatpush.bf16.msrb.mxu0 %v4083_v1  ;;  %v995_v36 = vmul.f32 %v4873_v7, %v994_v60 }
 0x333   : > { %7359 = vst [vmem:[#allocation47_spill] sm:$0xff] %v6244_v50 }
 0x334   : > { %1984 = vmatpush.bf16.msrb.mxu1 %v4087_v39  ;;  %v999_v39 = vsel %vm998_vm13, %v4873_v7, %v995_v36 }
 0x337   : > { %v6246_v28 = vpop.f32.mrf.mxu3  ;;  %v6248_v62 = vpop.f32.mrf.mxu0 }
 0x338   : > { %7360 = vst [vmem:[#allocation48_spill] sm:$0xff] %v6246_v28  ;;  %v6253_v28 = vpop.f32.mrf.mxu2 }
 0x339   : > { %v6250_v42 = vpop.f32.mrf.mxu1  ;;  %7361 = vst [vmem:[#allocation49_spill] sm:$0xff] %v6253_v28  ;;  %v4661_v28 = vld [vmem:[#allocation10 + $0x78] sm:$0xff] }
 0x33a   : > { %3233 = vmatpush.bf16.msra.mxu1 %v4661_v28 }
 0x33f   : > { %v6255_v17 = vpop.f32.mrf.mxu3  ;;  %v6257_v3 = vpop.f32.mrf.mxu0 }
 0x340   : > { %7362 = vst [vmem:[#allocation50_spill] sm:$0xff] %v6255_v17  ;;  %v6261_v49 = vpop.f32.mrf.mxu2  ;;  %v4677_v17 = vld [vmem:[#allocation10 + $0xf8] sm:$0xff] }
 0x341   : > { %v6259_v61 = vpop.f32.mrf.mxu1  ;;  %3411 = vmatpush.bf16.msra.mxu3 %v4677_v17 }
 0x347   : > { %v6263_v1 = vpop.f32.mrf.mxu3  ;;  %v6266_v20 = vpop.f32.mrf.mxu0 }
 0x348   : > { %7363 = vst [vmem:[#allocation51_spill] sm:$0xff] %v6266_v20 }
 0x349   : > { %v6268_v47 = vpop.f32.mrf.mxu1 }
 0x34a   : > { %7364 = vst [vmem:[#allocation52_spill] sm:$0xff] %v6268_v47 }
 0x34f   : > { %v6276_v44 = vpop.f32.mrf.mxu3 }
 0x350   : > { %7366 = vst [vmem:[#allocation54_spill] sm:$0xff] %v6276_v44 }
 0x351   : > { %v625_v24 = vpop.xlane.xlu0 %624 }
 0x352   : > { %v657_v50 = vmul.f32 %v625_v24, %v5330_v13 }
 0x354   : > { %v689_v55 = vadd.f32 1e-05, %v657_v50  ;;  %v1040_v50 = vmul.f32 %v999_v39, %v5944_v6  ;;  %v6274_v39 = vpop.f32.mrf.mxu2 }
 0x355   : > { %7365 = vst [vmem:[#allocation53_spill] sm:$0xff] %v6274_v39 }
 0x356   : > { %4874 = vrsqrt.f32 %v689_v55  ;;  %vm1006_vm15 = vweird.f32 %v689_v55  ;;  %v1076_v7 = vmul.f32 %v5971_v56, %v1040_v50 }
 0x357   : > { %v6291_v17 = vpop.f32.mrf.mxu3 }
 0x358   : > { %v1112_v6 = vadd.f32 %v5978_v16, %v1076_v7  ;;  %7370 = vst [vmem:[#allocation58_spill] sm:$0xff] %v6291_v17 }
 0x35c   : > { %v4875_v54 = vpop.eup %4874 }
 0x35d   : > { %v1001_v13 = vmul.f32 %v4875_v54, %v689_v55  ;;  %vm1007_vm14 = vweird.f32 %v4875_v54 }
 0x35e   : > { %vm1008_vm0 = vmor %vm1006_vm15, %vm1007_vm14 }
 0x35f   : > { %v1002_v24 = vmul.f32 %v4875_v54, %v1001_v13 }
 0x361   : > { %v1003_v0 = vmul.f32 0.5, %v1002_v24  ;;  %v4653_v24 = vld [vmem:[#allocation10 + $0x38] sm:$0xff] }
 0x362   : > { %3144 = vmatpush.bf16.msra.mxu0 %v4653_v24  ;;  %v4652_v24 = vld [vmem:[#allocation10 + $0x30] sm:$0xff] }
 0x363   : > { %v1004_v23 = vsub.f32 1.5, %v1003_v0 }
 0x365   : > { %v1005_v60 = vmul.f32 %v4875_v54, %v1004_v23  ;;  %v6281_v23 = vpop.f32.mrf.mxu0 }
 0x366   : > { %7367 = vst [vmem:[#allocation55_spill] sm:$0xff] %v6281_v23  ;;  %3145 = vmatpush.bf16.msra.mxu0 %v4652_v24 }
 0x367   : > { %v1009_v13 = vsel %vm1008_vm0, %v4875_v54, %v1005_v60  ;;  %v6299_v60 = vpop.f32.mrf.mxu3 }
 0x368   : > { %v1041_v36 = vmul.f32 %v1009_v13, %v6016_v22  ;;  %v6283_v22 = vpop.f32.mrf.mxu1  ;;  %7374 = vst [vmem:[#allocation62_spill] sm:$0xff] %v6299_v60  ;;  %v4668_v13 = vld [vmem:[#allocation10 + $0xb0] sm:$0xff] }
 0x369   : > { %7368 = vst [vmem:[#allocation56_spill] sm:$0xff] %v6283_v22  ;;  %3323 = vmatpush.bf16.msra.mxu2 %v4668_v13 }
 0x36a   : > { %v1077_v0 = vmul.f32 %v5971_v56, %v1041_v36  ;;  %v6289_v56 = vpop.f32.mrf.mxu2 }
 0x36b   : > { %7369 = vst [vmem:[#allocation57_spill] sm:$0xff] %v6289_v56 }
 0x36c   : > { %v1113_v55 = vadd.f32 %v5978_v16, %v1077_v0  ;;  %v4676_v0 = vld [vmem:[#allocation10 + $0xf0] sm:$0xff] }
 0x36d   : > { %v6293_v16 = vpop.f32.mrf.mxu0  ;;  %3412 = vmatpush.bf16.msra.mxu3 %v4676_v0 }
 0x36e   : > { %v6279_v54 = vpack.c.bf16 %v1113_v55, %v1112_v6  ;;  %7371 = vst [vmem:[#allocation59_spill] sm:$0xff] %v6293_v16  ;;  %v4660_v6 = vld [vmem:[#allocation10 + $0x70] sm:$0xff] }
 0x36f   : > { %v6311_v60 = vpop.f32.mrf.mxu3  ;;  %3234 = vmatpush.bf16.msra.mxu1 %v4660_v6 }
 0x370   : > { %1615 = vmatmul.bf16.gmra.mxu0 %v6279_v54  ;;  %1704 = vmatmul.bf16.gmra.mxu1 %v6279_v54  ;;  %v6295_v28 = vpop.f32.mrf.mxu1  ;;  %7378 = vst [vmem:[#allocation66_spill] sm:$0xff] %v6311_v60 }
 0x371   : > { %1793 = vmatmul.bf16.gmra.mxu2 %v6279_v54  ;;  %1882 = vmatmul.bf16.gmra.mxu3 %v6279_v54  ;;  %7372 = vst [vmem:[#allocation60_spill] sm:$0xff] %v6295_v28 }
 0x372   : > { %v6297_v50 = vpop.f32.mrf.mxu2 }
 0x373   : > { %7373 = vst [vmem:[#allocation61_spill] sm:$0xff] %v6297_v50 }
 0x375   : > { %v6305_v7 = vpop.f32.mrf.mxu0 }
 0x376   : > { %7375 = vst [vmem:[#allocation63_spill] sm:$0xff] %v6305_v7 }
 0x377   : > { %v6323_v13 = vpop.f32.mrf.mxu3 }
 0x378   : > { %v6307_v36 = vpop.f32.mrf.mxu1  ;;  %7382 = vst [vmem:[#allocation70_spill] sm:$0xff] %v6323_v13  ;;  %v4651_v13 = vld [vmem:[#allocation10 + $0x28] sm:$0xff] }
 0x379   : > { %7376 = vst [vmem:[#allocation64_spill] sm:$0xff] %v6307_v36  ;;  %3146 = vmatpush.bf16.msra.mxu0 %v4651_v13 }
 0x37a   : > { %v6309_v55 = vpop.f32.mrf.mxu2 }
 0x37b   : > { %7377 = vst [vmem:[#allocation65_spill] sm:$0xff] %v6309_v55 }
 0x37d   : > { %v6313_v50 = vpop.f32.mrf.mxu0 }
 0x37e   : > { %7379 = vst [vmem:[#allocation67_spill] sm:$0xff] %v6313_v50 }
 0x37f   : > { %v6331_v6 = vpop.f32.mrf.mxu3 }
 0x380   : > { %1896 = vmatmul.bf16.vlgmr.msrb.gmra.mxu0 %v5505_v14  ;;  %1985 = vmatmul.bf16.vlgmr.msrb.gmra.mxu1 %v5505_v14  ;;  %v6315_v28 = vpop.f32.mrf.mxu1  ;;  %7386 = vst [vmem:[#allocation74_spill] sm:$0xff] %v6331_v6 }
 0x381   : > { %2074 = vmatmul.bf16.vlgmr.msrb.gmra.mxu2 %v5505_v14  ;;  %2163 = vmatmul.bf16.vlgmr.msrb.gmra.mxu3 %v5505_v14  ;;  %7380 = vst [vmem:[#allocation68_spill] sm:$0xff] %v6315_v28 }
 0x382   : > { %v6321_v14 = vpop.f32.mrf.mxu2 }
 0x383   : > { %7381 = vst [vmem:[#allocation69_spill] sm:$0xff] %v6321_v14  ;;  %v4675_v14 = vld [vmem:[#allocation10 + $0xe8] sm:$0xff] }
 0x384   : > { %3413 = vmatpush.bf16.msra.mxu3 %v4675_v14 }
 0x385   : > { %v6325_v16 = vpop.f32.mrf.mxu0 }
 0x386   : > { %7383 = vst [vmem:[#allocation71_spill] sm:$0xff] %v6325_v16 }
 0x388   : > { %v6327_v24 = vpop.f32.mrf.mxu1 }
 0x389   : > { %7384 = vst [vmem:[#allocation72_spill] sm:$0xff] %v6327_v24  ;;  %v4659_v24 = vld [vmem:[#allocation10 + $0x68] sm:$0xff] }
 0x38a   : > { %v6329_v0 = vpop.f32.mrf.mxu2  ;;  %3235 = vmatpush.bf16.msra.mxu1 %v4659_v24 }
 0x38b   : > { %7385 = vst [vmem:[#allocation73_spill] sm:$0xff] %v6329_v0 }
 0x38d   : > { %v6333_v28 = vpop.f32.mrf.mxu0 }
 0x38e   : > { %7387 = vst [vmem:[#allocation75_spill] sm:$0xff] %v6333_v28  ;;  %v6343_v28 = vpop.f32.mrf.mxu3 }
 0x38f   : > { %7390 = vst [vmem:[#allocation78_spill] sm:$0xff] %v6343_v28 }
 0x390   : > { %1901 = vmatmul.bf16.gmra.mxu0 %v5559_v59  ;;  %1990 = vmatmul.bf16.gmra.mxu1 %v5559_v59  ;;  %v6335_v50 = vpop.f32.mrf.mxu1 }
 0x391   : > { %2079 = vmatmul.bf16.gmra.mxu2 %v5559_v59  ;;  %2168 = vmatmul.bf16.gmra.mxu3 %v5559_v59  ;;  %7388 = vst [vmem:[#allocation76_spill] sm:$0xff] %v6335_v50  ;;  %v4667_v59 = vld [vmem:[#allocation10 + $0xa8] sm:$0xff] }
 0x392   : > { %3324 = vmatpush.bf16.msra.mxu2 %v4667_v59  ;;  %v6341_v6 = vpop.f32.mrf.mxu2 }
 0x393   : > { %7389 = vst [vmem:[#allocation77_spill] sm:$0xff] %v6341_v6  ;;  %v4674_v6 = vld [vmem:[#allocation10 + $0xe0] sm:$0xff] }
 0x394   : > { %3414 = vmatpush.bf16.msra.mxu3 %v4674_v6 }
 0x395   : > { %v6345_v50 = vpop.f32.mrf.mxu0 }
 0x396   : > { %7391 = vst [vmem:[#allocation79_spill] sm:$0xff] %v6345_v50  ;;  %v6351_v60 = vpop.f32.mrf.mxu3 }
 0x397   : > { %7394 = vst [vmem:[#allocation82_spill] sm:$0xff] %v6351_v60 }
 0x398   : > { %v6347_v0 = vpop.f32.mrf.mxu1 }
 0x399   : > { %7392 = vst [vmem:[#allocation80_spill] sm:$0xff] %v6347_v0 }
 0x39a   : > { %v6349_v16 = vpop.f32.mrf.mxu2 }
 0x39b   : > { %7393 = vst [vmem:[#allocation81_spill] sm:$0xff] %v6349_v16 }
 0x39e   : > { %v6363_v24 = vpop.f32.mrf.mxu3 }
 0x39f   : > { %7398 = vst [vmem:[#allocation86_spill] sm:$0xff] %v6363_v24 }
 0x3a0   : > { %1906 = vmatmul.bf16.gmra.mxu0 %v5584_v38  ;;  %1995 = vmatmul.bf16.gmra.mxu1 %v5584_v38  ;;  %v6359_v14 = vpop.f32.mrf.mxu1 }
 0x3a1   : > { %2084 = vmatmul.bf16.gmra.mxu2 %v5584_v38  ;;  %2173 = vmatmul.bf16.gmra.mxu3 %v5584_v38  ;;  %v6357_v38 = vpop.f32.mrf.mxu0  ;;  %7396 = vst [vmem:[#allocation84_spill] sm:$0xff] %v6359_v14  ;;  %v4658_v14 = vld [vmem:[#allocation10 + $0x60] sm:$0xff] }
 0x3a2   : > { %7395 = vst [vmem:[#allocation83_spill] sm:$0xff] %v6357_v38  ;;  %v6361_v13 = vpop.f32.mrf.mxu2  ;;  %v4650_v38 = vld [vmem:[#allocation10 + $0x20] sm:$0xff]  ;;  %3236 = vmatpush.bf16.msra.mxu1 %v4658_v14 }
 0x3a3   : > { %7397 = vst [vmem:[#allocation85_spill] sm:$0xff] %v6361_v13  ;;  %3147 = vmatpush.bf16.msra.mxu0 %v4650_v38 }
 0x3a6   : > { %v6375_v24 = vpop.f32.mrf.mxu3 }
 0x3a7   : > { %7402 = vst [vmem:[#allocation90_spill] sm:$0xff] %v6375_v24 }
 0x3a8   : > { %v6367_v28 = vpop.f32.mrf.mxu1 }
 0x3a9   : > { %v6365_v59 = vpop.f32.mrf.mxu0  ;;  %7400 = vst [vmem:[#allocation88_spill] sm:$0xff] %v6367_v28 }
 0x3aa   : > { %7399 = vst [vmem:[#allocation87_spill] sm:$0xff] %v6365_v59  ;;  %v6373_v13 = vpop.f32.mrf.mxu2 }
 0x3ab   : > { %7401 = vst [vmem:[#allocation89_spill] sm:$0xff] %v6373_v13 }
 0x3ae   : > { %v6383_v16 = vpop.f32.mrf.mxu3 }
 0x3af   : > { %7406 = vst [vmem:[#allocation94_spill] sm:$0xff] %v6383_v16  ;;  %v4665_v16 = vld [vmem:[#allocation10 + $0x98] sm:$0xff] }
 0x3b0   : > { %1911 = vmatmul.bf16.gmra.mxu0 %v5618_v46  ;;  %2000 = vmatmul.bf16.gmra.mxu1 %v5618_v46  ;;  %v6379_v59 = vpop.f32.mrf.mxu1 }
 0x3b1   : > { %2089 = vmatmul.bf16.gmra.mxu2 %v5618_v46  ;;  %2178 = vmatmul.bf16.gmra.mxu3 %v5618_v46  ;;  %v4666_v46 = vld [vmem:[#allocation10 + $0xa0] sm:$0xff]  ;;  %v6377_v28 = vpop.f32.mrf.mxu0  ;;  %7404 = vst [vmem:[#allocation92_spill] sm:$0xff] %v6379_v59  ;;  %v4649_v59 = vld [vmem:[#allocation10 + $0x18] sm:$0xff] }
 0x3b2   : > { %3325 = vmatpush.bf16.msra.mxu2 %v4666_v46  ;;  %7403 = vst [vmem:[#allocation91_spill] sm:$0xff] %v6377_v28  ;;  %v6381_v60 = vpop.f32.mrf.mxu2  ;;  %v4673_v28 = vld [vmem:[#allocation10 + $0xd8] sm:$0xff]  ;;  %3148 = vmatpush.bf16.msra.mxu0 %v4649_v59 }
 0x3b3   : > { %7405 = vst [vmem:[#allocation93_spill] sm:$0xff] %v6381_v60  ;;  %3415 = vmatpush.bf16.msra.mxu3 %v4673_v28 }
 0x3b6   : > { %v6395_v14 = vpop.f32.mrf.mxu3  ;;  %3326 = vmatpush.bf16.msra.mxu2 %v4665_v16 }
 0x3b7   : > { %7410 = vst [vmem:[#allocation98_spill] sm:$0xff] %v6395_v14  ;;  %v4657_v14 = vld [vmem:[#allocation10 + $0x58] sm:$0xff] }
 0x3b8   : > { %v6389_v38 = vpop.f32.mrf.mxu1  ;;  %3237 = vmatpush.bf16.msra.mxu1 %v4657_v14 }
 0x3b9   : > { %7408 = vst [vmem:[#allocation96_spill] sm:$0xff] %v6389_v38 }
 0x3ba   : > { %v6393_v6 = vpop.f32.mrf.mxu2 }
 0x3bb   : > { %7409 = vst [vmem:[#allocation97_spill] sm:$0xff] %v6393_v6 }
 0x3be   : > { %v6407_v6 = vpop.f32.mrf.mxu3 }
 0x3bf   : > { %7414 = vst [vmem:[#allocation102_spill] sm:$0xff] %v6407_v6  ;;  %v1194_v6 = vld [vmem:[#allocation8] sm:$0xff] }
 0x3c0   : > { %1916 = vmatmul.bf16.gmra.mxu0 %v5695_v27  ;;  %2005 = vmatmul.bf16.gmra.mxu1 %v5695_v27  ;;  %v6399_v60 = vpop.f32.mrf.mxu1  ;;  %v6421_v16 = vperm.slane %v1194_v6, 0  ;;  %v6423_v28 = vperm.slane %v1194_v6, 1  ;;  %v6429_v55 = vperm.slane %v1194_v6, 2  ;;  %v6457_v47 = vperm.slane %v1194_v6, 6 }
 0x3c1   : > { %2094 = vmatmul.bf16.gmra.mxu2 %v5695_v27  ;;  %2183 = vmatmul.bf16.gmra.mxu3 %v5695_v27  ;;  %v6387_v27 = vpop.f32.mrf.mxu0  ;;  %7412 = vst [vmem:[#allocation100_spill] sm:$0xff] %v6399_v60 }
 0x3c2   : > { %7407 = vst [vmem:[#allocation95_spill] sm:$0xff] %v6387_v27 }
 0x3c6   : > { %v6415_v27 = vpop.f32.mrf.mxu3 }
 0x3c7   : > { %7418 = vst [vmem:[#allocation106_spill] sm:$0xff] %v6415_v27 }
 0x3c8   : > { %v6411_v60 = vpop.f32.mrf.mxu1 }
 0x3c9   : > { %v6397_v46 = vpop.f32.mrf.mxu0  ;;  %7416 = vst [vmem:[#allocation104_spill] sm:$0xff] %v6411_v60 }
 0x3ca   : > { %7411 = vst [vmem:[#allocation99_spill] sm:$0xff] %v6397_v46 }
 0x3d0   : > { %1921 = vmatmul.bf16.gmra.mxu0 %v5759_v32  ;;  %2010 = vmatmul.bf16.gmra.mxu1 %v5759_v32 }
 0x3d1   : > { %2099 = vmatmul.bf16.gmra.mxu2 %v5759_v32  ;;  %2188 = vmatmul.bf16.gmra.mxu3 %v5759_v32  ;;  %v6405_v32 = vpop.f32.mrf.mxu2  ;;  %v6409_v46 = vpop.f32.mrf.mxu0 }
 0x3d2   : > { %7413 = vst [vmem:[#allocation101_spill] sm:$0xff] %v6405_v32 }
 0x3d3   : > { %7415 = vst [vmem:[#allocation103_spill] sm:$0xff] %v6409_v46 }
 0x3d9   : > { %v6413_v38 = vpop.f32.mrf.mxu2 }
 0x3da   : > { %7417 = vst [vmem:[#allocation105_spill] sm:$0xff] %v6413_v38 }
 0x3e0   : > { %1926 = vmatmul.bf16.gmra.mxu0 %v5791_v34  ;;  %2015 = vmatmul.bf16.gmra.mxu1 %v5791_v34 }
 0x3e1   : > { %2104 = vmatmul.bf16.gmra.mxu2 %v5791_v34  ;;  %2193 = vmatmul.bf16.gmra.mxu3 %v5791_v34 }
 0x3ed   : > { %v1616_v34 = vpop.f32.mrf.mxu0  ;;  %v1705_v24 = vpop.f32.mrf.mxu1 }
 0x3ee   : > { %v1617_v46 = vadd.f32 %v1616_v34, %v6421_v16  ;;  %v1706_v13 = vadd.f32 %v1705_v24, %v6423_v28 }
 0x3f0   : > { %1931 = vmatmul.bf16.gmra.mxu0 %v5825_v48  ;;  %2020 = vmatmul.bf16.gmra.mxu1 %v5825_v48  ;;  %v2484_v36 = vmax.f32 %v1617_v46, 0.0  ;;  %v2485_v7 = vmax.f32 %v1706_v13, 0.0  ;;  %v6441_v46 = vperm.slane %v1194_v6, 4  ;;  %v6443_v13 = vperm.slane %v1194_v6, 5 }
 0x3f1   : > { %2109 = vmatmul.bf16.gmra.mxu2 %v5825_v48  ;;  %2198 = vmatmul.bf16.gmra.mxu3 %v5825_v48  ;;  %v6431_v48 = vperm.slane %v1194_v6, 3 }
 0x3f4   : > { %v1794_v59 = vpop.f32.mrf.mxu2  ;;  %v1883_v14 = vpop.f32.mrf.mxu3 }
 0x3f5   : > { %v1618_v32 = vpop.f32.mrf.mxu0  ;;  %v1707_v38 = vpop.f32.mrf.mxu1  ;;  %v1795_v44 = vadd.f32 %v1794_v59, %v6429_v55  ;;  %v1884_v39 = vadd.f32 %v1883_v14, %v6431_v48 }
 0x3f6   : > { %v1619_v27 = vadd.f32 %v1618_v32, %v6421_v16  ;;  %v1708_v60 = vadd.f32 %v1707_v38, %v6423_v28 }
 0x3f7   : > { %v2486_v59 = vmax.f32 %v1795_v44, 0.0 }
 0x3f8   : > { %v2492_v0 = vmax.f32 %v1619_v27, 0.0  ;;  %v2493_v50 = vmax.f32 %v1708_v60, 0.0 }
 0x3fa   : > { %v6437_v27 = vpack.c.bf16 %v2492_v0, %v2484_v36  ;;  %v6439_v60 = vpack.c.bf16 %v2493_v50, %v2485_v7  ;;  %v4664_v36 = vld [vmem:[#allocation10 + $0x90] sm:$0xff] }
 0x3fb   : > { %v4648_v0 = vld [vmem:[#allocation10 + $0x10] sm:$0xff]  ;;  %3327 = vmatpush.bf16.msra.mxu2 %v4664_v36  ;;  %v6459_v36 = vperm.slane %v1194_v6, 7 }
 0x3fc   : > { %v1796_v17 = vpop.f32.mrf.mxu2  ;;  %v1885_v32 = vpop.f32.mrf.mxu3  ;;  %7419 = vst [vmem:[#allocation107_spill] sm:$0xff] %v6437_v27  ;;  %v4672_v50 = vld [vmem:[#allocation10 + $0xd0] sm:$0xff]  ;;  %3149 = vmatpush.bf16.msra.mxu0 %v4648_v0 }
 0x3fd   : > { %v1797_v38 = vadd.f32 %v1796_v17, %v6429_v55  ;;  %v1886_v34 = vadd.f32 %v1885_v32, %v6431_v48  ;;  %v1897_v56 = vpop.f32.mrf.mxu0  ;;  %v1986_v24 = vpop.f32.mrf.mxu1  ;;  %7420 = vst [vmem:[#allocation108_spill] sm:$0xff] %v6439_v60  ;;  %v2487_v17 = vmax.f32 %v1884_v39, 0.0  ;;  %3416 = vmatpush.bf16.msra.mxu3 %v4672_v50 }
 0x3fe   : > { %v1898_v32 = vadd.f32 %v1897_v56, %v6441_v46 }
 0x3ff   : > { %v2494_v22 = vmax.f32 %v1797_v38, 0.0  ;;  %v2495_v23 = vmax.f32 %v1886_v34, 0.0  ;;  %v1987_v38 = vadd.f32 %v1986_v24, %v6443_v13 }
 0x400   : > { %1936 = vmatmul.bf16.gmra.mxu0 %v5897_v51  ;;  %2025 = vmatmul.bf16.gmra.mxu1 %v5897_v51 }
 0x401   : > { %2114 = vmatmul.bf16.gmra.mxu2 %v5897_v51  ;;  %2203 = vmatmul.bf16.gmra.mxu3 %v5897_v51  ;;  %v6449_v7 = vpack.c.bf16 %v2494_v22, %v2486_v59  ;;  %v6451_v14 = vpack.c.bf16 %v2495_v23, %v2487_v17  ;;  %v4656_v22 = vld [vmem:[#allocation10 + $0x50] sm:$0xff]  ;;  %v2248_v23 = vmax.f32 %v1898_v32, 0.0  ;;  %v2249_v59 = vmax.f32 %v1987_v38, 0.0 }
 0x402   : > { %3238 = vmatpush.bf16.msra.mxu1 %v4656_v22 }
 0x403   : > { %7421 = vst [vmem:[#allocation109_spill] sm:$0xff] %v6449_v7 }
 0x404   : > { %7422 = vst [vmem:[#allocation110_spill] sm:$0xff] %v6451_v14  ;;  %v2075_v34 = vpop.f32.mrf.mxu2  ;;  %v2164_v44 = vpop.f32.mrf.mxu3 }
 0x405   : > { %v1899_v39 = vpop.f32.mrf.mxu0  ;;  %v1988_v60 = vpop.f32.mrf.mxu1  ;;  %v2076_v50 = vadd.f32 %v2075_v34, %v6457_v47 }
 0x406   : > { %v1900_v51 = vadd.f32 %v1899_v39, %v6441_v46  ;;  %v1989_v27 = vadd.f32 %v1988_v60, %v6443_v13  ;;  %v2165_v39 = vadd.f32 %v2164_v44, %v6459_v36 }
 0x407   : > { %v2250_v38 = vmax.f32 %v2076_v50, 0.0 }
 0x408   : > { %v2256_v17 = vmax.f32 %v1900_v51, 0.0  ;;  %v2257_v56 = vmax.f32 %v1989_v27, 0.0  ;;  %v2251_v51 = vmax.f32 %v2165_v39, 0.0 }
 0x40a   : > { %v6461_v24 = vpack.c.bf16 %v2256_v17, %v2248_v23  ;;  %v6463_v0 = vpack.c.bf16 %v2257_v56, %v2249_v59 }
 0x40c   : > { %7423 = vst [vmem:[#allocation111_spill] sm:$0xff] %v6461_v24  ;;  %v2077_v14 = vpop.f32.mrf.mxu2  ;;  %v2166_v60 = vpop.f32.mrf.mxu3 }
 0x40d   : > { %7424 = vst [vmem:[#allocation112_spill] sm:$0xff] %v6463_v0  ;;  %v2078_v7 = vadd.f32 %v2077_v14, %v6457_v47  ;;  %v2167_v6 = vadd.f32 %v2166_v60, %v6459_v36  ;;  %v1902_v20 = vpop.f32.mrf.mxu0  ;;  %v1991_v32 = vpop.f32.mrf.mxu1 }
 0x40e   : > { %v1903_v50 = vadd.f32 %v1902_v20, %v6441_v46  ;;  %v1992_v39 = vadd.f32 %v1991_v32, %v6443_v13 }
 0x40f   : > { %v2258_v27 = vmax.f32 %v2078_v7, 0.0  ;;  %v2259_v22 = vmax.f32 %v2167_v6, 0.0 }
 0x410   : > { %1941 = vmatmul.bf16.gmra.mxu0 %v5955_v30  ;;  %2030 = vmatmul.bf16.gmra.mxu1 %v5955_v30 }
 0x411   : > { %v6471_v23 = vpack.c.bf16 %v2258_v27, %v2250_v38  ;;  %v6473_v34 = vpack.c.bf16 %v2259_v22, %v2251_v51  ;;  %2119 = vmatmul.bf16.gmra.mxu2 %v5955_v30  ;;  %2208 = vmatmul.bf16.gmra.mxu3 %v5955_v30  ;;  %v2264_v38 = vmax.f32 %v1903_v50, 0.0  ;;  %v2265_v51 = vmax.f32 %v1992_v39, 0.0  ;;  %v4671_v50 = vld [vmem:[#allocation10 + $0xc8] sm:$0xff] }
 0x412   : > { %3417 = vmatpush.bf16.msra.mxu3 %v4671_v50 }
 0x413   : > { %7425 = vst [vmem:[#allocation113_spill] sm:$0xff] %v6471_v23 }
 0x414   : > { %7426 = vst [vmem:[#allocation114_spill] sm:$0xff] %v6473_v34  ;;  %v2080_v14 = vpop.f32.mrf.mxu2  ;;  %v2169_v44 = vpop.f32.mrf.mxu3 }
 0x415   : > { %v1904_v59 = vpop.f32.mrf.mxu0  ;;  %v1993_v17 = vpop.f32.mrf.mxu1  ;;  %v2081_v27 = vadd.f32 %v2080_v14, %v6457_v47  ;;  %v2170_v30 = vadd.f32 %v2169_v44, %v6459_v36 }
 0x416   : > { %v1905_v56 = vadd.f32 %v1904_v59, %v6441_v46  ;;  %v1994_v7 = vadd.f32 %v1993_v17, %v6443_v13 }
 0x417   : > { %v2266_v14 = vmax.f32 %v2081_v27, 0.0  ;;  %v2267_v44 = vmax.f32 %v2170_v30, 0.0 }
 0x418   : > { %v2272_v60 = vmax.f32 %v1905_v56, 0.0  ;;  %v2273_v6 = vmax.f32 %v1994_v7, 0.0  ;;  %v4663_v7 = vld [vmem:[#allocation10 + $0x88] sm:$0xff] }
 0x419   : > { %3328 = vmatpush.bf16.msra.mxu2 %v4663_v7 }
 0x41a   : > { %v6485_v24 = vpack.c.bf16 %v2272_v60, %v2264_v38  ;;  %v6487_v20 = vpack.c.bf16 %v2273_v6, %v2265_v51 }
 0x41c   : > { %v2082_v22 = vpop.f32.mrf.mxu2  ;;  %v2171_v34 = vpop.f32.mrf.mxu3  ;;  %7427 = vst [vmem:[#allocation115_spill] sm:$0xff] %v6487_v20 }
 0x41d   : > { %v2083_v23 = vadd.f32 %v2082_v22, %v6457_v47  ;;  %v2172_v59 = vadd.f32 %v2171_v34, %v6459_v36  ;;  %v1907_v0 = vpop.f32.mrf.mxu0  ;;  %v1996_v17 = vpop.f32.mrf.mxu1  ;;  %v4647_v34 = vld [vmem:[#allocation10 + $0x8] sm:$0xff] }
 0x41e   : > { %3150 = vmatpush.bf16.msra.mxu0 %v4647_v34  ;;  %v1997_v22 = vadd.f32 %v1996_v17, %v6443_v13 }
 0x41f   : > { %v2274_v32 = vmax.f32 %v2083_v23, 0.0  ;;  %v2275_v56 = vmax.f32 %v2172_v59, 0.0  ;;  %v4655_v59 = vld [vmem:[#allocation10 + $0x48] sm:$0xff] }
 0x420   : > { %1946 = vmatmul.bf16.gmra.mxu0 %v5982_v9  ;;  %2035 = vmatmul.bf16.gmra.mxu1 %v5982_v9 }
 0x421   : > { %2124 = vmatmul.bf16.gmra.mxu2 %v5982_v9  ;;  %2213 = vmatmul.bf16.gmra.mxu3 %v5982_v9  ;;  %v6493_v39 = vpack.c.bf16 %v2274_v32, %v2266_v14  ;;  %v6495_v60 = vpack.c.bf16 %v2275_v56, %v2267_v44  ;;  %v1908_v9 = vadd.f32 %v1907_v0, %v6441_v46  ;;  %v2281_v56 = vmax.f32 %v1997_v22, 0.0 }
 0x422   : > { %3239 = vmatpush.bf16.msra.mxu1 %v4655_v59 }
 0x423   : > { %7428 = vst [vmem:[#allocation116_spill] sm:$0xff] %v6493_v39  ;;  %v2280_v32 = vmax.f32 %v1908_v9, 0.0 }
 0x424   : > { %7429 = vst [vmem:[#allocation117_spill] sm:$0xff] %v6495_v60  ;;  %v2085_v23 = vpop.f32.mrf.mxu2  ;;  %v2174_v6 = vpop.f32.mrf.mxu3 }
 0x425   : > { %v1909_v38 = vpop.f32.mrf.mxu0  ;;  %v1998_v51 = vpop.f32.mrf.mxu1  ;;  %v2086_v14 = vadd.f32 %v2085_v23, %v6457_v47  ;;  %v2175_v44 = vadd.f32 %v2174_v6, %v6459_v36 }
 0x426   : > { %v1910_v27 = vadd.f32 %v1909_v38, %v6441_v46  ;;  %v1999_v30 = vadd.f32 %v1998_v51, %v6443_v13 }
 0x427   : > { %v2282_v23 = vmax.f32 %v2086_v14, 0.0  ;;  %v2283_v6 = vmax.f32 %v2175_v44, 0.0 }
 0x428   : > { %v2288_v7 = vmax.f32 %v1910_v27, 0.0  ;;  %v2289_v34 = vmax.f32 %v1999_v30, 0.0 }
 0x42a   : > { %v6505_v20 = vpack.c.bf16 %v2288_v7, %v2280_v32  ;;  %v6507_v17 = vpack.c.bf16 %v2289_v34, %v2281_v56 }
 0x42c   : > { %v2087_v50 = vpop.f32.mrf.mxu2  ;;  %v2176_v60 = vpop.f32.mrf.mxu3  ;;  %7430 = vst [vmem:[#allocation118_spill] sm:$0xff] %v6507_v17 }
 0x42d   : > { %v2088_v38 = vadd.f32 %v2087_v50, %v6457_v47  ;;  %v2177_v51 = vadd.f32 %v2176_v60, %v6459_v36  ;;  %v1912_v39 = vpop.f32.mrf.mxu0  ;;  %v2001_v0 = vpop.f32.mrf.mxu1 }
 0x42e   : > { %v1913_v50 = vadd.f32 %v1912_v39, %v6441_v46  ;;  %v2002_v14 = vadd.f32 %v2001_v0, %v6443_v13 }
 0x42f   : > { %v2290_v27 = vmax.f32 %v2088_v38, 0.0  ;;  %v2291_v30 = vmax.f32 %v2177_v51, 0.0 }
 0x430   : > { %1951 = vmatmul.bf16.gmra.mxu0 %v6044_v58  ;;  %2040 = vmatmul.bf16.gmra.mxu1 %v6044_v58  ;;  %v2296_v51 = vmax.f32 %v1913_v50, 0.0  ;;  %v4646_v50 = vld [vmem:[#allocation10] sm:$0xff] }
 0x431   : > { %2129 = vmatmul.bf16.gmra.mxu2 %v6044_v58  ;;  %2218 = vmatmul.bf16.gmra.mxu3 %v6044_v58  ;;  %v6513_v9 = vpack.c.bf16 %v2290_v27, %v2282_v23  ;;  %v6515_v60 = vpack.c.bf16 %v2291_v30, %v2283_v6  ;;  %v2297_v58 = vmax.f32 %v2002_v14, 0.0  ;;  %v4670_v14 = vld [vmem:[#allocation10 + $0xc0] sm:$0xff] }
 0x432   : > { %3151 = vmatpush.bf16.msra.mxu0 %v4646_v50  ;;  %3418 = vmatpush.bf16.msra.mxu3 %v4670_v14 }
 0x433   : > { %7431 = vst [vmem:[#allocation119_spill] sm:$0xff] %v6513_v9 }
 0x434   : > { %7432 = vst [vmem:[#allocation120_spill] sm:$0xff] %v6515_v60  ;;  %v2090_v22 = vpop.f32.mrf.mxu2  ;;  %v2179_v59 = vpop.f32.mrf.mxu3 }
 0x435   : > { %v1914_v7 = vpop.f32.mrf.mxu0  ;;  %v2003_v34 = vpop.f32.mrf.mxu1  ;;  %v2091_v27 = vadd.f32 %v2090_v22, %v6457_v47  ;;  %v2180_v30 = vadd.f32 %v2179_v59, %v6459_v36 }
 0x436   : > { %v1915_v32 = vadd.f32 %v1914_v7, %v6441_v46  ;;  %v2004_v56 = vadd.f32 %v2003_v34, %v6443_v13 }
 0x437   : > { %v2298_v22 = vmax.f32 %v2091_v27, 0.0  ;;  %v2299_v59 = vmax.f32 %v2180_v30, 0.0 }
 0x438   : > { %v2304_v44 = vmax.f32 %v1915_v32, 0.0  ;;  %v2305_v38 = vmax.f32 %v2004_v56, 0.0  ;;  %v4662_v56 = vld [vmem:[#allocation10 + $0x80] sm:$0xff] }
 0x439   : > { %3329 = vmatpush.bf16.msra.mxu2 %v4662_v56 }
 0x43a   : > { %v6525_v17 = vpack.c.bf16 %v2304_v44, %v2296_v51  ;;  %v6527_v39 = vpack.c.bf16 %v2305_v38, %v2297_v58 }
 0x43c   : > { %v2092_v23 = vpop.f32.mrf.mxu2  ;;  %v2181_v6 = vpop.f32.mrf.mxu3  ;;  %7433 = vst [vmem:[#allocation121_spill] sm:$0xff] %v6527_v39 }
 0x43d   : > { %v2093_v60 = vadd.f32 %v2092_v23, %v6457_v47  ;;  %v2182_v7 = vadd.f32 %v2181_v6, %v6459_v36  ;;  %v1917_v9 = vpop.f32.mrf.mxu0  ;;  %v2006_v34 = vpop.f32.mrf.mxu1 }
 0x43e   : > { %v2007_v6 = vadd.f32 %v2006_v34, %v6443_v13 }
 0x43f   : > { %v2306_v0 = vmax.f32 %v2093_v60, 0.0  ;;  %v2307_v32 = vmax.f32 %v2182_v7, 0.0  ;;  %v4654_v7 = vld [vmem:[#allocation10 + $0x40] sm:$0xff] }
 0x440   : > { %1956 = vmatmul.bf16.gmra.mxu0 %v6122_v11  ;;  %2045 = vmatmul.bf16.gmra.mxu1 %v6122_v11 }
 0x441   : > { %2134 = vmatmul.bf16.gmra.mxu2 %v6122_v11  ;;  %2223 = vmatmul.bf16.gmra.mxu3 %v6122_v11  ;;  %v6533_v44 = vpack.c.bf16 %v2306_v0, %v2298_v22  ;;  %v6535_v38 = vpack.c.bf16 %v2307_v32, %v2299_v59  ;;  %v1918_v11 = vadd.f32 %v1917_v9, %v6441_v46  ;;  %v2313_v32 = vmax.f32 %v2007_v6, 0.0 }
 0x442   : > { %3240 = vmatpush.bf16.msra.mxu1 %v4654_v7 }
 0x443   : > { %7434 = vst [vmem:[#allocation122_spill] sm:$0xff] %v6533_v44  ;;  %v2312_v0 = vmax.f32 %v1918_v11, 0.0 }
 0x444   : > { %7435 = vst [vmem:[#allocation123_spill] sm:$0xff] %v6535_v38  ;;  %v2095_v60 = vpop.f32.mrf.mxu2  ;;  %v2184_v51 = vpop.f32.mrf.mxu3 }
 0x445   : > { %v1919_v58 = vpop.f32.mrf.mxu0  ;;  %v2008_v23 = vpop.f32.mrf.mxu1  ;;  %v2096_v22 = vadd.f32 %v2095_v60, %v6457_v47  ;;  %v2185_v59 = vadd.f32 %v2184_v51, %v6459_v36 }
 0x446   : > { %v1920_v27 = vadd.f32 %v1919_v58, %v6441_v46  ;;  %v2009_v30 = vadd.f32 %v2008_v23, %v6443_v13 }
 0x447   : > { %v2314_v60 = vmax.f32 %v2096_v22, 0.0  ;;  %v2315_v51 = vmax.f32 %v2185_v59, 0.0 }
 0x448   : > { %v2320_v56 = vmax.f32 %v1920_v27, 0.0  ;;  %v2321_v50 = vmax.f32 %v2009_v30, 0.0 }
 0x44a   : > { %v6545_v39 = vpack.c.bf16 %v2320_v56, %v2312_v0  ;;  %v6547_v34 = vpack.c.bf16 %v2321_v50, %v2313_v32 }
 0x44c   : > { %v2097_v14 = vpop.f32.mrf.mxu2  ;;  %v2186_v38 = vpop.f32.mrf.mxu3  ;;  %7436 = vst [vmem:[#allocation124_spill] sm:$0xff] %v6547_v34 }
 0x44d   : > { %v2098_v58 = vadd.f32 %v2097_v14, %v6457_v47  ;;  %v2187_v23 = vadd.f32 %v2186_v38, %v6459_v36  ;;  %v1922_v44 = vpop.f32.mrf.mxu0  ;;  %v2011_v9 = vpop.f32.mrf.mxu1 }
 0x44e   : > { %v1923_v14 = vadd.f32 %v1922_v44, %v6441_v46  ;;  %v2012_v22 = vadd.f32 %v2011_v9, %v6443_v13 }
 0x44f   : > { %v2322_v27 = vmax.f32 %v2098_v58, 0.0  ;;  %v2323_v30 = vmax.f32 %v2187_v23, 0.0 }
 0x450   : > { %1961 = vmatmul.bf16.gmra.mxu0 %v6165_v52  ;;  %2050 = vmatmul.bf16.gmra.mxu1 %v6165_v52  ;;  %v2328_v23 = vmax.f32 %v1923_v14, 0.0  ;;  %v4685_v14 = vld [vmem:[#allocation10 + $0x138] sm:$0xff] }
 0x451   : > { %2139 = vmatmul.bf16.gmra.mxu2 %v6165_v52  ;;  %2228 = vmatmul.bf16.gmra.mxu3 %v6165_v52  ;;  %v6553_v11 = vpack.c.bf16 %v2322_v27, %v2314_v60  ;;  %v6555_v38 = vpack.c.bf16 %v2323_v30, %v2315_v51  ;;  %v2329_v52 = vmax.f32 %v2012_v22, 0.0  ;;  %v4709_v22 = vld [vmem:[#allocation10 + $0x1f8] sm:$0xff] }
 0x452   : > { %3500 = vmatpush.bf16.msrb.mxu0 %v4685_v14  ;;  %3767 = vmatpush.bf16.msrb.mxu3 %v4709_v22 }
 0x453   : > { %7437 = vst [vmem:[#allocation125_spill] sm:$0xff] %v6553_v11 }
 0x454   : > { %7438 = vst [vmem:[#allocation126_spill] sm:$0xff] %v6555_v38  ;;  %v2100_v6 = vpop.f32.mrf.mxu2  ;;  %v2189_v7 = vpop.f32.mrf.mxu3 }
 0x455   : > { %v1924_v56 = vpop.f32.mrf.mxu0  ;;  %v2013_v50 = vpop.f32.mrf.mxu1  ;;  %v2101_v27 = vadd.f32 %v2100_v6, %v6457_v47  ;;  %v2190_v30 = vadd.f32 %v2189_v7, %v6459_v36 }
 0x456   : > { %v1925_v0 = vadd.f32 %v1924_v56, %v6441_v46  ;;  %v2014_v32 = vadd.f32 %v2013_v50, %v6443_v13 }
 0x457   : > { %v2330_v6 = vmax.f32 %v2101_v27, 0.0  ;;  %v2331_v7 = vmax.f32 %v2190_v30, 0.0 }
 0x458   : > { %v2336_v59 = vmax.f32 %v1925_v0, 0.0  ;;  %v2337_v58 = vmax.f32 %v2014_v32, 0.0  ;;  %v4701_v32 = vld [vmem:[#allocation10 + $0x1b8] sm:$0xff] }
 0x459   : > { %3678 = vmatpush.bf16.msrb.mxu2 %v4701_v32 }
 0x45a   : > { %v6565_v34 = vpack.c.bf16 %v2336_v59, %v2328_v23  ;;  %v6567_v44 = vpack.c.bf16 %v2337_v58, %v2329_v52 }
 0x45c   : > { %v2102_v60 = vpop.f32.mrf.mxu2  ;;  %v2191_v51 = vpop.f32.mrf.mxu3  ;;  %7439 = vst [vmem:[#allocation127_spill] sm:$0xff] %v6565_v34 }
 0x45d   : > { %v2103_v38 = vadd.f32 %v2102_v60, %v6457_v47  ;;  %v2192_v56 = vadd.f32 %v2191_v51, %v6459_v36  ;;  %v1927_v11 = vpop.f32.mrf.mxu0  ;;  %v2016_v50 = vpop.f32.mrf.mxu1  ;;  %7440 = vst [vmem:[#allocation128_spill] sm:$0xff] %v6567_v44 }
 0x45e   : > { %v2017_v51 = vadd.f32 %v2016_v50, %v6443_v13 }
 0x45f   : > { %v2338_v9 = vmax.f32 %v2103_v38, 0.0  ;;  %v2339_v0 = vmax.f32 %v2192_v56, 0.0  ;;  %v4693_v56 = vld [vmem:[#allocation10 + $0x178] sm:$0xff] }
 0x460   : > { %1966 = vmatmul.bf16.gmra.mxu0 %v6197_v26  ;;  %2055 = vmatmul.bf16.gmra.mxu1 %v6197_v26 }
 0x461   : > { %2144 = vmatmul.bf16.gmra.mxu2 %v6197_v26  ;;  %2233 = vmatmul.bf16.gmra.mxu3 %v6197_v26  ;;  %v6573_v59 = vpack.c.bf16 %v2338_v9, %v2330_v6  ;;  %v6575_v58 = vpack.c.bf16 %v2339_v0, %v2331_v7  ;;  %v1928_v26 = vadd.f32 %v1927_v11, %v6441_v46  ;;  %v2345_v0 = vmax.f32 %v2017_v51, 0.0 }
 0x462   : > { %3589 = vmatpush.bf16.msrb.mxu1 %v4693_v56 }
 0x463   : > { %7441 = vst [vmem:[#allocation129_spill] sm:$0xff] %v6573_v59  ;;  %v2344_v9 = vmax.f32 %v1928_v26, 0.0 }
 0x464   : > { %7442 = vst [vmem:[#allocation130_spill] sm:$0xff] %v6575_v58  ;;  %v2105_v38 = vpop.f32.mrf.mxu2  ;;  %v2194_v23 = vpop.f32.mrf.mxu3 }
 0x465   : > { %v1929_v52 = vpop.f32.mrf.mxu0  ;;  %v2018_v60 = vpop.f32.mrf.mxu1  ;;  %v2106_v6 = vadd.f32 %v2105_v38, %v6457_v47  ;;  %v2195_v7 = vadd.f32 %v2194_v23, %v6459_v36 }
 0x466   : > { %v1930_v27 = vadd.f32 %v1929_v52, %v6441_v46  ;;  %v2019_v30 = vadd.f32 %v2018_v60, %v6443_v13 }
 0x467   : > { %v2346_v38 = vmax.f32 %v2106_v6, 0.0  ;;  %v2347_v23 = vmax.f32 %v2195_v7, 0.0  ;;  %v1544_v6 = vadd.f32 %v6000_v18, %v6421_v16  ;;  %v1720_v18 = vadd.f32 %v5995_v53, %v6429_v55 }
 0x468   : > { %v2352_v32 = vmax.f32 %v1930_v27, 0.0  ;;  %v2353_v14 = vmax.f32 %v2019_v30, 0.0 }
 0x46a   : > { %v6585_v44 = vpack.c.bf16 %v2352_v32, %v2344_v9  ;;  %v6587_v50 = vpack.c.bf16 %v2353_v14, %v2345_v0  ;;  %v1542_v32 = vadd.f32 %v5990_v40, %v6421_v16  ;;  %v1631_v14 = vadd.f32 %v5993_v63, %v6423_v28 }
 0x46b   : > { %v1811_v40 = vadd.f32 %v6012_v2, %v6431_v48 }
 0x46c   : > { %v2107_v22 = vpop.f32.mrf.mxu2  ;;  %v2196_v58 = vpop.f32.mrf.mxu3  ;;  %7443 = vst [vmem:[#allocation131_spill] sm:$0xff] %v6585_v44 }
 0x46d   : > { %v2108_v52 = vadd.f32 %v2107_v22, %v6457_v47  ;;  %v2197_v60 = vadd.f32 %v2196_v58, %v6459_v36  ;;  %v1932_v59 = vpop.f32.mrf.mxu0  ;;  %v2021_v11 = vpop.f32.mrf.mxu1  ;;  %7444 = vst [vmem:[#allocation132_spill] sm:$0xff] %v6587_v50  ;;  %v2246_v50 = vmax.f32 %v1720_v18, 0.0 }
 0x46e   : > { %v1933_v63 = vadd.f32 %v1932_v59, %v6441_v46 }
 0x46f   : > { %v2354_v27 = vmax.f32 %v2108_v52, 0.0  ;;  %v2355_v30 = vmax.f32 %v2197_v60, 0.0  ;;  %v1722_v52 = vadd.f32 %v6008_v33, %v6429_v55  ;;  %v2022_v60 = vadd.f32 %v2021_v11, %v6443_v13 }
 0x470   : > { %1971 = vmatmul.bf16.gmra.mxu0 %v6279_v54  ;;  %2060 = vmatmul.bf16.gmra.mxu1 %v6279_v54 }
 0x471   : > { %2149 = vmatmul.bf16.gmra.mxu2 %v6279_v54  ;;  %2238 = vmatmul.bf16.gmra.mxu3 %v6279_v54  ;;  %v6593_v26 = vpack.c.bf16 %v2354_v27, %v2346_v38  ;;  %v6595_v58 = vpack.c.bf16 %v2355_v30, %v2347_v23  ;;  %v1633_v54 = vadd.f32 %v6004_v25, %v6423_v28  ;;  %v2244_v38 = vmax.f32 %v1542_v32, 0.0 }
 0x472   : > { %v1809_v25 = vadd.f32 %v5997_v57, %v6431_v48  ;;  %v2245_v23 = vmax.f32 %v1631_v14, 0.0  ;;  %v2254_v33 = vmax.f32 %v1722_v52, 0.0  ;;  %v2361_v2 = vmax.f32 %v2022_v60, 0.0 }
 0x473   : > { %7445 = vst [vmem:[#allocation133_spill] sm:$0xff] %v6593_v26  ;;  %v2360_v26 = vmax.f32 %v1933_v63, 0.0 }
 0x474   : > { %7446 = vst [vmem:[#allocation134_spill] sm:$0xff] %v6595_v58  ;;  %v2110_v51 = vpop.f32.mrf.mxu2  ;;  %v2199_v56 = vpop.f32.mrf.mxu3  ;;  %v2255_v58 = vmax.f32 %v1811_v40, 0.0  ;;  %v2247_v59 = vmax.f32 %v1809_v25, 0.0  ;;  %v2502_v40 = vpack.c.bf16 %v2254_v33, %v2246_v50  ;;  %v4700_v25 = vld [vmem:[#allocation10 + $0x1b0] sm:$0xff] }
 0x475   : > { %v1934_v9 = vpop.f32.mrf.mxu0  ;;  %v2023_v0 = vpop.f32.mrf.mxu1  ;;  %v2111_v11 = vadd.f32 %v2110_v51, %v6457_v47  ;;  %v2200_v44 = vadd.f32 %v2199_v56, %v6459_v36  ;;  %3679 = vmatpush.bf16.msrb.mxu2 %v4700_v25 }
 0x476   : > { %v1935_v7 = vadd.f32 %v1934_v9, %v6441_v46  ;;  %v2024_v22 = vadd.f32 %v2023_v0, %v6443_v13  ;;  %v2252_v9 = vmax.f32 %v1544_v6, 0.0  ;;  %v2253_v0 = vmax.f32 %v1633_v54, 0.0 }
 0x477   : > { %v2503_v63 = vpack.c.bf16 %v2255_v58, %v2247_v59  ;;  %v2362_v56 = vmax.f32 %v2111_v11, 0.0  ;;  %v2363_v18 = vmax.f32 %v2200_v44, 0.0  ;;  %v1547_v58 = vadd.f32 %v6021_v41, %v6421_v16 }
 0x478   : > { %v2368_v27 = vmax.f32 %v1935_v7, 0.0  ;;  %v2369_v30 = vmax.f32 %v2024_v22, 0.0  ;;  %v2500_v22 = vpack.c.bf16 %v2252_v9, %v2244_v38  ;;  %v2501_v52 = vpack.c.bf16 %v2253_v0, %v2245_v23 }
 0x479   : > { %v1636_v44 = vadd.f32 %v6026_v45, %v6423_v28  ;;  %v1549_v9 = vadd.f32 %v6049_v37, %v6421_v16  ;;  %v1638_v0 = vadd.f32 %v6055_v29, %v6423_v28  ;;  %v1727_v59 = vadd.f32 %v6078_v12, %v6429_v55  ;;  %v7447_v29 = vld [vmem:[#allocation16_spill] sm:$0xff] }
 0x47a   : > { %v6621_v6 = vpack.c.bf16 %v2368_v27, %v2360_v26  ;;  %v6623_v54 = vpack.c.bf16 %v2369_v30, %v2361_v2  ;;  %v1816_v41 = vadd.f32 %v6081_v5, %v6431_v48  ;;  %v1725_v37 = vadd.f32 %v6040_v15, %v6429_v55 }
 0x47b   : > { %v2268_v12 = vmax.f32 %v1549_v9, 0.0 }
 0x47c   : > { %v2112_v53 = vpop.f32.mrf.mxu2  ;;  %v2201_v34 = vpop.f32.mrf.mxu3  ;;  %v2271_v5 = vmax.f32 %v1816_v41, 0.0 }
 0x47d   : > { %v2113_v57 = vadd.f32 %v2112_v53, %v6457_v47  ;;  %v2202_v7 = vadd.f32 %v2201_v34, %v6459_v36  ;;  %v1937_v32 = vpop.f32.mrf.mxu0  ;;  %v2026_v14 = vpop.f32.mrf.mxu1  ;;  %v4684_v34 = vld [vmem:[#allocation10 + $0x130] sm:$0xff] }
 0x47e   : > { %v4708_v53 = vld [vmem:[#allocation10 + $0x1f0] sm:$0xff]  ;;  %3501 = vmatpush.bf16.msrb.mxu0 %v4684_v34  ;;  %v1938_v45 = vadd.f32 %v1937_v32, %v6441_v46  ;;  %v2027_v11 = vadd.f32 %v2026_v14, %v6443_v13 }
 0x47f   : > { %v2370_v60 = vmax.f32 %v2113_v57, 0.0  ;;  %v2371_v51 = vmax.f32 %v2202_v7, 0.0  ;;  %3768 = vmatpush.bf16.msrb.mxu3 %v4708_v53  ;;  %v4692_v57 = vld [vmem:[#allocation10 + $0x170] sm:$0xff]  ;;  %v1814_v7 = vadd.f32 %v7447_v29, %v6431_v48 }
 0x480   : > { %3152 = vmatmul.bf16.vlgmr.msra.gmra.mxu0 %v2500_v22  ;;  %3241 = vmatmul.bf16.vlgmr.msra.gmra.mxu1 %v2501_v52  ;;  %v2377_v32 = vmax.f32 %v2027_v11, 0.0 }
 0x481   : > { %3330 = vmatmul.bf16.vlgmr.msra.gmra.mxu2 %v2502_v40  ;;  %3419 = vmatmul.bf16.vlgmr.msra.gmra.mxu3 %v2503_v63  ;;  %v6625_v26 = vpack.c.bf16 %v2370_v60, %v2362_v56  ;;  %v6627_v27 = vpack.c.bf16 %v2371_v51, %v2363_v18  ;;  %v2260_v40 = vmax.f32 %v1547_v58, 0.0  ;;  %v2261_v63 = vmax.f32 %v1636_v44, 0.0 }
 0x482   : > { %3590 = vmatpush.bf16.msrb.mxu1 %v4692_v57  ;;  %v2269_v60 = vmax.f32 %v1638_v0, 0.0  ;;  %v2270_v51 = vmax.f32 %v1727_v59, 0.0  ;;  %v2376_v56 = vmax.f32 %v1938_v45, 0.0  ;;  %v2262_v18 = vmax.f32 %v1725_v37, 0.0 }
 0x483   : > { %v2263_v14 = vmax.f32 %v1814_v7, 0.0 }
 0x484   : > { %v2115_v30 = vpop.f32.mrf.mxu2  ;;  %v2204_v50 = vpop.f32.mrf.mxu3  ;;  %v2510_v45 = vpack.c.bf16 %v2270_v51, %v2262_v18  ;;  %v7450_v51 = vld [vmem:[#allocation21_spill] sm:$0xff] }
 0x485   : > { %v1939_v38 = vpop.f32.mrf.mxu0  ;;  %v2028_v23 = vpop.f32.mrf.mxu1  ;;  %v2116_v25 = vadd.f32 %v2115_v30, %v6457_v47  ;;  %v2205_v15 = vadd.f32 %v2204_v50, %v6459_v36  ;;  %v2511_v30 = vpack.c.bf16 %v2271_v5, %v2263_v14  ;;  %v1554_v5 = vadd.f32 %v7450_v51, %v6421_v16 }
 0x486   : > { %v1940_v33 = vadd.f32 %v1939_v38, %v6441_v46  ;;  %v2029_v2 = vadd.f32 %v2028_v23, %v6443_v13 }
 0x487   : > { %v2378_v50 = vmax.f32 %v2116_v25, 0.0  ;;  %v2379_v11 = vmax.f32 %v2205_v15, 0.0  ;;  %v1732_v25 = vadd.f32 %v6144_v31, %v6429_v55  ;;  %v1821_v15 = vadd.f32 %v6146_v4, %v6431_v48 }
 0x488   : > { %v2384_v22 = vmax.f32 %v1940_v33, 0.0  ;;  %v2385_v52 = vmax.f32 %v2029_v2, 0.0  ;;  %v2508_v33 = vpack.c.bf16 %v2268_v12, %v2260_v40  ;;  %v2509_v2 = vpack.c.bf16 %v2269_v60, %v2261_v63  ;;  %v7449_v40 = vld [vmem:[#allocation18_spill] sm:$0xff] }
 0x489   : > { %v1641_v63 = vadd.f32 %v7449_v40, %v6423_v28  ;;  %v2286_v31 = vmax.f32 %v1732_v25, 0.0 }
 0x48a   : > { %v6653_v9 = vpack.c.bf16 %v2384_v22, %v2376_v56  ;;  %v6655_v0 = vpack.c.bf16 %v2385_v52, %v2377_v32  ;;  %v7448_v22 = vld [vmem:[#allocation17_spill] sm:$0xff]  ;;  %v7451_v56 = vld [vmem:[#allocation22_spill] sm:$0xff] }
 0x48b   : > { %v1552_v52 = vadd.f32 %v7448_v22, %v6421_v16  ;;  %v1643_v32 = vadd.f32 %v7451_v56, %v6423_v28  ;;  %v2287_v22 = vmax.f32 %v1821_v15, 0.0 }
 0x48c   : > { %v2117_v34 = vpop.f32.mrf.mxu2  ;;  %v2206_v53 = vpop.f32.mrf.mxu3 }
 0x48d   : > { %v2118_v38 = vadd.f32 %v2117_v34, %v6457_v47  ;;  %v2207_v23 = vadd.f32 %v2206_v53, %v6459_v36  ;;  %v1942_v58 = vpop.f32.mrf.mxu0  ;;  %v2031_v44 = vpop.f32.mrf.mxu1 }
 0x48e   : > { %v1943_v34 = vadd.f32 %v1942_v58, %v6441_v46  ;;  %v2032_v53 = vadd.f32 %v2031_v44, %v6443_v13 }
 0x48f   : > { %v2386_v59 = vmax.f32 %v2118_v38, 0.0  ;;  %v2387_v41 = vmax.f32 %v2207_v23, 0.0  ;;  %v7452_v38 = vld [vmem:[#allocation19_spill] sm:$0xff] }
 0x490   : > { %3157 = vmatmul.bf16.gmra.mxu0 %v2508_v33  ;;  %3246 = vmatmul.bf16.gmra.mxu1 %v2509_v2  ;;  %v1730_v23 = vadd.f32 %v7452_v38, %v6429_v55  ;;  %v7453_v33 = vld [vmem:[#allocation20_spill] sm:$0xff]  ;;  %v2392_v40 = vmax.f32 %v1943_v34, 0.0  ;;  %v2393_v4 = vmax.f32 %v2032_v53, 0.0 }
 0x491   : > { %3335 = vmatmul.bf16.gmra.mxu2 %v2510_v45  ;;  %3424 = vmatmul.bf16.gmra.mxu3 %v2511_v30  ;;  %v6657_v57 = vpack.c.bf16 %v2386_v59, %v2378_v50  ;;  %v6659_v37 = vpack.c.bf16 %v2387_v41, %v2379_v11  ;;  %v1819_v2 = vadd.f32 %v7453_v33, %v6431_v48  ;;  %v2276_v45 = vmax.f32 %v1552_v52, 0.0  ;;  %v4699_v33 = vld [vmem:[#allocation10 + $0x1a8] sm:$0xff] }
 0x492   : > { %v2277_v30 = vmax.f32 %v1641_v63, 0.0  ;;  %v2284_v50 = vmax.f32 %v1554_v5, 0.0  ;;  %v2285_v11 = vmax.f32 %v1643_v32, 0.0  ;;  %3680 = vmatpush.bf16.msrb.mxu2 %v4699_v33 }
 0x493   : > { %v2279_v58 = vmax.f32 %v1819_v2, 0.0  ;;  %v4683_v2 = vld [vmem:[#allocation10 + $0x128] sm:$0xff] }
 0x494   : > { %v2120_v29 = vpop.f32.mrf.mxu2  ;;  %v2209_v7 = vpop.f32.mrf.mxu3  ;;  %v2517_v25 = vpack.c.bf16 %v2285_v11, %v2277_v30  ;;  %3502 = vmatpush.bf16.msrb.mxu0 %v4683_v2  ;;  %v1646_v11 = vadd.f32 %v6151_v43, %v6423_v28 }
 0x495   : > { %v1944_v12 = vpop.f32.mrf.mxu0  ;;  %v2033_v60 = vpop.f32.mrf.mxu1  ;;  %v2121_v44 = vadd.f32 %v2120_v29, %v6457_v47  ;;  %v2519_v29 = vpack.c.bf16 %v2287_v22, %v2279_v58 }
 0x496   : > { %v1945_v18 = vadd.f32 %v1944_v12, %v6441_v46  ;;  %v2034_v14 = vadd.f32 %v2033_v60, %v6443_v13  ;;  %v2278_v12 = vmax.f32 %v1730_v23, 0.0  ;;  %v2210_v60 = vadd.f32 %v2209_v7, %v6459_v36 }
 0x497   : > { %v2394_v7 = vmax.f32 %v2121_v44, 0.0  ;;  %v1737_v44 = vadd.f32 %v6187_v10, %v6429_v55 }
 0x498   : > { %v2400_v59 = vmax.f32 %v1945_v18, 0.0  ;;  %v2401_v41 = vmax.f32 %v2034_v14, 0.0  ;;  %v2516_v14 = vpack.c.bf16 %v2284_v50, %v2276_v45  ;;  %v2518_v53 = vpack.c.bf16 %v2286_v31, %v2278_v12 }
 0x499   : > { %v2395_v23 = vmax.f32 %v2210_v60, 0.0  ;;  %v1557_v50 = vadd.f32 %v6148_v35, %v6421_v16  ;;  %v1826_v35 = vadd.f32 %v6189_v19, %v6431_v48 }
 0x49a   : > { %v6685_v5 = vpack.c.bf16 %v2400_v59, %v2392_v40  ;;  %v6687_v32 = vpack.c.bf16 %v2401_v41, %v2393_v4  ;;  %v1559_v40 = vadd.f32 %v6179_v21, %v6421_v16  ;;  %v1648_v4 = vadd.f32 %v6182_v8, %v6423_v28  ;;  %v7454_v21 = vld [vmem:[#allocation23_spill] sm:$0xff]  ;;  %v7455_v8 = vld [vmem:[#allocation24_spill] sm:$0xff] }
 0x49b   : > { %v2303_v19 = vmax.f32 %v1826_v35, 0.0 }
 0x49c   : > { %v2122_v51 = vpop.f32.mrf.mxu2  ;;  %v2211_v56 = vpop.f32.mrf.mxu3  ;;  %v2300_v10 = vmax.f32 %v1559_v40, 0.0 }
 0x49d   : > { %v2123_v38 = vadd.f32 %v2122_v51, %v6457_v47  ;;  %v2212_v18 = vadd.f32 %v2211_v56, %v6459_v36  ;;  %v1947_v52 = vpop.f32.mrf.mxu0  ;;  %v2036_v63 = vpop.f32.mrf.mxu1  ;;  %v4707_v51 = vld [vmem:[#allocation10 + $0x1e8] sm:$0xff] }
 0x49e   : > { %3769 = vmatpush.bf16.msrb.mxu3 %v4707_v51  ;;  %v1948_v43 = vadd.f32 %v1947_v52, %v6441_v46  ;;  %v2037_v60 = vadd.f32 %v2036_v63, %v6443_v13  ;;  %v4691_v56 = vld [vmem:[#allocation10 + $0x168] sm:$0xff] }
 0x49f   : > { %v2402_v15 = vmax.f32 %v2123_v38, 0.0  ;;  %v2403_v34 = vmax.f32 %v2212_v18, 0.0  ;;  %v1735_v38 = vadd.f32 %v7454_v21, %v6429_v55  ;;  %v1824_v18 = vadd.f32 %v7455_v8, %v6431_v48  ;;  %3591 = vmatpush.bf16.msrb.mxu1 %v4691_v56 }
 0x4a0   : > { %3162 = vmatmul.bf16.gmra.mxu0 %v2516_v14  ;;  %3251 = vmatmul.bf16.gmra.mxu1 %v2517_v25  ;;  %v2409_v52 = vmax.f32 %v2037_v60, 0.0 }
 0x4a1   : > { %3340 = vmatmul.bf16.gmra.mxu2 %v2518_v53  ;;  %3429 = vmatmul.bf16.gmra.mxu3 %v2519_v29  ;;  %v6689_v59 = vpack.c.bf16 %v2402_v15, %v2394_v7  ;;  %v6691_v41 = vpack.c.bf16 %v2403_v34, %v2395_v23  ;;  %v2292_v15 = vmax.f32 %v1557_v50, 0.0  ;;  %v2293_v34 = vmax.f32 %v1646_v11, 0.0 }
 0x4a2   : > { %v2301_v53 = vmax.f32 %v1648_v4, 0.0  ;;  %v2302_v29 = vmax.f32 %v1737_v44, 0.0  ;;  %v2408_v7 = vmax.f32 %v1948_v43, 0.0  ;;  %v2294_v23 = vmax.f32 %v1735_v38, 0.0 }
 0x4a3   : > { %v2295_v63 = vmax.f32 %v1824_v18, 0.0 }
 0x4a4   : > { %v2125_v45 = vpop.f32.mrf.mxu2  ;;  %v2214_v30 = vpop.f32.mrf.mxu3  ;;  %v2525_v44 = vpack.c.bf16 %v2301_v53, %v2293_v34  ;;  %v2526_v60 = vpack.c.bf16 %v2302_v29, %v2294_v23  ;;  %v7460_v29 = vld [vmem:[#allocation29_spill] sm:$0xff] }
 0x4a5   : > { %v1949_v31 = vpop.f32.mrf.mxu0  ;;  %v2038_v22 = vpop.f32.mrf.mxu1  ;;  %v2126_v33 = vadd.f32 %v2125_v45, %v6457_v47  ;;  %v2215_v2 = vadd.f32 %v2214_v30, %v6459_v36  ;;  %v2527_v45 = vpack.c.bf16 %v2303_v19, %v2295_v63  ;;  %v1564_v19 = vadd.f32 %v7460_v29, %v6421_v16 }
 0x4a6   : > { %v1950_v12 = vadd.f32 %v1949_v31, %v6441_v46  ;;  %v2039_v58 = vadd.f32 %v2038_v22, %v6443_v13 }
 0x4a7   : > { %v2410_v30 = vmax.f32 %v2126_v33, 0.0  ;;  %v2411_v56 = vmax.f32 %v2215_v2, 0.0  ;;  %v7462_v33 = vld [vmem:[#allocation31_spill] sm:$0xff] }
 0x4a8   : > { %v2416_v14 = vmax.f32 %v1950_v12, 0.0  ;;  %v2417_v25 = vmax.f32 %v2039_v58, 0.0  ;;  %v2524_v58 = vpack.c.bf16 %v2300_v10, %v2292_v15  ;;  %v7459_v15 = vld [vmem:[#allocation26_spill] sm:$0xff]  ;;  %v1742_v2 = vadd.f32 %v7462_v33, %v6429_v55 }
 0x4a9   : > { %v1651_v34 = vadd.f32 %v7459_v15, %v6423_v28 }
 0x4aa   : > { %v6717_v40 = vpack.c.bf16 %v2416_v14, %v2408_v7  ;;  %v6719_v4 = vpack.c.bf16 %v2417_v25, %v2409_v52  ;;  %v7458_v14 = vld [vmem:[#allocation25_spill] sm:$0xff]  ;;  %v7461_v7 = vld [vmem:[#allocation30_spill] sm:$0xff] }
 0x4ab   : > { %v1562_v25 = vadd.f32 %v7458_v14, %v6421_v16  ;;  %v1653_v52 = vadd.f32 %v7461_v7, %v6423_v28  ;;  %v2316_v14 = vmax.f32 %v1564_v19, 0.0 }
 0x4ac   : > { %v2127_v51 = vpop.f32.mrf.mxu2  ;;  %v2216_v31 = vpop.f32.mrf.mxu3 }
 0x4ad   : > { %v2128_v22 = vadd.f32 %v2127_v51, %v6457_v47  ;;  %v2217_v12 = vadd.f32 %v2216_v31, %v6459_v36  ;;  %v1952_v50 = vpop.f32.mrf.mxu0  ;;  %v2041_v11 = vpop.f32.mrf.mxu1  ;;  %v7463_v51 = vld [vmem:[#allocation32_spill] sm:$0xff]  ;;  %v2317_v15 = vmax.f32 %v1653_v52, 0.0 }
 0x4ae   : > { %v1831_v31 = vadd.f32 %v7463_v51, %v6431_v48 }
 0x4af   : > { %v2418_v35 = vmax.f32 %v2128_v22, 0.0  ;;  %v2419_v43 = vmax.f32 %v2217_v12, 0.0  ;;  %v1953_v22 = vadd.f32 %v1952_v50, %v6441_v46  ;;  %v2042_v12 = vadd.f32 %v2041_v11, %v6443_v13 }
 0x4b0   : > { %3167 = vmatmul.bf16.gmra.mxu0 %v2524_v58  ;;  %3256 = vmatmul.bf16.gmra.mxu1 %v2525_v44  ;;  %v7464_v58 = vld [vmem:[#allocation27_spill] sm:$0xff] }
 0x4b1   : > { %3345 = vmatmul.bf16.gmra.mxu2 %v2526_v60  ;;  %3434 = vmatmul.bf16.gmra.mxu3 %v2527_v45  ;;  %v6721_v21 = vpack.c.bf16 %v2418_v35, %v2410_v30  ;;  %v6723_v38 = vpack.c.bf16 %v2419_v43, %v2411_v56  ;;  %v1740_v44 = vadd.f32 %v7464_v58, %v6429_v55  ;;  %v7465_v35 = vld [vmem:[#allocation28_spill] sm:$0xff]  ;;  %v2308_v30 = vmax.f32 %v1562_v25, 0.0 }
 0x4b2   : > { %v1829_v43 = vadd.f32 %v7465_v35, %v6431_v48  ;;  %v2309_v56 = vmax.f32 %v1651_v34, 0.0  ;;  %v2424_v29 = vmax.f32 %v1953_v22, 0.0  ;;  %v2425_v7 = vmax.f32 %v2042_v12, 0.0 }
 0x4b3   : > { %7456 = vst [vmem:[#allocation16_spill] sm:$0xff] %v6721_v21  ;;  %v2310_v33 = vmax.f32 %v1740_v44, 0.0 }
 0x4b4   : > { %7457 = vst [vmem:[#allocation17_spill] sm:$0xff] %v6723_v38  ;;  %v2130_v8 = vpop.f32.mrf.mxu2  ;;  %v2219_v18 = vpop.f32.mrf.mxu3  ;;  %v2311_v50 = vmax.f32 %v1829_v43, 0.0  ;;  %v4698_v43 = vld [vmem:[#allocation10 + $0x1a0] sm:$0xff] }
 0x4b5   : > { %v1954_v10 = vpop.f32.mrf.mxu0  ;;  %v2043_v53 = vpop.f32.mrf.mxu1  ;;  %v2131_v11 = vadd.f32 %v2130_v8, %v6457_v47  ;;  %v2220_v51 = vadd.f32 %v2219_v18, %v6459_v36  ;;  %3681 = vmatpush.bf16.msrb.mxu2 %v4698_v43 }
 0x4b6   : > { %v1955_v23 = vadd.f32 %v1954_v10, %v6441_v46  ;;  %v2044_v63 = vadd.f32 %v2043_v53, %v6443_v13  ;;  %v2318_v10 = vmax.f32 %v1742_v2, 0.0  ;;  %v2319_v53 = vmax.f32 %v1831_v31, 0.0 }
 0x4b7   : > { %v2533_v2 = vpack.c.bf16 %v2317_v15, %v2309_v56  ;;  %v2426_v18 = vmax.f32 %v2131_v11, 0.0  ;;  %v2427_v44 = vmax.f32 %v2220_v51, 0.0  ;;  %v7473_v11 = vld [vmem:[#allocation38_spill] sm:$0xff] }
 0x4b8   : > { %v2432_v60 = vmax.f32 %v1955_v23, 0.0  ;;  %v2433_v45 = vmax.f32 %v2044_v63, 0.0  ;;  %v2532_v63 = vpack.c.bf16 %v2316_v14, %v2308_v30  ;;  %v2534_v12 = vpack.c.bf16 %v2318_v10, %v2310_v33  ;;  %v7470_v14 = vld [vmem:[#allocation33_spill] sm:$0xff]  ;;  %v7471_v10 = vld [vmem:[#allocation34_spill] sm:$0xff] }
 0x4b9   : > { %v2535_v8 = vpack.c.bf16 %v2319_v53, %v2311_v50  ;;  %v1567_v15 = vadd.f32 %v7470_v14, %v6421_v16  ;;  %v1656_v53 = vadd.f32 %v7471_v10, %v6423_v28  ;;  %v7472_v33 = vld [vmem:[#allocation37_spill] sm:$0xff]  ;;  %v1658_v51 = vadd.f32 %v7473_v11, %v6423_v28 }
 0x4ba   : > { %v6749_v19 = vpack.c.bf16 %v2432_v60, %v2424_v29  ;;  %v6751_v52 = vpack.c.bf16 %v2433_v45, %v2425_v7  ;;  %v1569_v50 = vadd.f32 %v7472_v33, %v6421_v16 }
 0x4bb   : > { %v2333_v11 = vmax.f32 %v1658_v51, 0.0 }
 0x4bc   : > { %v2132_v58 = vpop.f32.mrf.mxu2  ;;  %v2221_v38 = vpop.f32.mrf.mxu3  ;;  %7466 = vst [vmem:[#allocation18_spill] sm:$0xff] %v6749_v19  ;;  %v2332_v33 = vmax.f32 %v1569_v50, 0.0 }
 0x4bd   : > { %v2133_v35 = vadd.f32 %v2132_v58, %v6457_v47  ;;  %v2222_v23 = vadd.f32 %v2221_v38, %v6459_v36  ;;  %v1957_v25 = vpop.f32.mrf.mxu0  ;;  %v2046_v34 = vpop.f32.mrf.mxu1  ;;  %7467 = vst [vmem:[#allocation21_spill] sm:$0xff] %v6751_v52  ;;  %v4682_v38 = vld [vmem:[#allocation10 + $0x120] sm:$0xff] }
 0x4be   : > { %v4706_v58 = vld [vmem:[#allocation10 + $0x1e0] sm:$0xff]  ;;  %3503 = vmatpush.bf16.msrb.mxu0 %v4682_v38 }
 0x4bf   : > { %v2434_v31 = vmax.f32 %v2133_v35, 0.0  ;;  %v2435_v22 = vmax.f32 %v2222_v23, 0.0  ;;  %3770 = vmatpush.bf16.msrb.mxu3 %v4706_v58  ;;  %v7477_v38 = vld [vmem:[#allocation36_spill] sm:$0xff] }
 0x4c0   : > { %3172 = vmatmul.bf16.gmra.mxu0 %v2532_v63  ;;  %3261 = vmatmul.bf16.gmra.mxu1 %v2533_v2  ;;  %v7474_v63 = vld [vmem:[#allocation39_spill] sm:$0xff]  ;;  %v1834_v58 = vadd.f32 %v7477_v38, %v6431_v48 }
 0x4c1   : > { %3350 = vmatmul.bf16.gmra.mxu2 %v2534_v12  ;;  %3439 = vmatmul.bf16.gmra.mxu3 %v2535_v8  ;;  %v6753_v60 = vpack.c.bf16 %v2434_v31, %v2426_v18  ;;  %v6755_v45 = vpack.c.bf16 %v2435_v22, %v2427_v44  ;;  %v1747_v2 = vadd.f32 %v7474_v63, %v6429_v55  ;;  %v7475_v31 = vld [vmem:[#allocation40_spill] sm:$0xff]  ;;  %v7476_v44 = vld [vmem:[#allocation35_spill] sm:$0xff] }
 0x4c2   : > { %v1836_v22 = vadd.f32 %v7475_v31, %v6431_v48  ;;  %v1958_v12 = vadd.f32 %v1957_v25, %v6441_v46  ;;  %v2047_v8 = vadd.f32 %v2046_v34, %v6443_v13  ;;  %v4690_v18 = vld [vmem:[#allocation10 + $0x160] sm:$0xff]  ;;  %v1745_v43 = vadd.f32 %v7476_v44, %v6429_v55 }
 0x4c3   : > { %7468 = vst [vmem:[#allocation22_spill] sm:$0xff] %v6753_v60  ;;  %3592 = vmatpush.bf16.msrb.mxu1 %v4690_v18  ;;  %v2334_v63 = vmax.f32 %v1747_v2, 0.0  ;;  %v2327_v34 = vmax.f32 %v1834_v58, 0.0  ;;  %v7481_v58 = vld [vmem:[#allocation41_spill] sm:$0xff] }
 0x4c4   : > { %7469 = vst [vmem:[#allocation19_spill] sm:$0xff] %v6755_v45  ;;  %v2135_v30 = vpop.f32.mrf.mxu2  ;;  %v2224_v56 = vpop.f32.mrf.mxu3  ;;  %v2335_v31 = vmax.f32 %v1836_v22, 0.0  ;;  %v2440_v45 = vmax.f32 %v1958_v12, 0.0  ;;  %v2441_v25 = vmax.f32 %v2047_v8, 0.0  ;;  %v2326_v60 = vmax.f32 %v1745_v43, 0.0 }
 0x4c5   : > { %v1959_v29 = vpop.f32.mrf.mxu0  ;;  %v2048_v7 = vpop.f32.mrf.mxu1  ;;  %v2136_v52 = vadd.f32 %v2135_v30, %v6457_v47  ;;  %v2225_v44 = vadd.f32 %v2224_v56, %v6459_v36 }
 0x4c6   : > { %v1960_v35 = vadd.f32 %v1959_v29, %v6441_v46  ;;  %v2049_v23 = vadd.f32 %v2048_v7, %v6443_v13  ;;  %v2324_v29 = vmax.f32 %v1567_v15, 0.0  ;;  %v2325_v7 = vmax.f32 %v1656_v53, 0.0 }
 0x4c7   : > { %v2542_v18 = vpack.c.bf16 %v2334_v63, %v2326_v60  ;;  %v2543_v30 = vpack.c.bf16 %v2335_v31, %v2327_v34  ;;  %v2442_v56 = vmax.f32 %v2136_v52, 0.0  ;;  %v2443_v43 = vmax.f32 %v2225_v44, 0.0  ;;  %v7485_v34 = vld [vmem:[#allocation47_spill] sm:$0xff] }
 0x4c8   : > { %v2448_v14 = vmax.f32 %v1960_v35, 0.0  ;;  %v2449_v10 = vmax.f32 %v2049_v23, 0.0  ;;  %v2540_v2 = vpack.c.bf16 %v2332_v33, %v2324_v29  ;;  %v2541_v22 = vpack.c.bf16 %v2333_v11, %v2325_v7  ;;  %v7483_v33 = vld [vmem:[#allocation45_spill] sm:$0xff]  ;;  %v7484_v11 = vld [vmem:[#allocation46_spill] sm:$0xff] }
 0x4c9   : > { %v1574_v52 = vadd.f32 %v7483_v33, %v6421_v16  ;;  %v1663_v63 = vadd.f32 %v7484_v11, %v6423_v28  ;;  %v1752_v44 = vadd.f32 %v7485_v34, %v6429_v55 }
 0x4ca   : > { %v6781_v50 = vpack.c.bf16 %v2448_v14, %v2440_v45  ;;  %v6783_v51 = vpack.c.bf16 %v2449_v10, %v2441_v25  ;;  %v1572_v14 = vadd.f32 %v7481_v58, %v6421_v16  ;;  %v7482_v10 = vld [vmem:[#allocation42_spill] sm:$0xff] }
 0x4cb   : > { %v1661_v29 = vadd.f32 %v7482_v10, %v6423_v28  ;;  %v2350_v33 = vmax.f32 %v1752_v44, 0.0 }
 0x4cc   : > { %v2137_v19 = vpop.f32.mrf.mxu2  ;;  %v2226_v21 = vpop.f32.mrf.mxu3  ;;  %7478 = vst [vmem:[#allocation20_spill] sm:$0xff] %v6783_v51  ;;  %v2340_v58 = vmax.f32 %v1572_v14, 0.0 }
 0x4cd   : > { %v2138_v35 = vadd.f32 %v2137_v19, %v6457_v47  ;;  %v2227_v23 = vadd.f32 %v2226_v21, %v6459_v36  ;;  %v1962_v15 = vpop.f32.mrf.mxu0  ;;  %v2051_v53 = vpop.f32.mrf.mxu1  ;;  %v2341_v10 = vmax.f32 %v1661_v29, 0.0 }
 0x4cf   : > { %v2450_v12 = vmax.f32 %v2138_v35, 0.0  ;;  %v2451_v8 = vmax.f32 %v2227_v23, 0.0  ;;  %v7486_v35 = vld [vmem:[#allocation48_spill] sm:$0xff] }
 0x4d0   : > { %3177 = vmatmul.bf16.gmra.mxu0 %v2540_v2  ;;  %3266 = vmatmul.bf16.gmra.mxu1 %v2541_v22  ;;  %v1841_v23 = vadd.f32 %v7486_v35, %v6431_v48  ;;  %v1963_v2 = vadd.f32 %v1962_v15, %v6441_v46  ;;  %v2052_v22 = vadd.f32 %v2051_v53, %v6443_v13 }
 0x4d1   : > { %3355 = vmatmul.bf16.gmra.mxu2 %v2542_v18  ;;  %3444 = vmatmul.bf16.gmra.mxu3 %v2543_v30  ;;  %v6785_v19 = vpack.c.bf16 %v2450_v12, %v2442_v56  ;;  %v6787_v21 = vpack.c.bf16 %v2451_v8, %v2443_v43  ;;  %v7487_v12 = vld [vmem:[#allocation43_spill] sm:$0xff]  ;;  %v7488_v18 = vld [vmem:[#allocation44_spill] sm:$0xff] }
 0x4d2   : > { %v1750_v8 = vadd.f32 %v7487_v12, %v6429_v55  ;;  %v1839_v30 = vadd.f32 %v7488_v18, %v6431_v48  ;;  %v2351_v11 = vmax.f32 %v1841_v23, 0.0  ;;  %v2456_v34 = vmax.f32 %v1963_v2, 0.0 }
 0x4d3   : > { %7479 = vst [vmem:[#allocation23_spill] sm:$0xff] %v6785_v19  ;;  %v2457_v35 = vmax.f32 %v2052_v22, 0.0 }
 0x4d4   : > { %7480 = vst [vmem:[#allocation24_spill] sm:$0xff] %v6787_v21  ;;  %v2140_v45 = vpop.f32.mrf.mxu2  ;;  %v2229_v38 = vpop.f32.mrf.mxu3  ;;  %v2342_v21 = vmax.f32 %v1750_v8, 0.0  ;;  %v2343_v15 = vmax.f32 %v1839_v30, 0.0  ;;  %v4697_v30 = vld [vmem:[#allocation10 + $0x198] sm:$0xff] }
 0x4d5   : > { %v1964_v60 = vpop.f32.mrf.mxu0  ;;  %v2053_v7 = vpop.f32.mrf.mxu1  ;;  %v2141_v53 = vadd.f32 %v2140_v45, %v6457_v47  ;;  %v2230_v19 = vadd.f32 %v2229_v38, %v6459_v36  ;;  %3682 = vmatpush.bf16.msrb.mxu2 %v4697_v30 }
 0x4d6   : > { %v1965_v31 = vadd.f32 %v1964_v60, %v6441_v46  ;;  %v2054_v25 = vadd.f32 %v2053_v7, %v6443_v13  ;;  %v2348_v60 = vmax.f32 %v1574_v52, 0.0  ;;  %v2349_v7 = vmax.f32 %v1663_v63, 0.0 }
 0x4d7   : > { %v2550_v22 = vpack.c.bf16 %v2350_v33, %v2342_v21  ;;  %v2551_v45 = vpack.c.bf16 %v2351_v11, %v2343_v15  ;;  %v2458_v38 = vmax.f32 %v2141_v53, 0.0  ;;  %v2459_v8 = vmax.f32 %v2230_v19, 0.0 }
 0x4d8   : > { %v2464_v56 = vmax.f32 %v1965_v31, 0.0  ;;  %v2465_v43 = vmax.f32 %v2054_v25, 0.0  ;;  %v2548_v25 = vpack.c.bf16 %v2348_v60, %v2340_v58  ;;  %v2549_v44 = vpack.c.bf16 %v2349_v7, %v2341_v10 }
 0x4d9   : > { %v1577_v21 = vadd.f32 %v6248_v62, %v6421_v16  ;;  %v1666_v19 = vadd.f32 %v6250_v42, %v6423_v28  ;;  %v1579_v33 = vadd.f32 %v6257_v3, %v6421_v16  ;;  %v1668_v11 = vadd.f32 %v6259_v61, %v6423_v28  ;;  %v7490_v3 = vld [vmem:[#allocation49_spill] sm:$0xff]  ;;  %v7491_v61 = vld [vmem:[#allocation50_spill] sm:$0xff] }
 0x4da   : > { %v6813_v52 = vpack.c.bf16 %v2464_v56, %v2456_v34  ;;  %v6815_v63 = vpack.c.bf16 %v2465_v43, %v2457_v35  ;;  %v1757_v15 = vadd.f32 %v6261_v49, %v6429_v55  ;;  %v1846_v62 = vadd.f32 %v6263_v1, %v6431_v48 }
 0x4db   : > { %v2364_v49 = vmax.f32 %v1579_v33, 0.0 }
 0x4dc   : > { %v2142_v12 = vpop.f32.mrf.mxu2  ;;  %v2231_v51 = vpop.f32.mrf.mxu3  ;;  %v2367_v1 = vmax.f32 %v1846_v62, 0.0 }
 0x4dd   : > { %v2143_v18 = vadd.f32 %v2142_v12, %v6457_v47  ;;  %v2232_v31 = vadd.f32 %v2231_v51, %v6459_v36  ;;  %v1967_v14 = vpop.f32.mrf.mxu0  ;;  %v2056_v29 = vpop.f32.mrf.mxu1  ;;  %v4681_v51 = vld [vmem:[#allocation10 + $0x118] sm:$0xff] }
 0x4de   : > { %v4705_v12 = vld [vmem:[#allocation10 + $0x1d8] sm:$0xff]  ;;  %3504 = vmatpush.bf16.msrb.mxu0 %v4681_v51  ;;  %v1968_v42 = vadd.f32 %v1967_v14, %v6441_v46  ;;  %v2057_v53 = vadd.f32 %v2056_v29, %v6443_v13 }
 0x4df   : > { %v2466_v23 = vmax.f32 %v2143_v18, 0.0  ;;  %v2467_v2 = vmax.f32 %v2232_v31, 0.0  ;;  %3771 = vmatpush.bf16.msrb.mxu3 %v4705_v12  ;;  %v4689_v18 = vld [vmem:[#allocation10 + $0x158] sm:$0xff]  ;;  %v1755_v31 = vadd.f32 %v7490_v3, %v6429_v55 }
 0x4e0   : > { %3182 = vmatmul.bf16.gmra.mxu0 %v2548_v25  ;;  %3271 = vmatmul.bf16.gmra.mxu1 %v2549_v44  ;;  %v1844_v25 = vadd.f32 %v7491_v61, %v6431_v48  ;;  %v2473_v14 = vmax.f32 %v2057_v53, 0.0 }
 0x4e1   : > { %3360 = vmatmul.bf16.gmra.mxu2 %v2550_v22  ;;  %3449 = vmatmul.bf16.gmra.mxu3 %v2551_v45  ;;  %v6817_v56 = vpack.c.bf16 %v2466_v23, %v2458_v38  ;;  %v6819_v43 = vpack.c.bf16 %v2467_v2, %v2459_v8  ;;  %v2356_v2 = vmax.f32 %v1577_v21, 0.0  ;;  %v2357_v22 = vmax.f32 %v1666_v19, 0.0 }
 0x4e2   : > { %3593 = vmatpush.bf16.msrb.mxu1 %v4689_v18  ;;  %v2365_v45 = vmax.f32 %v1668_v11, 0.0  ;;  %v2366_v38 = vmax.f32 %v1757_v15, 0.0  ;;  %v2472_v8 = vmax.f32 %v1968_v42, 0.0  ;;  %v2358_v30 = vmax.f32 %v1755_v31, 0.0 }
 0x4e3   : > { %7489 = vst [vmem:[#allocation25_spill] sm:$0xff] %v6819_v43  ;;  %v2359_v29 = vmax.f32 %v1844_v25, 0.0  ;;  %v2556_v15 = vpack.c.bf16 %v2364_v49, %v2356_v2 }
 0x4e4   : > { %v2145_v58 = vpop.f32.mrf.mxu2  ;;  %v2234_v10 = vpop.f32.mrf.mxu3  ;;  %v2557_v62 = vpack.c.bf16 %v2365_v45, %v2357_v22  ;;  %v2558_v18 = vpack.c.bf16 %v2366_v38, %v2358_v30  ;;  %v7497_v22 = vld [vmem:[#allocation52_spill] sm:$0xff] }
 0x4e5   : > { %v1969_v60 = vpop.f32.mrf.mxu0  ;;  %v2058_v7 = vpop.f32.mrf.mxu1  ;;  %v2146_v51 = vadd.f32 %v2145_v58, %v6457_v47  ;;  %v2235_v12 = vadd.f32 %v2234_v10, %v6459_v36  ;;  %v2559_v58 = vpack.c.bf16 %v2367_v1, %v2359_v29  ;;  %v1671_v49 = vadd.f32 %v7497_v22, %v6423_v28  ;;  %v7498_v1 = vld [vmem:[#allocation55_spill] sm:$0xff] }
 0x4e6   : > { %v1970_v34 = vadd.f32 %v1969_v60, %v6441_v46  ;;  %v2059_v35 = vadd.f32 %v2058_v7, %v6443_v13 }
 0x4e7   : > { %v2474_v10 = vmax.f32 %v2146_v51, 0.0  ;;  %v2475_v3 = vmax.f32 %v2235_v12, 0.0  ;;  %v7500_v12 = vld [vmem:[#allocation57_spill] sm:$0xff] }
 0x4e8   : > { %v2480_v44 = vmax.f32 %v1970_v34, 0.0  ;;  %v2481_v23 = vmax.f32 %v2059_v35, 0.0 }
 0x4ea   : > { %v6845_v33 = vpack.c.bf16 %v2480_v44, %v2472_v8  ;;  %v6847_v11 = vpack.c.bf16 %v2481_v23, %v2473_v14  ;;  %v7496_v23 = vld [vmem:[#allocation51_spill] sm:$0xff]  ;;  %v1584_v8 = vadd.f32 %v7498_v1, %v6421_v16  ;;  %v7499_v14 = vld [vmem:[#allocation56_spill] sm:$0xff] }
 0x4eb   : > { %v1582_v2 = vadd.f32 %v7496_v23, %v6421_v16  ;;  %v1673_v30 = vadd.f32 %v7499_v14, %v6423_v28  ;;  %v2373_v23 = vmax.f32 %v1671_v49, 0.0 }
 0x4ec   : > { %v2147_v60 = vpop.f32.mrf.mxu2  ;;  %v2236_v7 = vpop.f32.mrf.mxu3  ;;  %7492 = vst [vmem:[#allocation26_spill] sm:$0xff] %v6845_v33  ;;  %v2380_v22 = vmax.f32 %v1584_v8, 0.0 }
 0x4ed   : > { %v2148_v34 = vadd.f32 %v2147_v60, %v6457_v47  ;;  %v2237_v35 = vadd.f32 %v2236_v7, %v6459_v36  ;;  %v1972_v21 = vpop.f32.mrf.mxu0  ;;  %v2061_v19 = vpop.f32.mrf.mxu1  ;;  %7493 = vst [vmem:[#allocation29_spill] sm:$0xff] %v6847_v11  ;;  %v1762_v60 = vadd.f32 %v7500_v12, %v6429_v55  ;;  %v7501_v7 = vld [vmem:[#allocation58_spill] sm:$0xff] }
 0x4ef   : > { %v2482_v42 = vmax.f32 %v2148_v34, 0.0  ;;  %v2483_v53 = vmax.f32 %v2237_v35, 0.0  ;;  %v1851_v34 = vadd.f32 %v7501_v7, %v6431_v48  ;;  %v1973_v35 = vadd.f32 %v1972_v21, %v6441_v46 }
 0x4f0   : > { %3187 = vmatmul.bf16.gmra.mxu0 %v2556_v15  ;;  %3276 = vmatmul.bf16.gmra.mxu1 %v2557_v62  ;;  %v2062_v15 = vadd.f32 %v2061_v19, %v6443_v13  ;;  %v7502_v62 = vld [vmem:[#allocation53_spill] sm:$0xff] }
 0x4f1   : > { %3365 = vmatmul.bf16.gmra.mxu2 %v2558_v18  ;;  %3454 = vmatmul.bf16.gmra.mxu3 %v2559_v58  ;;  %v6849_v31 = vpack.c.bf16 %v2482_v42, %v2474_v10  ;;  %v6851_v61 = vpack.c.bf16 %v2483_v53, %v2475_v3  ;;  %v1760_v42 = vadd.f32 %v7502_v62, %v6429_v55  ;;  %v7503_v53 = vld [vmem:[#allocation54_spill] sm:$0xff]  ;;  %v2372_v3 = vmax.f32 %v1582_v2, 0.0 }
 0x4f2   : > { %v1849_v18 = vadd.f32 %v7503_v53, %v6431_v48  ;;  %v2383_v21 = vmax.f32 %v1851_v34, 0.0  ;;  %v2489_v19 = vmax.f32 %v2062_v15, 0.0 }
 0x4f3   : > { %7494 = vst [vmem:[#allocation30_spill] sm:$0xff] %v6849_v31  ;;  %v2374_v1 = vmax.f32 %v1760_v42, 0.0 }
 0x4f4   : > { %7495 = vst [vmem:[#allocation31_spill] sm:$0xff] %v6851_v61  ;;  %v2150_v25 = vpop.f32.mrf.mxu2  ;;  %v2239_v44 = vpop.f32.mrf.mxu3  ;;  %v2375_v14 = vmax.f32 %v1849_v18, 0.0 }
 0x4f5   : > { %v1974_v45 = vpop.f32.mrf.mxu0  ;;  %v2063_v38 = vpop.f32.mrf.mxu1  ;;  %v2151_v12 = vadd.f32 %v2150_v25, %v6457_v47 }
 0x4f6   : > { %v1975_v29 = vadd.f32 %v1974_v45, %v6441_v46  ;;  %v2064_v51 = vadd.f32 %v2063_v38, %v6443_v13  ;;  %v2381_v45 = vmax.f32 %v1673_v30, 0.0  ;;  %v6876_v38 = vld [vmem:[%s7290_s6] ss:$0 sm:$0xff]  ;;  %v2382_v46 = vmax.f32 %v1762_v60, 0.0 }
 0x4f7   : > { %v2488_v13 = vmax.f32 %v1973_v35, 0.0  ;;  %v2564_v35 = vpack.c.bf16 %v2380_v22, %v2372_v3 }
 0x4f8   : > { %v2496_v58 = vmax.f32 %v1975_v29, 0.0  ;;  %v2497_v10 = vmax.f32 %v2064_v51, 0.0  ;;  %v2240_v29 = vadd.f32 %v2239_v44, %v6459_v36  ;;  %v2565_v15 = vpack.c.bf16 %v2381_v45, %v2373_v23 }
 0x4f9   : > { %v2566_v53 = vpack.c.bf16 %v2382_v46, %v2374_v1  ;;  %v2567_v44 = vpack.c.bf16 %v2383_v21, %v2375_v14  ;;  %v7509_v14 = vld [vmem:[#allocation64_spill] sm:$0xff] }
 0x4fa   : > { %v6882_v62 = vpack.c.bf16 %v2496_v58, %v2488_v13  ;;  %v6884_v60 = vpack.c.bf16 %v2497_v10, %v2489_v19  ;;  %v4680_v58 = vld [vmem:[#allocation10 + $0x110] sm:$0xff]  ;;  %v7508_v19 = vld [vmem:[#allocation63_spill] sm:$0xff] }
 0x4fb   : > { %v4704_v13 = vld [vmem:[#allocation10 + $0x1d0] sm:$0xff]  ;;  %3505 = vmatpush.bf16.msrb.mxu0 %v4680_v58  ;;  %v1589_v1 = vadd.f32 %v7508_v19, %v6421_v16 }
 0x4fc   : > { %v2152_v51 = vpop.f32.mrf.mxu2  ;;  %v2241_v2 = vpop.f32.mrf.mxu3  ;;  %7504 = vst [vmem:[#allocation32_spill] sm:$0xff] %v6882_v62  ;;  %3772 = vmatpush.bf16.msrb.mxu3 %v4704_v13 }
 0x4fd   : > { %v2153_v49 = vadd.f32 %v2152_v51, %v6457_v47  ;;  %v2242_v8 = vadd.f32 %v2241_v2, %v6459_v36  ;;  %v3153_v30 = vpop.f32.mrf.mxu0  ;;  %v3242_v7 = vpop.f32.mrf.mxu1  ;;  %7505 = vst [vmem:[#allocation27_spill] sm:$0xff] %v6884_v60  ;;  %v2490_v47 = vmax.f32 %v2151_v12, 0.0  ;;  %v2491_v51 = vmax.f32 %v2240_v29, 0.0  ;;  %v4696_v36 = vld [vmem:[#allocation10 + $0x190] sm:$0xff]  ;;  %v7510_v2 = vld [vmem:[#allocation65_spill] sm:$0xff] }
 0x4fe   : > { %v3154_v34 = vadd.f32 %v6876_v38, %v3153_v30  ;;  %3683 = vmatpush.bf16.msrb.mxu2 %v4696_v36  ;;  %v1678_v12 = vadd.f32 %v7509_v14, %v6423_v28  ;;  %v2396_v36 = vmax.f32 %v1589_v1, 0.0 }
 0x4ff   : > { %v2498_v42 = vmax.f32 %v2153_v49, 0.0  ;;  %v2499_v25 = vmax.f32 %v2242_v8, 0.0  ;;  %v1767_v49 = vadd.f32 %v7510_v2, %v6429_v55  ;;  %v7511_v8 = vld [vmem:[#allocation66_spill] sm:$0xff] }
 0x500   : > { %v3243_v18 = vadd.f32 %v3242_v7, %v3154_v34  ;;  %3192 = vmatmul.bf16.gmra.mxu0 %v2564_v35  ;;  %3281 = vmatmul.bf16.gmra.mxu1 %v2565_v15  ;;  %v1856_v30 = vadd.f32 %v7511_v8, %v6431_v48  ;;  %v4688_v34 = vld [vmem:[#allocation10 + $0x150] sm:$0xff]  ;;  %v7512_v35 = vld [vmem:[#allocation59_spill] sm:$0xff]  ;;  %v2397_v58 = vmax.f32 %v1678_v12, 0.0 }
 0x501   : > { %3370 = vmatmul.bf16.gmra.mxu2 %v2566_v53  ;;  %3459 = vmatmul.bf16.gmra.mxu3 %v2567_v44  ;;  %v6887_v10 = vpack.c.bf16 %v2498_v42, %v2490_v47  ;;  %v6889_v3 = vpack.c.bf16 %v2499_v25, %v2491_v51  ;;  %v1587_v15 = vadd.f32 %v7512_v35, %v6421_v16  ;;  %v7513_v42 = vld [vmem:[#allocation60_spill] sm:$0xff]  ;;  %v7514_v44 = vld [vmem:[#allocation61_spill] sm:$0xff]  ;;  %v7515_v47 = vld [vmem:[#allocation62_spill] sm:$0xff]  ;;  %v2398_v13 = vmax.f32 %v1767_v49, 0.0 }
 0x502   : > { %v1676_v25 = vadd.f32 %v7513_v42, %v6423_v28  ;;  %v1854_v51 = vadd.f32 %v7515_v47, %v6431_v48  ;;  %3594 = vmatpush.bf16.msrb.mxu1 %v4688_v34 }
 0x503   : > { %7506 = vst [vmem:[#allocation28_spill] sm:$0xff] %v6887_v10 }
 0x504   : > { %7507 = vst [vmem:[#allocation33_spill] sm:$0xff] %v6889_v3  ;;  %v3331_v23 = vpop.f32.mrf.mxu2  ;;  %v3420_v22 = vpop.f32.mrf.mxu3  ;;  %v2391_v2 = vmax.f32 %v1854_v51, 0.0  ;;  %v7517_v51 = vld [vmem:[#allocation72_spill] sm:$0xff] }
 0x505   : > { %v3332_v45 = vadd.f32 %v3331_v23, %v3243_v18  ;;  %v3155_v46 = vpop.f32.mrf.mxu0  ;;  %v3244_v21 = vpop.f32.mrf.mxu1  ;;  %v1765_v18 = vadd.f32 %v7514_v44, %v6429_v55  ;;  %v2399_v23 = vmax.f32 %v1856_v30, 0.0 }
 0x506   : > { %v3156_v29 = vadd.f32 %v6876_v38, %v3155_v46 }
 0x507   : > { %v6900_v7 = vadd.f32 %v3420_v22, %v3332_v45  ;;  %v2388_v22 = vmax.f32 %v1587_v15, 0.0  ;;  %v2389_v45 = vmax.f32 %v1676_v25, 0.0  ;;  %v2390_v14 = vmax.f32 %v1765_v18, 0.0  ;;  %v7516_v18 = vld [vmem:[#allocation71_spill] sm:$0xff] }
 0x508   : > { %v3245_v53 = vadd.f32 %v3244_v21, %v3156_v29  ;;  %v2575_v1 = vpack.c.bf16 %v2399_v23, %v2391_v2  ;;  %v1594_v47 = vadd.f32 %v7516_v18, %v6421_v16  ;;  %v7521_v2 = vld [vmem:[#allocation68_spill] sm:$0xff] }
 0x509   : > { %v2572_v42 = vpack.c.bf16 %v2396_v36, %v2388_v22  ;;  %v2573_v44 = vpack.c.bf16 %v2397_v58, %v2389_v45  ;;  %v2574_v34 = vpack.c.bf16 %v2398_v13, %v2390_v14  ;;  %v1683_v36 = vadd.f32 %v7517_v51, %v6423_v28  ;;  %v7518_v13 = vld [vmem:[#allocation73_spill] sm:$0xff]  ;;  %v7519_v22 = vld [vmem:[#allocation74_spill] sm:$0xff] }
 0x50a   : > { %v1772_v23 = vadd.f32 %v7518_v13, %v6429_v55  ;;  %v1861_v45 = vadd.f32 %v7519_v22, %v6431_v48 }
 0x50c   : > { %v3333_v46 = vpop.f32.mrf.mxu2  ;;  %v3422_v19 = vpop.f32.mrf.mxu3 }
 0x50d   : > { %v3334_v8 = vadd.f32 %v3333_v46, %v3245_v53  ;;  %v3158_v35 = vpop.f32.mrf.mxu0  ;;  %v3247_v21 = vpop.f32.mrf.mxu1 }
 0x50e   : > { %v3159_v29 = vadd.f32 %v6876_v38, %v3158_v35 }
 0x50f   : > { %v6911_v3 = vadd.f32 %v3422_v19, %v3334_v8  ;;  %v7520_v19 = vld [vmem:[#allocation67_spill] sm:$0xff]  ;;  %v1681_v8 = vadd.f32 %v7521_v2, %v6423_v28 }
 0x510   : > { %v3248_v12 = vadd.f32 %v3247_v21, %v3159_v29  ;;  %3197 = vmatmul.bf16.gmra.mxu0 %v2572_v42  ;;  %3286 = vmatmul.bf16.gmra.mxu1 %v2573_v44  ;;  %v1592_v14 = vadd.f32 %v7520_v19, %v6421_v16  ;;  %v7522_v21 = vld [vmem:[#allocation69_spill] sm:$0xff]  ;;  %v7523_v42 = vld [vmem:[#allocation70_spill] sm:$0xff] }
 0x511   : > { %3375 = vmatmul.bf16.gmra.mxu2 %v2574_v34  ;;  %3464 = vmatmul.bf16.gmra.mxu3 %v2575_v1  ;;  %v1770_v29 = vadd.f32 %v7522_v21, %v6429_v55  ;;  %v1859_v44 = vadd.f32 %v7523_v42, %v6431_v48  ;;  %v2412_v34 = vmax.f32 %v1594_v47, 0.0  ;;  %v2413_v1 = vmax.f32 %v1683_v36, 0.0 }
 0x513   : > { %v2406_v51 = vmax.f32 %v1770_v29, 0.0  ;;  %v2407_v13 = vmax.f32 %v1859_v44, 0.0 }
 0x514   : > { %v3336_v49 = vpop.f32.mrf.mxu2  ;;  %v3425_v30 = vpop.f32.mrf.mxu3 }
 0x515   : > { %v3337_v15 = vadd.f32 %v3336_v49, %v3248_v12  ;;  %v3160_v25 = vpop.f32.mrf.mxu0  ;;  %v3249_v53 = vpop.f32.mrf.mxu1  ;;  %v2414_v12 = vmax.f32 %v1772_v23, 0.0  ;;  %v2415_v49 = vmax.f32 %v1861_v45, 0.0  ;;  %v4695_v23 = vld [vmem:[#allocation10 + $0x188] sm:$0xff] }
 0x516   : > { %v3161_v58 = vadd.f32 %v6876_v38, %v3160_v25  ;;  %v2404_v25 = vmax.f32 %v1592_v14, 0.0  ;;  %v4679_v45 = vld [vmem:[#allocation10 + $0x108] sm:$0xff]  ;;  %3684 = vmatpush.bf16.msrb.mxu2 %v4695_v23  ;;  %v7531_v23 = vld [vmem:[#allocation78_spill] sm:$0xff] }
 0x517   : > { %v6922_v46 = vadd.f32 %v3425_v30, %v3337_v15  ;;  %v2405_v30 = vmax.f32 %v1681_v8, 0.0  ;;  %v2582_v42 = vpack.c.bf16 %v2414_v12, %v2406_v51  ;;  %v2583_v47 = vpack.c.bf16 %v2415_v49, %v2407_v13  ;;  %v4703_v14 = vld [vmem:[#allocation10 + $0x1c8] sm:$0xff]  ;;  %3506 = vmatpush.bf16.msrb.mxu0 %v4679_v45  ;;  %v7525_v49 = vld [vmem:[#allocation80_spill] sm:$0xff]  ;;  %v7527_v51 = vld [vmem:[#allocation82_spill] sm:$0xff] }
 0x518   : > { %v3250_v35 = vadd.f32 %v3249_v53, %v3161_v58  ;;  %v2580_v58 = vpack.c.bf16 %v2412_v34, %v2404_v25  ;;  %3773 = vmatpush.bf16.msrb.mxu3 %v4703_v14  ;;  %v1688_v25 = vadd.f32 %v7525_v49, %v6423_v28  ;;  %v1866_v13 = vadd.f32 %v7527_v51, %v6431_v48 }
 0x519   : > { %v2581_v21 = vpack.c.bf16 %v2413_v1, %v2405_v30  ;;  %v7524_v1 = vld [vmem:[#allocation79_spill] sm:$0xff]  ;;  %v1864_v45 = vadd.f32 %v7531_v23, %v6431_v48 }
 0x51a   : > { %v1599_v12 = vadd.f32 %v7524_v1, %v6421_v16 }
 0x51c   : > { %v3338_v15 = vpop.f32.mrf.mxu2  ;;  %v3427_v18 = vpop.f32.mrf.mxu3  ;;  %v2428_v14 = vmax.f32 %v1599_v12, 0.0 }
 0x51d   : > { %v3339_v22 = vadd.f32 %v3338_v15, %v3250_v35  ;;  %v3163_v19 = vpop.f32.mrf.mxu0  ;;  %v3252_v2 = vpop.f32.mrf.mxu1  ;;  %v7526_v15 = vld [vmem:[#allocation81_spill] sm:$0xff] }
 0x51e   : > { %v3164_v53 = vadd.f32 %v6876_v38, %v3163_v19  ;;  %v4687_v19 = vld [vmem:[#allocation10 + $0x148] sm:$0xff] }
 0x51f   : > { %v6933_v10 = vadd.f32 %v3427_v18, %v3339_v22  ;;  %v1777_v18 = vadd.f32 %v7526_v15, %v6429_v55  ;;  %3595 = vmatpush.bf16.msrb.mxu1 %v4687_v19 }
 0x520   : > { %v3253_v36 = vadd.f32 %v3252_v2, %v3164_v53  ;;  %3202 = vmatmul.bf16.gmra.mxu0 %v2580_v58  ;;  %3291 = vmatmul.bf16.gmra.mxu1 %v2581_v21  ;;  %v7528_v2 = vld [vmem:[#allocation75_spill] sm:$0xff]  ;;  %v7529_v58 = vld [vmem:[#allocation76_spill] sm:$0xff] }
 0x521   : > { %3380 = vmatmul.bf16.gmra.mxu2 %v2582_v42  ;;  %3469 = vmatmul.bf16.gmra.mxu3 %v2583_v47  ;;  %v1597_v53 = vadd.f32 %v7528_v2, %v6421_v16  ;;  %v1686_v21 = vadd.f32 %v7529_v58, %v6423_v28  ;;  %v7530_v47 = vld [vmem:[#allocation77_spill] sm:$0xff]  ;;  %v2423_v2 = vmax.f32 %v1864_v45, 0.0  ;;  %v7533_v45 = vld [vmem:[#allocation88_spill] sm:$0xff] }
 0x523   : > { %v2421_v1 = vmax.f32 %v1686_v21, 0.0 }
 0x524   : > { %v3341_v8 = vpop.f32.mrf.mxu2  ;;  %v3430_v35 = vpop.f32.mrf.mxu3 }
 0x525   : > { %v3342_v29 = vadd.f32 %v3341_v8, %v3253_v36  ;;  %v3165_v44 = vpop.f32.mrf.mxu0  ;;  %v3254_v34 = vpop.f32.mrf.mxu1  ;;  %v1775_v36 = vadd.f32 %v7530_v47, %v6429_v55  ;;  %v2429_v8 = vmax.f32 %v1688_v25, 0.0 }
 0x526   : > { %v3166_v30 = vadd.f32 %v6876_v38, %v3165_v44  ;;  %v2430_v44 = vmax.f32 %v1777_v18, 0.0 }
 0x527   : > { %v6944_v22 = vadd.f32 %v3430_v35, %v3342_v29  ;;  %v2431_v35 = vmax.f32 %v1866_v13, 0.0  ;;  %v2420_v29 = vmax.f32 %v1597_v53, 0.0  ;;  %v2422_v51 = vmax.f32 %v1775_v36, 0.0  ;;  %v7532_v36 = vld [vmem:[#allocation87_spill] sm:$0xff] }
 0x528   : > { %v3255_v42 = vadd.f32 %v3254_v34, %v3166_v30  ;;  %v2589_v62 = vpack.c.bf16 %v2429_v8, %v2421_v1  ;;  %v1604_v23 = vadd.f32 %v7532_v36, %v6421_v16  ;;  %v7534_v8 = vld [vmem:[#allocation89_spill] sm:$0xff]  ;;  %v7536_v1 = vld [vmem:[#allocation83_spill] sm:$0xff] }
 0x529   : > { %v2588_v47 = vpack.c.bf16 %v2428_v14, %v2420_v29  ;;  %v2590_v19 = vpack.c.bf16 %v2430_v44, %v2422_v51  ;;  %v2591_v12 = vpack.c.bf16 %v2431_v35, %v2423_v2  ;;  %v1693_v14 = vadd.f32 %v7533_v45, %v6423_v28 }
 0x52a   : > { %v1782_v44 = vadd.f32 %v7534_v8, %v6429_v55 }
 0x52c   : > { %v3343_v49 = vpop.f32.mrf.mxu2  ;;  %v3432_v15 = vpop.f32.mrf.mxu3 }
 0x52d   : > { %v3344_v60 = vadd.f32 %v3343_v49, %v3255_v42  ;;  %v3168_v58 = vpop.f32.mrf.mxu0  ;;  %v3257_v34 = vpop.f32.mrf.mxu1  ;;  %v1602_v49 = vadd.f32 %v7536_v1, %v6421_v16 }
 0x52e   : > { %v3169_v30 = vadd.f32 %v6876_v38, %v3168_v58  ;;  %v7538_v58 = vld [vmem:[#allocation85_spill] sm:$0xff] }
 0x52f   : > { %v6955_v61 = vadd.f32 %v3432_v15, %v3344_v60  ;;  %v7537_v15 = vld [vmem:[#allocation84_spill] sm:$0xff] }
 0x530   : > { %v3258_v25 = vadd.f32 %v3257_v34, %v3169_v30  ;;  %3207 = vmatmul.bf16.gmra.mxu0 %v2588_v47  ;;  %3296 = vmatmul.bf16.gmra.mxu1 %v2589_v62  ;;  %v7535_v62 = vld [vmem:[#allocation90_spill] sm:$0xff]  ;;  %v1691_v51 = vadd.f32 %v7537_v15, %v6423_v28  ;;  %v1780_v34 = vadd.f32 %v7538_v58, %v6429_v55 }
 0x531   : > { %3385 = vmatmul.bf16.gmra.mxu2 %v2590_v19  ;;  %3474 = vmatmul.bf16.gmra.mxu3 %v2591_v12  ;;  %v1871_v35 = vadd.f32 %v7535_v62, %v6431_v48  ;;  %v7539_v30 = vld [vmem:[#allocation86_spill] sm:$0xff]  ;;  %v2444_v19 = vmax.f32 %v1604_v23, 0.0  ;;  %v2445_v12 = vmax.f32 %v1693_v14, 0.0 }
 0x532   : > { %v1869_v47 = vadd.f32 %v7539_v30, %v6431_v48  ;;  %v2438_v45 = vmax.f32 %v1780_v34, 0.0 }
 0x534   : > { %v3346_v18 = vpop.f32.mrf.mxu2  ;;  %v3435_v13 = vpop.f32.mrf.mxu3  ;;  %v2439_v8 = vmax.f32 %v1869_v47, 0.0 }
 0x535   : > { %v3347_v53 = vadd.f32 %v3346_v18, %v3258_v25  ;;  %v3170_v21 = vpop.f32.mrf.mxu0  ;;  %v3259_v42 = vpop.f32.mrf.mxu1  ;;  %v2446_v25 = vmax.f32 %v1782_v44, 0.0  ;;  %v2447_v18 = vmax.f32 %v1871_v35, 0.0  ;;  %v4694_v44 = vld [vmem:[#allocation10 + $0x180] sm:$0xff] }
 0x536   : > { %v3171_v60 = vadd.f32 %v6876_v38, %v3170_v21  ;;  %v2436_v21 = vmax.f32 %v1602_v49, 0.0  ;;  %v4678_v35 = vld [vmem:[#allocation10 + $0x100] sm:$0xff]  ;;  %3685 = vmatpush.bf16.msrb.mxu2 %v4694_v44  ;;  %v7547_v44 = vld [vmem:[#allocation94_spill] sm:$0xff] }
 0x537   : > { %v6966_v29 = vadd.f32 %v3435_v13, %v3347_v53  ;;  %v2437_v13 = vmax.f32 %v1691_v51, 0.0  ;;  %v2598_v30 = vpack.c.bf16 %v2446_v25, %v2438_v45  ;;  %v2599_v23 = vpack.c.bf16 %v2447_v18, %v2439_v8  ;;  %v4702_v49 = vld [vmem:[#allocation10 + $0x1c0] sm:$0xff]  ;;  %3507 = vmatpush.bf16.msrb.mxu0 %v4678_v35  ;;  %v7543_v45 = vld [vmem:[#allocation98_spill] sm:$0xff] }
 0x538   : > { %v3260_v2 = vadd.f32 %v3259_v42, %v3171_v60  ;;  %v2596_v60 = vpack.c.bf16 %v2444_v19, %v2436_v21  ;;  %3774 = vmatpush.bf16.msrb.mxu3 %v4702_v49  ;;  %v7541_v18 = vld [vmem:[#allocation96_spill] sm:$0xff]  ;;  %v1876_v8 = vadd.f32 %v7543_v45, %v6431_v48  ;;  %v1874_v35 = vadd.f32 %v7547_v44, %v6431_v48 }
 0x539   : > { %v2597_v58 = vpack.c.bf16 %v2445_v12, %v2437_v13  ;;  %v7540_v12 = vld [vmem:[#allocation95_spill] sm:$0xff]  ;;  %v1698_v21 = vadd.f32 %v7541_v18, %v6423_v28 }
 0x53a   : > { %v1609_v25 = vadd.f32 %v7540_v12, %v6421_v16 }
 0x53c   : > { %v3348_v53 = vpop.f32.mrf.mxu2  ;;  %v3437_v36 = vpop.f32.mrf.mxu3  ;;  %v2460_v49 = vmax.f32 %v1609_v25, 0.0 }
 0x53d   : > { %v3349_v62 = vadd.f32 %v3348_v53, %v3260_v2  ;;  %v3173_v1 = vpop.f32.mrf.mxu0  ;;  %v3262_v15 = vpop.f32.mrf.mxu1  ;;  %v7542_v53 = vld [vmem:[#allocation97_spill] sm:$0xff] }
 0x53e   : > { %v3174_v42 = vadd.f32 %v6876_v38, %v3173_v1  ;;  %v4686_v1 = vld [vmem:[#allocation10 + $0x140] sm:$0xff] }
 0x53f   : > { %v6977_v31 = vadd.f32 %v3437_v36, %v3349_v62  ;;  %v1787_v36 = vadd.f32 %v7542_v53, %v6429_v55  ;;  %3596 = vmatpush.bf16.msrb.mxu1 %v4686_v1 }
 0x540   : > { %v3263_v14 = vadd.f32 %v3262_v15, %v3174_v42  ;;  %3212 = vmatmul.bf16.gmra.mxu0 %v2596_v60  ;;  %3301 = vmatmul.bf16.gmra.mxu1 %v2597_v58  ;;  %v7544_v15 = vld [vmem:[#allocation91_spill] sm:$0xff]  ;;  %v7545_v60 = vld [vmem:[#allocation92_spill] sm:$0xff] }
 0x541   : > { %3390 = vmatmul.bf16.gmra.mxu2 %v2598_v30  ;;  %3479 = vmatmul.bf16.gmra.mxu3 %v2599_v23  ;;  %v1607_v42 = vadd.f32 %v7544_v15, %v6421_v16  ;;  %v1696_v58 = vadd.f32 %v7545_v60, %v6423_v28  ;;  %v7546_v23 = vld [vmem:[#allocation93_spill] sm:$0xff]  ;;  %v2455_v15 = vmax.f32 %v1874_v35, 0.0  ;;  %v7549_v35 = vld [vmem:[#allocation104_spill] sm:$0xff] }
 0x543   : > { %v2453_v12 = vmax.f32 %v1696_v58, 0.0 }
 0x544   : > { %v3351_v51 = vpop.f32.mrf.mxu2  ;;  %v3440_v2 = vpop.f32.mrf.mxu3 }
 0x545   : > { %v3352_v34 = vadd.f32 %v3351_v51, %v3263_v14  ;;  %v3175_v47 = vpop.f32.mrf.mxu0  ;;  %v3264_v19 = vpop.f32.mrf.mxu1  ;;  %v1785_v14 = vadd.f32 %v7546_v23, %v6429_v55  ;;  %v2461_v51 = vmax.f32 %v1698_v21, 0.0 }
 0x546   : > { %v3176_v13 = vadd.f32 %v6876_v38, %v3175_v47  ;;  %v2462_v47 = vmax.f32 %v1787_v36, 0.0 }
 0x547   : > { %v6988_v62 = vadd.f32 %v3440_v2, %v3352_v34  ;;  %v2463_v2 = vmax.f32 %v1876_v8, 0.0  ;;  %v2452_v34 = vmax.f32 %v1607_v42, 0.0  ;;  %v2454_v45 = vmax.f32 %v1785_v14, 0.0  ;;  %v7548_v14 = vld [vmem:[#allocation103_spill] sm:$0xff] }
 0x548   : > { %v3265_v30 = vadd.f32 %v3264_v19, %v3176_v13  ;;  %v2605_v33 = vpack.c.bf16 %v2461_v51, %v2453_v12  ;;  %v1614_v44 = vadd.f32 %v7548_v14, %v6421_v16  ;;  %v7550_v51 = vld [vmem:[#allocation105_spill] sm:$0xff]  ;;  %v7552_v12 = vld [vmem:[#allocation99_spill] sm:$0xff] }
 0x549   : > { %v2604_v23 = vpack.c.bf16 %v2460_v49, %v2452_v34  ;;  %v2606_v1 = vpack.c.bf16 %v2462_v47, %v2454_v45  ;;  %v2607_v25 = vpack.c.bf16 %v2463_v2, %v2455_v15  ;;  %v1703_v49 = vadd.f32 %v7549_v35, %v6423_v28 }
 0x54a   : > { %v1792_v47 = vadd.f32 %v7550_v51, %v6429_v55 }
 0x54c   : > { %v3353_v18 = vpop.f32.mrf.mxu2  ;;  %v3442_v53 = vpop.f32.mrf.mxu3 }
 0x54d   : > { %v3354_v11 = vadd.f32 %v3353_v18, %v3265_v30  ;;  %v3178_v60 = vpop.f32.mrf.mxu0  ;;  %v3267_v19 = vpop.f32.mrf.mxu1  ;;  %v1612_v18 = vadd.f32 %v7552_v12, %v6421_v16 }
 0x54e   : > { %v3179_v13 = vadd.f32 %v6876_v38, %v3178_v60  ;;  %v7554_v60 = vld [vmem:[#allocation101_spill] sm:$0xff] }
 0x54f   : > { %v6999_v43 = vadd.f32 %v3442_v53, %v3354_v11  ;;  %v7553_v53 = vld [vmem:[#allocation100_spill] sm:$0xff] }
 0x550   : > { %v3268_v21 = vadd.f32 %v3267_v19, %v3179_v13  ;;  %3217 = vmatmul.bf16.gmra.mxu0 %v2604_v23  ;;  %3306 = vmatmul.bf16.gmra.mxu1 %v2605_v33  ;;  %v7551_v33 = vld [vmem:[#allocation106_spill] sm:$0xff]  ;;  %v1701_v45 = vadd.f32 %v7553_v53, %v6423_v28  ;;  %v1790_v19 = vadd.f32 %v7554_v60, %v6429_v55 }
 0x551   : > { %3395 = vmatmul.bf16.gmra.mxu2 %v2606_v1  ;;  %3484 = vmatmul.bf16.gmra.mxu3 %v2607_v25  ;;  %v1881_v2 = vadd.f32 %v7551_v33, %v6431_v48  ;;  %v7555_v13 = vld [vmem:[#allocation102_spill] sm:$0xff]  ;;  %v2476_v1 = vmax.f32 %v1614_v44, 0.0  ;;  %v2477_v25 = vmax.f32 %v1703_v49, 0.0 }
 0x552   : > { %v1879_v23 = vadd.f32 %v7555_v13, %v6431_v48  ;;  %v2470_v35 = vmax.f32 %v1790_v19, 0.0 }
 0x554   : > { %v3356_v36 = vpop.f32.mrf.mxu2  ;;  %v3445_v8 = vpop.f32.mrf.mxu3  ;;  %v2471_v16 = vmax.f32 %v1879_v23, 0.0 }
 0x555   : > { %v3357_v42 = vadd.f32 %v3356_v36, %v3268_v21  ;;  %v3180_v58 = vpop.f32.mrf.mxu0  ;;  %v3269_v30 = vpop.f32.mrf.mxu1  ;;  %v2478_v21 = vmax.f32 %v1792_v47, 0.0  ;;  %v2479_v36 = vmax.f32 %v1881_v2, 0.0 }
 0x556   : > { %v3181_v11 = vadd.f32 %v6876_v38, %v3180_v58  ;;  %v2468_v58 = vmax.f32 %v1612_v18, 0.0 }
 0x557   : > { %v7010_v34 = vadd.f32 %v3445_v8, %v3357_v42  ;;  %v2469_v8 = vmax.f32 %v1701_v45, 0.0  ;;  %v2614_v48 = vpack.c.bf16 %v2478_v21, %v2470_v35  ;;  %v2615_v44 = vpack.c.bf16 %v2479_v36, %v2471_v16  ;;  %v7558_v35 = vld [vmem:[#allocation109_spill] sm:$0xff]  ;;  %v7559_v16 = vld [vmem:[#allocation110_spill] sm:$0xff] }
 0x558   : > { %v3270_v15 = vadd.f32 %v3269_v30, %v3181_v11  ;;  %v2612_v11 = vpack.c.bf16 %v2476_v1, %v2468_v58 }
 0x559   : > { %v2613_v55 = vpack.c.bf16 %v2477_v25, %v2469_v8 }
 0x55c   : > { %v3358_v42 = vpop.f32.mrf.mxu2  ;;  %v3447_v14 = vpop.f32.mrf.mxu3 }
 0x55d   : > { %v3359_v51 = vadd.f32 %v3358_v42, %v3270_v15  ;;  %v3183_v33 = vpop.f32.mrf.mxu0  ;;  %v3272_v28 = vpop.f32.mrf.mxu1  ;;  %v7556_v42 = vld [vmem:[#allocation107_spill] sm:$0xff] }
 0x55e   : > { %v3184_v30 = vadd.f32 %v6876_v38, %v3183_v33 }
 0x55f   : > { %v7021_v12 = vadd.f32 %v3447_v14, %v3359_v51  ;;  %v7557_v14 = vld [vmem:[#allocation108_spill] sm:$0xff] }
 0x560   : > { %v3273_v49 = vadd.f32 %v3272_v28, %v3184_v30  ;;  %3222 = vmatmul.bf16.gmra.mxu0 %v2612_v11  ;;  %3311 = vmatmul.bf16.gmra.mxu1 %v2613_v55 }
 0x561   : > { %3400 = vmatmul.bf16.gmra.mxu2 %v2614_v48  ;;  %3489 = vmatmul.bf16.gmra.mxu3 %v2615_v44 }
 0x564   : > { %v3361_v47 = vpop.f32.mrf.mxu2  ;;  %v3450_v2 = vpop.f32.mrf.mxu3 }
 0x565   : > { %v3362_v18 = vadd.f32 %v3361_v47, %v3273_v49  ;;  %v3185_v53 = vpop.f32.mrf.mxu0  ;;  %v3274_v45 = vpop.f32.mrf.mxu1 }
 0x566   : > { %v3186_v15 = vadd.f32 %v6876_v38, %v3185_v53 }
 0x567   : > { %v7024_v60 = vadd.f32 %v3450_v2, %v3362_v18 }
 0x568   : > { %v3275_v19 = vadd.f32 %v3274_v45, %v3186_v15 }
 0x56c   : > { %v3363_v13 = vpop.f32.mrf.mxu2  ;;  %v3452_v23 = vpop.f32.mrf.mxu3 }
 0x56d   : > { %v3364_v1 = vadd.f32 %v3363_v13, %v3275_v19  ;;  %v3188_v25 = vpop.f32.mrf.mxu0  ;;  %v3277_v21 = vpop.f32.mrf.mxu1  ;;  %v7560_v13 = vld [vmem:[#allocation111_spill] sm:$0xff] }
 0x56e   : > { %v3189_v36 = vadd.f32 %v6876_v38, %v3188_v25  ;;  %v7563_v25 = vld [vmem:[#allocation114_spill] sm:$0xff] }
 0x56f   : > { %v7027_v58 = vadd.f32 %v3452_v23, %v3364_v1  ;;  %v7561_v23 = vld [vmem:[#allocation112_spill] sm:$0xff]  ;;  %v7562_v1 = vld [vmem:[#allocation113_spill] sm:$0xff] }
 0x570   : > { %v3278_v8 = vadd.f32 %v3277_v21, %v3189_v36  ;;  %3227 = vmatmul.bf16.gmra.mxu0 %v7556_v42  ;;  %3316 = vmatmul.bf16.gmra.mxu1 %v7557_v14 }
 0x571   : > { %3405 = vmatmul.bf16.gmra.mxu2 %v7558_v35  ;;  %3494 = vmatmul.bf16.gmra.mxu3 %v7559_v16 }
 0x574   : > { %v3366_v51 = vpop.f32.mrf.mxu2  ;;  %v3455_v33 = vpop.f32.mrf.mxu3 }
 0x575   : > { %v3367_v28 = vadd.f32 %v3366_v51, %v3278_v8  ;;  %v3190_v30 = vpop.f32.mrf.mxu0  ;;  %v3279_v11 = vpop.f32.mrf.mxu1 }
 0x576   : > { %v3191_v55 = vadd.f32 %v6876_v38, %v3190_v30 }
 0x577   : > { %v7034_v48 = vadd.f32 %v3455_v33, %v3367_v28 }
 0x578   : > { %v3280_v44 = vadd.f32 %v3279_v11, %v3191_v55 }
 0x57c   : > { %v3368_v49 = vpop.f32.mrf.mxu2  ;;  %v3457_v47 = vpop.f32.mrf.mxu3 }
 0x57d   : > { %v3369_v2 = vadd.f32 %v3368_v49, %v3280_v44  ;;  %v3193_v18 = vpop.f32.mrf.mxu0  ;;  %v3282_v53 = vpop.f32.mrf.mxu1 }
 0x57e   : > { %v3194_v45 = vadd.f32 %v6876_v38, %v3193_v18  ;;  %v7565_v18 = vld [vmem:[#allocation116_spill] sm:$0xff] }
 0x57f   : > { %v7037_v15 = vadd.f32 %v3457_v47, %v3369_v2  ;;  %v7564_v2 = vld [vmem:[#allocation115_spill] sm:$0xff] }
 0x580   : > { %v3283_v19 = vadd.f32 %v3282_v53, %v3194_v45  ;;  %3508 = vmatmul.bf16.vlgmr.msrb.gmra.mxu0 %v7560_v13  ;;  %3597 = vmatmul.bf16.vlgmr.msrb.gmra.mxu1 %v7561_v23  ;;  %v7566_v53 = vld [vmem:[#allocation117_spill] sm:$0xff] }
 0x581   : > { %3686 = vmatmul.bf16.vlgmr.msrb.gmra.mxu2 %v7562_v1  ;;  %3775 = vmatmul.bf16.vlgmr.msrb.gmra.mxu3 %v7563_v25 }
 0x584   : > { %v3371_v21 = vpop.f32.mrf.mxu2  ;;  %v3460_v36 = vpop.f32.mrf.mxu3 }
 0x585   : > { %v3372_v8 = vadd.f32 %v3371_v21, %v3283_v19  ;;  %v3195_v42 = vpop.f32.mrf.mxu0  ;;  %v3284_v14 = vpop.f32.mrf.mxu1 }
 0x586   : > { %v3196_v35 = vadd.f32 %v6876_v38, %v3195_v42 }
 0x587   : > { %v7044_v16 = vadd.f32 %v3460_v36, %v3372_v8 }
 0x588   : > { %v3285_v51 = vadd.f32 %v3284_v14, %v3196_v35 }
 0x58c   : > { %v3373_v33 = vpop.f32.mrf.mxu2  ;;  %v3462_v28 = vpop.f32.mrf.mxu3 }
 0x58d   : > { %v3374_v30 = vadd.f32 %v3373_v33, %v3285_v51  ;;  %v3198_v11 = vpop.f32.mrf.mxu0  ;;  %v3287_v55 = vpop.f32.mrf.mxu1 }
 0x58e   : > { %v3199_v44 = vadd.f32 %v6876_v38, %v3198_v11  ;;  %v7568_v11 = vld [vmem:[#allocation119_spill] sm:$0xff] }
 0x58f   : > { %v7047_v49 = vadd.f32 %v3462_v28, %v3374_v30  ;;  %v7567_v30 = vld [vmem:[#allocation118_spill] sm:$0xff] }
 0x590   : > { %v3288_v47 = vadd.f32 %v3287_v55, %v3199_v44  ;;  %3513 = vmatmul.bf16.gmra.mxu0 %v6485_v24  ;;  %3602 = vmatmul.bf16.gmra.mxu1 %v7564_v2  ;;  %v7569_v55 = vld [vmem:[#allocation120_spill] sm:$0xff] }
 0x591   : > { %3691 = vmatmul.bf16.gmra.mxu2 %v7565_v18  ;;  %3780 = vmatmul.bf16.gmra.mxu3 %v7566_v53 }
 0x594   : > { %v3376_v45 = vpop.f32.mrf.mxu2  ;;  %v3465_v19 = vpop.f32.mrf.mxu3 }
 0x595   : > { %v3377_v13 = vadd.f32 %v3376_v45, %v3288_v47  ;;  %v3200_v23 = vpop.f32.mrf.mxu0  ;;  %v3289_v1 = vpop.f32.mrf.mxu1 }
 0x596   : > { %v3201_v25 = vadd.f32 %v6876_v38, %v3200_v23 }
 0x597   : > { %v7054_v21 = vadd.f32 %v3465_v19, %v3377_v13 }
 0x598   : > { %v3290_v36 = vadd.f32 %v3289_v1, %v3201_v25 }
 0x59c   : > { %v3378_v8 = vpop.f32.mrf.mxu2  ;;  %v3467_v42 = vpop.f32.mrf.mxu3 }
 0x59d   : > { %v3379_v14 = vadd.f32 %v3378_v8, %v3290_v36  ;;  %v3203_v24 = vpop.f32.mrf.mxu0  ;;  %v3292_v35 = vpop.f32.mrf.mxu1 }
 0x59e   : > { %v3204_v51 = vadd.f32 %v6876_v38, %v3203_v24  ;;  %v7570_v24 = vld [vmem:[#allocation121_spill] sm:$0xff] }
 0x59f   : > { %v7057_v33 = vadd.f32 %v3467_v42, %v3379_v14 }
 0x5a0   : > { %v3293_v28 = vadd.f32 %v3292_v35, %v3204_v51  ;;  %3518 = vmatmul.bf16.gmra.mxu0 %v6505_v20  ;;  %3607 = vmatmul.bf16.gmra.mxu1 %v7567_v30  ;;  %v7571_v35 = vld [vmem:[#allocation122_spill] sm:$0xff]  ;;  %v7572_v51 = vld [vmem:[#allocation123_spill] sm:$0xff] }
 0x5a1   : > { %3696 = vmatmul.bf16.gmra.mxu2 %v7568_v11  ;;  %3785 = vmatmul.bf16.gmra.mxu3 %v7569_v55 }
 0x5a4   : > { %v3381_v44 = vpop.f32.mrf.mxu2  ;;  %v3470_v47 = vpop.f32.mrf.mxu3 }
 0x5a5   : > { %v3382_v2 = vadd.f32 %v3381_v44, %v3293_v28  ;;  %v3205_v18 = vpop.f32.mrf.mxu0  ;;  %v3294_v53 = vpop.f32.mrf.mxu1 }
 0x5a6   : > { %v3206_v45 = vadd.f32 %v6876_v38, %v3205_v18 }
 0x5a7   : > { %v7064_v19 = vadd.f32 %v3470_v47, %v3382_v2 }
 0x5a8   : > { %v3295_v13 = vadd.f32 %v3294_v53, %v3206_v45 }
 0x5ac   : > { %v3383_v23 = vpop.f32.mrf.mxu2  ;;  %v3472_v1 = vpop.f32.mrf.mxu3 }
 0x5ad   : > { %v3384_v25 = vadd.f32 %v3383_v23, %v3295_v13  ;;  %v3208_v20 = vpop.f32.mrf.mxu0  ;;  %v3297_v36 = vpop.f32.mrf.mxu1 }
 0x5ae   : > { %v3209_v8 = vadd.f32 %v6876_v38, %v3208_v20 }
 0x5af   : > { %v7067_v42 = vadd.f32 %v3472_v1, %v3384_v25 }
 0x5b0   : > { %v3298_v14 = vadd.f32 %v3297_v36, %v3209_v8  ;;  %3523 = vmatmul.bf16.gmra.mxu0 %v6525_v17  ;;  %3612 = vmatmul.bf16.gmra.mxu1 %v7570_v24  ;;  %v7573_v36 = vld [vmem:[#allocation124_spill] sm:$0xff]  ;;  %v7574_v8 = vld [vmem:[#allocation125_spill] sm:$0xff] }
 0x5b1   : > { %3701 = vmatmul.bf16.gmra.mxu2 %v7571_v35  ;;  %3790 = vmatmul.bf16.gmra.mxu3 %v7572_v51 }
 0x5b4   : > { %v3386_v28 = vpop.f32.mrf.mxu2  ;;  %v3475_v30 = vpop.f32.mrf.mxu3 }
 0x5b5   : > { %v3387_v11 = vadd.f32 %v3386_v28, %v3298_v14  ;;  %v3210_v55 = vpop.f32.mrf.mxu0  ;;  %v3299_v44 = vpop.f32.mrf.mxu1  ;;  %v7575_v14 = vld [vmem:[#allocation126_spill] sm:$0xff] }
 0x5b6   : > { %v3211_v47 = vadd.f32 %v6876_v38, %v3210_v55 }
 0x5b7   : > { %v7074_v2 = vadd.f32 %v3475_v30, %v3387_v11 }
 0x5b8   : > { %v3300_v18 = vadd.f32 %v3299_v44, %v3211_v47 }
 0x5bc   : > { %v3388_v53 = vpop.f32.mrf.mxu2  ;;  %v3477_v45 = vpop.f32.mrf.mxu3 }
 0x5bd   : > { %v3389_v13 = vadd.f32 %v3388_v53, %v3300_v18  ;;  %v3213_v17 = vpop.f32.mrf.mxu0  ;;  %v3302_v23 = vpop.f32.mrf.mxu1 }
 0x5be   : > { %v3214_v1 = vadd.f32 %v6876_v38, %v3213_v17 }
 0x5bf   : > { %v7077_v25 = vadd.f32 %v3477_v45, %v3389_v13 }
 0x5c0   : > { %v3303_v20 = vadd.f32 %v3302_v23, %v3214_v1  ;;  %3528 = vmatmul.bf16.gmra.mxu0 %v6545_v39  ;;  %3617 = vmatmul.bf16.gmra.mxu1 %v7573_v36  ;;  %v7576_v1 = vld [vmem:[#allocation127_spill] sm:$0xff]  ;;  %v7578_v36 = vld [vmem:[#allocation129_spill] sm:$0xff] }
 0x5c1   : > { %3706 = vmatmul.bf16.gmra.mxu2 %v7574_v8  ;;  %3795 = vmatmul.bf16.gmra.mxu3 %v7575_v14  ;;  %v7579_v8 = vld [vmem:[#allocation130_spill] sm:$0xff] }
 0x5c4   : > { %v3391_v24 = vpop.f32.mrf.mxu2  ;;  %v3480_v35 = vpop.f32.mrf.mxu3 }
 0x5c5   : > { %v3392_v51 = vadd.f32 %v3391_v24, %v3303_v20  ;;  %v3215_v28 = vpop.f32.mrf.mxu0  ;;  %v3304_v30 = vpop.f32.mrf.mxu1  ;;  %v7577_v20 = vld [vmem:[#allocation128_spill] sm:$0xff] }
 0x5c6   : > { %v3216_v11 = vadd.f32 %v6876_v38, %v3215_v28 }
 0x5c7   : > { %v7084_v55 = vadd.f32 %v3480_v35, %v3392_v51 }
 0x5c8   : > { %v3305_v44 = vadd.f32 %v3304_v30, %v3216_v11 }
 0x5cc   : > { %v3393_v47 = vpop.f32.mrf.mxu2  ;;  %v3482_v18 = vpop.f32.mrf.mxu3 }
 0x5cd   : > { %v3394_v53 = vadd.f32 %v3393_v47, %v3305_v44  ;;  %v3218_v39 = vpop.f32.mrf.mxu0  ;;  %v3307_v45 = vpop.f32.mrf.mxu1 }
 0x5ce   : > { %v3219_v13 = vadd.f32 %v6876_v38, %v3218_v39 }
 0x5cf   : > { %v7087_v17 = vadd.f32 %v3482_v18, %v3394_v53 }
 0x5d0   : > { %v3308_v23 = vadd.f32 %v3307_v45, %v3219_v13  ;;  %3533 = vmatmul.bf16.gmra.mxu0 %v7576_v1  ;;  %3622 = vmatmul.bf16.gmra.mxu1 %v7577_v20 }
 0x5d1   : > { %3711 = vmatmul.bf16.gmra.mxu2 %v7578_v36  ;;  %3800 = vmatmul.bf16.gmra.mxu3 %v7579_v8  ;;  %v7580_v36 = vld [vmem:[#allocation131_spill] sm:$0xff]  ;;  %v7582_v8 = vld [vmem:[#allocation133_spill] sm:$0xff] }
 0x5d4   : > { %v3396_v14 = vpop.f32.mrf.mxu2  ;;  %v3485_v24 = vpop.f32.mrf.mxu3 }
 0x5d5   : > { %v3397_v35 = vadd.f32 %v3396_v14, %v3308_v23  ;;  %v3220_v51 = vpop.f32.mrf.mxu0  ;;  %v3309_v28 = vpop.f32.mrf.mxu1  ;;  %v7581_v23 = vld [vmem:[#allocation132_spill] sm:$0xff]  ;;  %v7583_v14 = vld [vmem:[#allocation134_spill] sm:$0xff] }
 0x5d6   : > { %v3221_v30 = vadd.f32 %v6876_v38, %v3220_v51 }
 0x5d7   : > { %v7094_v11 = vadd.f32 %v3485_v24, %v3397_v35 }
 0x5d8   : > { %v3310_v44 = vadd.f32 %v3309_v28, %v3221_v30 }
 0x5dc   : > { %v3398_v47 = vpop.f32.mrf.mxu2  ;;  %v3487_v18 = vpop.f32.mrf.mxu3 }
 0x5dd   : > { %v3399_v53 = vadd.f32 %v3398_v47, %v3310_v44  ;;  %v3223_v39 = vpop.f32.mrf.mxu0  ;;  %v3312_v45 = vpop.f32.mrf.mxu1 }
 0x5de   : > { %v3224_v13 = vadd.f32 %v6876_v38, %v3223_v39 }
 0x5df   : > { %v7097_v1 = vadd.f32 %v3487_v18, %v3399_v53 }
 0x5e0   : > { %v3313_v20 = vadd.f32 %v3312_v45, %v3224_v13  ;;  %3538 = vmatmul.bf16.gmra.mxu0 %v7580_v36  ;;  %3627 = vmatmul.bf16.gmra.mxu1 %v7581_v23 }
 0x5e1   : > { %3716 = vmatmul.bf16.gmra.mxu2 %v7582_v8  ;;  %3805 = vmatmul.bf16.gmra.mxu3 %v7583_v14 }
 0x5e4   : > { %v3401_v24 = vpop.f32.mrf.mxu2  ;;  %v3490_v35 = vpop.f32.mrf.mxu3 }
 0x5e5   : > { %v3402_v51 = vadd.f32 %v3401_v24, %v3313_v20  ;;  %v3225_v28 = vpop.f32.mrf.mxu0  ;;  %v3314_v30 = vpop.f32.mrf.mxu1 }
 0x5e6   : > { %v3226_v44 = vadd.f32 %v6876_v38, %v3225_v28 }
 0x5e7   : > { %v7104_v47 = vadd.f32 %v3490_v35, %v3402_v51 }
 0x5e8   : > { %v3315_v18 = vadd.f32 %v3314_v30, %v3226_v44 }
 0x5ec   : > { %v3403_v53 = vpop.f32.mrf.mxu2  ;;  %v3492_v39 = vpop.f32.mrf.mxu3 }
 0x5ed   : > { %v3404_v45 = vadd.f32 %v3403_v53, %v3315_v18  ;;  %v3228_v13 = vpop.f32.mrf.mxu0  ;;  %v3317_v36 = vpop.f32.mrf.mxu1 }
 0x5ee   : > { %v3229_v23 = vadd.f32 %v6876_v38, %v3228_v13 }
 0x5ef   : > { %v7107_v8 = vadd.f32 %v3492_v39, %v3404_v45 }
 0x5f0   : > { %v3318_v14 = vadd.f32 %v3317_v36, %v3229_v23  ;;  %3543 = vmatmul.bf16.gmra.mxu0 %v6621_v6  ;;  %3632 = vmatmul.bf16.gmra.mxu1 %v6623_v54 }
 0x5f1   : > { %3721 = vmatmul.bf16.gmra.mxu2 %v6625_v26  ;;  %3810 = vmatmul.bf16.gmra.mxu3 %v6627_v27 }
 0x5f4   : > { %v3406_v20 = vpop.f32.mrf.mxu2  ;;  %v3495_v24 = vpop.f32.mrf.mxu3 }
 0x5f5   : > { %v3407_v35 = vadd.f32 %v3406_v20, %v3318_v14  ;;  %v3230_v51 = vpop.f32.mrf.mxu0  ;;  %v3319_v28 = vpop.f32.mrf.mxu1 }
 0x5f6   : > { %v3231_v30 = vadd.f32 %v6876_v38, %v3230_v51  ;;  %v4878_v51 = vld [vmem:[%s5309_s18] sm:$0xff] }
 0x5f7   : > { %v7114_v44 = vadd.f32 %v3495_v24, %v3407_v35 }
 0x5f8   : > { %v3320_v18 = vadd.f32 %v3319_v28, %v3231_v30 }
 0x5fc   : > { %v3408_v53 = vpop.f32.mrf.mxu2  ;;  %v3497_v39 = vpop.f32.mrf.mxu3 }
 0x5fd   : > { %v3409_v45 = vadd.f32 %v3408_v53, %v3320_v18  ;;  %v3509_v6 = vpop.f32.mrf.mxu0  ;;  %v3598_v54 = vpop.f32.mrf.mxu1 }
 0x5fe   : > { %v3510_v26 = vadd.f32 %v3509_v6, %v6900_v7 }
 0x5ff   : > { %v7116_v13 = vadd.f32 %v3497_v39, %v3409_v45 }
 0x600   : > { %3548 = vmatmul.bf16.gmra.mxu0 %v6653_v9  ;;  %3637 = vmatmul.bf16.gmra.mxu1 %v6655_v0  ;;  %v3599_v27 = vadd.f32 %v3598_v54, %v3510_v26 }
 0x601   : > { %3726 = vmatmul.bf16.gmra.mxu2 %v6657_v57  ;;  %3815 = vmatmul.bf16.gmra.mxu3 %v6659_v37 }
 0x604   : > { %v3687_v38 = vpop.f32.mrf.mxu2  ;;  %v3776_v36 = vpop.f32.mrf.mxu3 }
 0x605   : > { %v3688_v23 = vadd.f32 %v3687_v38, %v3599_v27  ;;  %v3511_v14 = vpop.f32.mrf.mxu0  ;;  %v3600_v20 = vpop.f32.mrf.mxu1 }
 0x606   : > { %v3512_v35 = vadd.f32 %v3511_v14, %v6911_v3  ;;  %v4879_v3 = vld [vmem:[%s5309_s18 + $0x8] sm:$0xff] }
 0x607   : > { %v3777_v24 = vadd.f32 %v3776_v36, %v3688_v23  ;;  %v4880_v36 = vld [vmem:[%s5309_s18 + $0x10] sm:$0xff] }
 0x608   : > { %v3601_v9 = vadd.f32 %v3600_v20, %v3512_v35 }
 0x609   : > { %v3856_v7 = vadd.f32 %v4878_v51, %v3777_v24 }
 0x60b   : > { %3888 = vst [vmem:[%s7127_s15] sm:$0xff] %v3856_v7 }
 0x60c   : > { %v3689_v0 = vpop.f32.mrf.mxu2  ;;  %v3778_v57 = vpop.f32.mrf.mxu3 }
 0x60d   : > { %v3690_v37 = vadd.f32 %v3689_v0, %v3601_v9  ;;  %v3514_v28 = vpop.f32.mrf.mxu0  ;;  %v3603_v30 = vpop.f32.mrf.mxu1  ;;  %v7584_v9 = vld [vmem:[#allocation16_spill] sm:$0xff]  ;;  %v7585_v0 = vld [vmem:[#allocation17_spill] sm:$0xff] }
 0x60e   : > { %v3515_v53 = vadd.f32 %v3514_v28, %v6922_v46 }
 0x60f   : > { %v3779_v18 = vadd.f32 %v3778_v57, %v3690_v37 }
 0x610   : > { %3553 = vmatmul.bf16.gmra.mxu0 %v6685_v5  ;;  %3642 = vmatmul.bf16.gmra.mxu1 %v6687_v32  ;;  %v3604_v45 = vadd.f32 %v3603_v30, %v3515_v53 }
 0x611   : > { %v3857_v39 = vadd.f32 %v4879_v3, %v3779_v18  ;;  %3731 = vmatmul.bf16.gmra.mxu2 %v6689_v59  ;;  %3820 = vmatmul.bf16.gmra.mxu3 %v6691_v41  ;;  %v4882_v3 = vld [vmem:[%s5309_s18 + $0x20] sm:$0xff] }
 0x613   : > { %3889 = vst [vmem:[%s7127_s15 + $0x8] sm:$0xff] %v3857_v39 }
 0x614   : > { %v3692_v6 = vpop.f32.mrf.mxu2  ;;  %v3781_v54 = vpop.f32.mrf.mxu3 }
 0x615   : > { %v3693_v26 = vadd.f32 %v3692_v6, %v3604_v45  ;;  %v3516_v27 = vpop.f32.mrf.mxu0  ;;  %v3605_v38 = vpop.f32.mrf.mxu1 }
 0x616   : > { %v3517_v5 = vadd.f32 %v3516_v27, %v6933_v10  ;;  %v4881_v10 = vld [vmem:[%s5309_s18 + $0x18] sm:$0xff] }
 0x617   : > { %v3782_v46 = vadd.f32 %v3781_v54, %v3693_v26 }
 0x618   : > { %v3606_v23 = vadd.f32 %v3605_v38, %v3517_v5  ;;  %v7586_v5 = vld [vmem:[#allocation18_spill] sm:$0xff] }
 0x619   : > { %v3858_v32 = vadd.f32 %v4880_v36, %v3782_v46  ;;  %v7587_v36 = vld [vmem:[#allocation21_spill] sm:$0xff] }
 0x61b   : > { %3890 = vst [vmem:[%s7127_s15 + $0x10] sm:$0xff] %v3858_v32 }
 0x61c   : > { %v3694_v14 = vpop.f32.mrf.mxu2  ;;  %v3783_v59 = vpop.f32.mrf.mxu3 }
 0x61d   : > { %v3695_v20 = vadd.f32 %v3694_v14, %v3606_v23  ;;  %v3519_v41 = vpop.f32.mrf.mxu0  ;;  %v3608_v24 = vpop.f32.mrf.mxu1  ;;  %v7588_v23 = vld [vmem:[#allocation22_spill] sm:$0xff]  ;;  %v7589_v14 = vld [vmem:[#allocation19_spill] sm:$0xff] }
 0x61e   : > { %v3520_v51 = vadd.f32 %v3519_v41, %v6944_v22 }
 0x61f   : > { %v3784_v35 = vadd.f32 %v3783_v59, %v3695_v20 }
 0x620   : > { %3558 = vmatmul.bf16.gmra.mxu0 %v6717_v40  ;;  %3647 = vmatmul.bf16.gmra.mxu1 %v6719_v4  ;;  %v3609_v57 = vadd.f32 %v3608_v24, %v3520_v51 }
 0x621   : > { %v3859_v7 = vadd.f32 %v4881_v10, %v3784_v35  ;;  %3736 = vmatmul.bf16.gmra.mxu2 %v7584_v9  ;;  %3825 = vmatmul.bf16.gmra.mxu3 %v7585_v0 }
 0x623   : > { %3891 = vst [vmem:[%s7127_s15 + $0x18] sm:$0xff] %v3859_v7  ;;  %v4884_v7 = vld [vmem:[%s5309_s18 + $0x30] sm:$0xff] }
 0x624   : > { %v3697_v37 = vpop.f32.mrf.mxu2  ;;  %v3786_v28 = vpop.f32.mrf.mxu3 }
 0x625   : > { %v3698_v30 = vadd.f32 %v3697_v37, %v3609_v57  ;;  %v3521_v18 = vpop.f32.mrf.mxu0  ;;  %v3610_v53 = vpop.f32.mrf.mxu1 }
 0x626   : > { %v3522_v40 = vadd.f32 %v3521_v18, %v6955_v61  ;;  %v4883_v61 = vld [vmem:[%s5309_s18 + $0x28] sm:$0xff] }
 0x627   : > { %v3787_v22 = vadd.f32 %v3786_v28, %v3698_v30 }
 0x628   : > { %v3611_v39 = vadd.f32 %v3610_v53, %v3522_v40  ;;  %v7590_v40 = vld [vmem:[#allocation20_spill] sm:$0xff] }
 0x629   : > { %v3860_v4 = vadd.f32 %v4882_v3, %v3787_v22 }
 0x62b   : > { %3892 = vst [vmem:[%s7127_s15 + $0x20] sm:$0xff] %v3860_v4  ;;  %v7591_v4 = vld [vmem:[#allocation23_spill] sm:$0xff] }
 0x62c   : > { %v3699_v45 = vpop.f32.mrf.mxu2  ;;  %v3788_v6 = vpop.f32.mrf.mxu3 }
 0x62d   : > { %v3700_v54 = vadd.f32 %v3699_v45, %v3611_v39  ;;  %v3524_v26 = vpop.f32.mrf.mxu0  ;;  %v3613_v27 = vpop.f32.mrf.mxu1  ;;  %v7592_v39 = vld [vmem:[#allocation24_spill] sm:$0xff] }
 0x62e   : > { %v3525_v46 = vadd.f32 %v3524_v26, %v6966_v29 }
 0x62f   : > { %v3789_v38 = vadd.f32 %v3788_v6, %v3700_v54 }
 0x630   : > { %3563 = vmatmul.bf16.gmra.mxu0 %v7586_v5  ;;  %3652 = vmatmul.bf16.gmra.mxu1 %v7587_v36  ;;  %v3614_v59 = vadd.f32 %v3613_v27, %v3525_v46  ;;  %v4886_v46 = vld [vmem:[%s5309_s18 + $0x40] sm:$0xff] }
 0x631   : > { %v3861_v32 = vadd.f32 %v4883_v61, %v3789_v38  ;;  %3741 = vmatmul.bf16.gmra.mxu2 %v7588_v23  ;;  %3830 = vmatmul.bf16.gmra.mxu3 %v7589_v14 }
 0x633   : > { %3893 = vst [vmem:[%s7127_s15 + $0x28] sm:$0xff] %v3861_v32 }
 0x634   : > { %v3702_v20 = vpop.f32.mrf.mxu2  ;;  %v3791_v41 = vpop.f32.mrf.mxu3 }
 0x635   : > { %v3703_v24 = vadd.f32 %v3702_v20, %v3614_v59  ;;  %v3526_v35 = vpop.f32.mrf.mxu0  ;;  %v3615_v51 = vpop.f32.mrf.mxu1 }
 0x636   : > { %v3527_v10 = vadd.f32 %v3526_v35, %v6977_v31  ;;  %v4885_v31 = vld [vmem:[%s5309_s18 + $0x38] sm:$0xff] }
 0x637   : > { %v3792_v29 = vadd.f32 %v3791_v41, %v3703_v24  ;;  %v7593_v35 = vld [vmem:[#allocation25_spill] sm:$0xff] }
 0x638   : > { %v3616_v0 = vadd.f32 %v3615_v51, %v3527_v10 }
 0x639   : > { %v3862_v9 = vadd.f32 %v4884_v7, %v3792_v29 }
 0x63b   : > { %3894 = vst [vmem:[%s7127_s15 + $0x30] sm:$0xff] %v3862_v9 }
 0x63c   : > { %v3704_v57 = vpop.f32.mrf.mxu2  ;;  %v3793_v37 = vpop.f32.mrf.mxu3 }
 0x63d   : > { %v3705_v28 = vadd.f32 %v3704_v57, %v3616_v0  ;;  %v3529_v30 = vpop.f32.mrf.mxu0  ;;  %v3618_v18 = vpop.f32.mrf.mxu1  ;;  %v4888_v57 = vld [vmem:[%s5309_s18 + $0x50] sm:$0xff] }
 0x63e   : > { %v3530_v22 = vadd.f32 %v3529_v30, %v6988_v62 }
 0x63f   : > { %v3794_v53 = vadd.f32 %v3793_v37, %v3705_v28 }
 0x640   : > { %3568 = vmatmul.bf16.gmra.mxu0 %v6781_v50  ;;  %3657 = vmatmul.bf16.gmra.mxu1 %v7590_v40  ;;  %v3619_v45 = vadd.f32 %v3618_v18, %v3530_v22 }
 0x641   : > { %v3863_v3 = vadd.f32 %v4885_v31, %v3794_v53  ;;  %3746 = vmatmul.bf16.gmra.mxu2 %v7591_v4  ;;  %3835 = vmatmul.bf16.gmra.mxu3 %v7592_v39  ;;  %v7594_v31 = vld [vmem:[#allocation26_spill] sm:$0xff] }
 0x642   : > { %v7596_v39 = vld [vmem:[#allocation30_spill] sm:$0xff] }
 0x643   : > { %3895 = vst [vmem:[%s7127_s15 + $0x38] sm:$0xff] %v3863_v3  ;;  %v7595_v3 = vld [vmem:[#allocation29_spill] sm:$0xff] }
 0x644   : > { %v3707_v6 = vpop.f32.mrf.mxu2  ;;  %v3796_v54 = vpop.f32.mrf.mxu3 }
 0x645   : > { %v3708_v26 = vadd.f32 %v3707_v6, %v3619_v45  ;;  %v3531_v27 = vpop.f32.mrf.mxu0  ;;  %v3620_v38 = vpop.f32.mrf.mxu1  ;;  %v7597_v45 = vld [vmem:[#allocation31_spill] sm:$0xff] }
 0x646   : > { %v3532_v50 = vadd.f32 %v3531_v27, %v6999_v43  ;;  %v4887_v43 = vld [vmem:[%s5309_s18 + $0x48] sm:$0xff] }
 0x647   : > { %v3797_v62 = vadd.f32 %v3796_v54, %v3708_v26 }
 0x648   : > { %v3621_v36 = vadd.f32 %v3620_v38, %v3532_v50 }
 0x649   : > { %v3864_v5 = vadd.f32 %v4886_v46, %v3797_v62  ;;  %v4890_v46 = vld [vmem:[%s5309_s18 + $0x60] sm:$0xff] }
 0x64b   : > { %3896 = vst [vmem:[%s7127_s15 + $0x40] sm:$0xff] %v3864_v5 }
 0x64c   : > { %v3709_v61 = vpop.f32.mrf.mxu2  ;;  %v3798_v32 = vpop.f32.mrf.mxu3 }
 0x64d   : > { %v3710_v23 = vadd.f32 %v3709_v61, %v3621_v36  ;;  %v3534_v14 = vpop.f32.mrf.mxu0  ;;  %v3623_v59 = vpop.f32.mrf.mxu1 }
 0x64e   : > { %v3535_v41 = vadd.f32 %v3534_v14, %v7010_v34 }
 0x64f   : > { %v3799_v20 = vadd.f32 %v3798_v32, %v3710_v23 }
 0x650   : > { %3573 = vmatmul.bf16.gmra.mxu0 %v6813_v52  ;;  %3662 = vmatmul.bf16.gmra.mxu1 %v6815_v63  ;;  %v3624_v51 = vadd.f32 %v3623_v59, %v3535_v41 }
 0x651   : > { %v3865_v24 = vadd.f32 %v4887_v43, %v3799_v20  ;;  %3751 = vmatmul.bf16.gmra.mxu2 %v6817_v56  ;;  %3840 = vmatmul.bf16.gmra.mxu3 %v7593_v35  ;;  %v7598_v43 = vld [vmem:[#allocation32_spill] sm:$0xff] }
 0x653   : > { %3897 = vst [vmem:[%s7127_s15 + $0x48] sm:$0xff] %v3865_v24  ;;  %v7599_v24 = vld [vmem:[#allocation27_spill] sm:$0xff] }
 0x654   : > { %v3712_v29 = vpop.f32.mrf.mxu2  ;;  %v3801_v10 = vpop.f32.mrf.mxu3 }
 0x655   : > { %v3713_v7 = vadd.f32 %v3712_v29, %v3624_v51  ;;  %v3536_v9 = vpop.f32.mrf.mxu0  ;;  %v3625_v0 = vpop.f32.mrf.mxu1  ;;  %v7600_v51 = vld [vmem:[#allocation28_spill] sm:$0xff]  ;;  %v7601_v29 = vld [vmem:[#allocation33_spill] sm:$0xff] }
 0x656   : > { %v3537_v52 = vadd.f32 %v3536_v9, %v7021_v12  ;;  %v4889_v12 = vld [vmem:[%s5309_s18 + $0x58] sm:$0xff] }
 0x657   : > { %v3802_v34 = vadd.f32 %v3801_v10, %v3713_v7 }
 0x658   : > { %v3626_v37 = vadd.f32 %v3625_v0, %v3537_v52 }
 0x659   : > { %v3866_v63 = vadd.f32 %v4888_v57, %v3802_v34 }
 0x65b   : > { %3898 = vst [vmem:[%s7127_s15 + $0x50] sm:$0xff] %v3866_v63  ;;  %v4892_v63 = vld [vmem:[%s5309_s18 + $0x70] sm:$0xff] }
 0x65c   : > { %v3714_v28 = vpop.f32.mrf.mxu2  ;;  %v3803_v56 = vpop.f32.mrf.mxu3 }
 0x65d   : > { %v3715_v30 = vadd.f32 %v3714_v28, %v3626_v37  ;;  %v3539_v18 = vpop.f32.mrf.mxu0  ;;  %v3628_v53 = vpop.f32.mrf.mxu1 }
 0x65e   : > { %v3540_v40 = vadd.f32 %v3539_v18, %v7024_v60 }
 0x65f   : > { %v3804_v22 = vadd.f32 %v3803_v56, %v3715_v30 }
 0x660   : > { %3578 = vmatmul.bf16.gmra.mxu0 %v7594_v31  ;;  %3667 = vmatmul.bf16.gmra.mxu1 %v7595_v3  ;;  %v3629_v6 = vadd.f32 %v3628_v53, %v3540_v40  ;;  %v4893_v3 = vld [vmem:[%s5309_s18 + $0x78] sm:$0xff] }
 0x661   : > { %v3867_v4 = vadd.f32 %v4889_v12, %v3804_v22  ;;  %3756 = vmatmul.bf16.gmra.mxu2 %v7596_v39  ;;  %3845 = vmatmul.bf16.gmra.mxu3 %v7597_v45 }
 0x663   : > { %3899 = vst [vmem:[%s7127_s15 + $0x58] sm:$0xff] %v3867_v4 }
 0x664   : > { %v3717_v54 = vpop.f32.mrf.mxu2  ;;  %v3806_v26 = vpop.f32.mrf.mxu3 }
 0x665   : > { %v3718_v27 = vadd.f32 %v3717_v54, %v3629_v6  ;;  %v3541_v38 = vpop.f32.mrf.mxu0  ;;  %v3630_v62 = vpop.f32.mrf.mxu1 }
 0x666   : > { %v3542_v50 = vadd.f32 %v3541_v38, %v7027_v58  ;;  %v4891_v58 = vld [vmem:[%s5309_s18 + $0x68] sm:$0xff]  ;;  %v4894_v38 = vld [vmem:[%s5309_s18 + $0x80] sm:$0xff] }
 0x667   : > { %v3807_v60 = vadd.f32 %v3806_v26, %v3718_v27 }
 0x668   : > { %v3631_v36 = vadd.f32 %v3630_v62, %v3542_v50 }
 0x669   : > { %v3868_v5 = vadd.f32 %v4890_v46, %v3807_v60 }
 0x66b   : > { %3900 = vst [vmem:[%s7127_s15 + $0x60] sm:$0xff] %v3868_v5 }
 0x66c   : > { %v3719_v61 = vpop.f32.mrf.mxu2  ;;  %v3808_v32 = vpop.f32.mrf.mxu3 }
 0x66d   : > { %v3720_v23 = vadd.f32 %v3719_v61, %v3631_v36  ;;  %v3544_v14 = vpop.f32.mrf.mxu0  ;;  %v3633_v59 = vpop.f32.mrf.mxu1 }
 0x66e   : > { %v3545_v41 = vadd.f32 %v3544_v14, %v7034_v48 }
 0x66f   : > { %v3809_v20 = vadd.f32 %v3808_v32, %v3720_v23  ;;  %v4895_v23 = vld [vmem:[%s5309_s18 + $0x88] sm:$0xff] }
 0x670   : > { %3583 = vmatmul.bf16.gmra.mxu0 %v7598_v43  ;;  %3672 = vmatmul.bf16.gmra.mxu1 %v7599_v24  ;;  %v3634_v10 = vadd.f32 %v3633_v59, %v3545_v41 }
 0x671   : > { %v3869_v35 = vadd.f32 %v4891_v58, %v3809_v20  ;;  %3761 = vmatmul.bf16.gmra.mxu2 %v7600_v51  ;;  %3850 = vmatmul.bf16.gmra.mxu3 %v7601_v29  ;;  %v4896_v51 = vld [vmem:[%s5309_s18 + $0x90] sm:$0xff] }
 0x673   : > { %3901 = vst [vmem:[%s7127_s15 + $0x68] sm:$0xff] %v3869_v35 }
 0x674   : > { %v3722_v7 = vpop.f32.mrf.mxu2  ;;  %v3811_v9 = vpop.f32.mrf.mxu3 }
 0x675   : > { %v3723_v0 = vadd.f32 %v3722_v7, %v3634_v10  ;;  %v3546_v34 = vpop.f32.mrf.mxu0  ;;  %v3635_v48 = vpop.f32.mrf.mxu1 }
 0x676   : > { %v3547_v57 = vadd.f32 %v3546_v34, %v7037_v15 }
 0x677   : > { %v3812_v52 = vadd.f32 %v3811_v9, %v3723_v0 }
 0x678   : > { %v3636_v28 = vadd.f32 %v3635_v48, %v3547_v57  ;;  %v4897_v57 = vld [vmem:[%s5309_s18 + $0x98] sm:$0xff] }
 0x679   : > { %v3870_v37 = vadd.f32 %v4892_v63, %v3812_v52 }
 0x67b   : > { %3902 = vst [vmem:[%s7127_s15 + $0x70] sm:$0xff] %v3870_v37 }
 0x67c   : > { %v3724_v56 = vpop.f32.mrf.mxu2  ;;  %v3813_v30 = vpop.f32.mrf.mxu3 }
 0x67d   : > { %v3725_v18 = vadd.f32 %v3724_v56, %v3636_v28  ;;  %v3549_v53 = vpop.f32.mrf.mxu0  ;;  %v3638_v22 = vpop.f32.mrf.mxu1 }
 0x67e   : > { %v3550_v31 = vadd.f32 %v3549_v53, %v7044_v16 }
 0x67f   : > { %v3814_v40 = vadd.f32 %v3813_v30, %v3725_v18 }
 0x680   : > { %v3639_v4 = vadd.f32 %v3638_v22, %v3550_v31 }
 0x681   : > { %v3871_v12 = vadd.f32 %v4893_v3, %v3814_v40  ;;  %v4898_v40 = vld [vmem:[%s5309_s18 + $0xa0] sm:$0xff] }
 0x683   : > { %3903 = vst [vmem:[%s7127_s15 + $0x78] sm:$0xff] %v3871_v12 }
 0x684   : > { %v3727_v39 = vpop.f32.mrf.mxu2  ;;  %v3816_v15 = vpop.f32.mrf.mxu3 }
 0x685   : > { %v3728_v45 = vadd.f32 %v3727_v39, %v3639_v4  ;;  %v3551_v6 = vpop.f32.mrf.mxu0  ;;  %v3640_v54 = vpop.f32.mrf.mxu1 }
 0x686   : > { %v3552_v27 = vadd.f32 %v3551_v6, %v7047_v49 }
 0x687   : > { %v3817_v26 = vadd.f32 %v3816_v15, %v3728_v45 }
 0x688   : > { %v3641_v60 = vadd.f32 %v3640_v54, %v3552_v27  ;;  %v4899_v54 = vld [vmem:[%s5309_s18 + $0xa8] sm:$0xff] }
 0x689   : > { %v3872_v62 = vadd.f32 %v4894_v38, %v3817_v26 }
 0x68b   : > { %3904 = vst [vmem:[%s7127_s15 + $0x80] sm:$0xff] %v3872_v62 }
 0x68c   : > { %v3729_v50 = vpop.f32.mrf.mxu2  ;;  %v3818_v16 = vpop.f32.mrf.mxu3 }
 0x68d   : > { %v3730_v46 = vadd.f32 %v3729_v50, %v3641_v60  ;;  %v3554_v5 = vpop.f32.mrf.mxu0  ;;  %v3643_v36 = vpop.f32.mrf.mxu1 }
 0x68e   : > { %v3555_v32 = vadd.f32 %v3554_v5, %v7054_v21  ;;  %v4900_v5 = vld [vmem:[%s5309_s18 + $0xb0] sm:$0xff] }
 0x68f   : > { %v3819_v61 = vadd.f32 %v3818_v16, %v3730_v46 }
 0x690   : > { %v3644_v59 = vadd.f32 %v3643_v36, %v3555_v32 }
 0x691   : > { %v3873_v14 = vadd.f32 %v4895_v23, %v3819_v61 }
 0x693   : > { %3905 = vst [vmem:[%s7127_s15 + $0x88] sm:$0xff] %v3873_v14 }
 0x694   : > { %v3732_v20 = vpop.f32.mrf.mxu2  ;;  %v3821_v49 = vpop.f32.mrf.mxu3 }
 0x695   : > { %v3733_v41 = vadd.f32 %v3732_v20, %v3644_v59  ;;  %v3556_v43 = vpop.f32.mrf.mxu0  ;;  %v3645_v24 = vpop.f32.mrf.mxu1 }
 0x696   : > { %v3557_v35 = vadd.f32 %v3556_v43, %v7057_v33 }
 0x697   : > { %v3822_v58 = vadd.f32 %v3821_v49, %v3733_v41  ;;  %v4901_v41 = vld [vmem:[%s5309_s18 + $0xb8] sm:$0xff] }
 0x698   : > { %v3646_v10 = vadd.f32 %v3645_v24, %v3557_v35 }
 0x699   : > { %v3874_v29 = vadd.f32 %v4896_v51, %v3822_v58 }
 0x69b   : > { %3906 = vst [vmem:[%s7127_s15 + $0x90] sm:$0xff] %v3874_v29 }
 0x69c   : > { %v3734_v7 = vpop.f32.mrf.mxu2  ;;  %v3823_v21 = vpop.f32.mrf.mxu3 }
 0x69d   : > { %v3735_v9 = vadd.f32 %v3734_v7, %v3646_v10  ;;  %v3559_v0 = vpop.f32.mrf.mxu0  ;;  %v3648_v34 = vpop.f32.mrf.mxu1 }
 0x69e   : > { %v3560_v52 = vadd.f32 %v3559_v0, %v7064_v19 }
 0x69f   : > { %v3824_v48 = vadd.f32 %v3823_v21, %v3735_v9  ;;  %v4902_v21 = vld [vmem:[%s5309_s18 + $0xc0] sm:$0xff] }
 0x6a0   : > { %v3649_v37 = vadd.f32 %v3648_v34, %v3560_v52 }
 0x6a1   : > { %v3875_v63 = vadd.f32 %v4897_v57, %v3824_v48 }
 0x6a3   : > { %3907 = vst [vmem:[%s7127_s15 + $0x98] sm:$0xff] %v3875_v63 }
 0x6a4   : > { %v3737_v28 = vpop.f32.mrf.mxu2  ;;  %v3826_v33 = vpop.f32.mrf.mxu3 }
 0x6a5   : > { %v3738_v56 = vadd.f32 %v3737_v28, %v3649_v37  ;;  %v3561_v30 = vpop.f32.mrf.mxu0  ;;  %v3650_v18 = vpop.f32.mrf.mxu1  ;;  %v4903_v28 = vld [vmem:[%s5309_s18 + $0xc8] sm:$0xff] }
 0x6a6   : > { %v3562_v22 = vadd.f32 %v3561_v30, %v7067_v42 }
 0x6a7   : > { %v3827_v53 = vadd.f32 %v3826_v33, %v3738_v56 }
 0x6a8   : > { %v3651_v3 = vadd.f32 %v3650_v18, %v3562_v22 }
 0x6a9   : > { %v3876_v31 = vadd.f32 %v4898_v40, %v3827_v53 }
 0x6ab   : > { %3908 = vst [vmem:[%s7127_s15 + $0xa0] sm:$0xff] %v3876_v31 }
 0x6ac   : > { %v3739_v12 = vpop.f32.mrf.mxu2  ;;  %v3828_v19 = vpop.f32.mrf.mxu3 }
 0x6ad   : > { %v3740_v4 = vadd.f32 %v3739_v12, %v3651_v3  ;;  %v3564_v39 = vpop.f32.mrf.mxu0  ;;  %v3653_v15 = vpop.f32.mrf.mxu1  ;;  %v4904_v3 = vld [vmem:[%s5309_s18 + $0xd0] sm:$0xff] }
 0x6ae   : > { %v3565_v6 = vadd.f32 %v3564_v39, %v7074_v2 }
 0x6af   : > { %v3829_v45 = vadd.f32 %v3828_v19, %v3740_v4 }
 0x6b0   : > { %v3654_v27 = vadd.f32 %v3653_v15, %v3565_v6 }
 0x6b1   : > { %v3877_v26 = vadd.f32 %v4899_v54, %v3829_v45 }
 0x6b3   : > { %3909 = vst [vmem:[%s7127_s15 + $0xa8] sm:$0xff] %v3877_v26  ;;  %v4905_v26 = vld [vmem:[%s5309_s18 + $0xd8] sm:$0xff] }
 0x6b4   : > { %v3742_v38 = vpop.f32.mrf.mxu2  ;;  %v3831_v42 = vpop.f32.mrf.mxu3 }
 0x6b5   : > { %v3743_v62 = vadd.f32 %v3742_v38, %v3654_v27  ;;  %v3566_v60 = vpop.f32.mrf.mxu0  ;;  %v3655_v50 = vpop.f32.mrf.mxu1 }
 0x6b6   : > { %v3567_v46 = vadd.f32 %v3566_v60, %v7077_v25 }
 0x6b7   : > { %v3832_v16 = vadd.f32 %v3831_v42, %v3743_v62 }
 0x6b8   : > { %v3656_v61 = vadd.f32 %v3655_v50, %v3567_v46 }
 0x6b9   : > { %v3878_v36 = vadd.f32 %v4900_v5, %v3832_v16  ;;  %v4906_v5 = vld [vmem:[%s5309_s18 + $0xe0] sm:$0xff] }
 0x6bb   : > { %3910 = vst [vmem:[%s7127_s15 + $0xb0] sm:$0xff] %v3878_v36 }
 0x6bc   : > { %v3744_v32 = vpop.f32.mrf.mxu2  ;;  %v3833_v2 = vpop.f32.mrf.mxu3 }
 0x6bd   : > { %v3745_v23 = vadd.f32 %v3744_v32, %v3656_v61  ;;  %v3569_v14 = vpop.f32.mrf.mxu0  ;;  %v3658_v59 = vpop.f32.mrf.mxu1 }
 0x6be   : > { %v3570_v49 = vadd.f32 %v3569_v14, %v7084_v55 }
 0x6bf   : > { %v3834_v20 = vadd.f32 %v3833_v2, %v3745_v23 }
 0x6c0   : > { %v3659_v24 = vadd.f32 %v3658_v59, %v3570_v49  ;;  %v4907_v49 = vld [vmem:[%s5309_s18 + $0xe8] sm:$0xff] }
 0x6c1   : > { %v3879_v43 = vadd.f32 %v4901_v41, %v3834_v20 }
 0x6c3   : > { %3911 = vst [vmem:[%s7127_s15 + $0xb8] sm:$0xff] %v3879_v43 }
 0x6c4   : > { %v3747_v58 = vpop.f32.mrf.mxu2  ;;  %v3836_v25 = vpop.f32.mrf.mxu3 }
 0x6c5   : > { %v3748_v35 = vadd.f32 %v3747_v58, %v3659_v24  ;;  %v3571_v51 = vpop.f32.mrf.mxu0  ;;  %v3660_v29 = vpop.f32.mrf.mxu1 }
 0x6c6   : > { %v3572_v7 = vadd.f32 %v3571_v51, %v7087_v17 }
 0x6c7   : > { %v3837_v10 = vadd.f32 %v3836_v25, %v3748_v35 }
 0x6c8   : > { %v3661_v0 = vadd.f32 %v3660_v29, %v3572_v7  ;;  %v4908_v29 = vld [vmem:[%s5309_s18 + $0xf0] sm:$0xff] }
 0x6c9   : > { %v3880_v9 = vadd.f32 %v4902_v21, %v3837_v10 }
 0x6cb   : > { %3912 = vst [vmem:[%s7127_s15 + $0xc0] sm:$0xff] %v3880_v9 }
 0x6cc   : > { %v3749_v34 = vpop.f32.mrf.mxu2  ;;  %v3838_v55 = vpop.f32.mrf.mxu3 }
 0x6cd   : > { %v3750_v48 = vadd.f32 %v3749_v34, %v3661_v0  ;;  %v3574_v52 = vpop.f32.mrf.mxu0  ;;  %v3663_v57 = vpop.f32.mrf.mxu1  ;;  %v4909_v34 = vld [vmem:[%s5309_s18 + $0xf8] sm:$0xff] }
 0x6ce   : > { %v3575_v37 = vadd.f32 %v3574_v52, %v7094_v11 }
 0x6cf   : > { %v3839_v63 = vadd.f32 %v3838_v55, %v3750_v48 }
 0x6d0   : > { %v3664_v56 = vadd.f32 %v3663_v57, %v3575_v37 }
 0x6d1   : > { %v3881_v33 = vadd.f32 %v4903_v28, %v3839_v63 }
 0x6d3   : > { %3913 = vst [vmem:[%s7127_s15 + $0xc8] sm:$0xff] %v3881_v33 }
 0x6d4   : > { %v3752_v30 = vpop.f32.mrf.mxu2  ;;  %v3841_v17 = vpop.f32.mrf.mxu3 }
 0x6d5   : > { %v3753_v18 = vadd.f32 %v3752_v30, %v3664_v56  ;;  %v3576_v53 = vpop.f32.mrf.mxu0  ;;  %v3665_v22 = vpop.f32.mrf.mxu1 }
 0x6d6   : > { %v3577_v31 = vadd.f32 %v3576_v53, %v7097_v1 }
 0x6d7   : > { %v3842_v40 = vadd.f32 %v3841_v17, %v3753_v18 }
 0x6d8   : > { %v3666_v19 = vadd.f32 %v3665_v22, %v3577_v31 }
 0x6d9   : > { %v3882_v12 = vadd.f32 %v4904_v3, %v3842_v40 }
 0x6db   : > { %3914 = vst [vmem:[%s7127_s15 + $0xd0] sm:$0xff] %v3882_v12 }
 0x6dc   : > { %v3754_v4 = vpop.f32.mrf.mxu2  ;;  %v3843_v11 = vpop.f32.mrf.mxu3 }
 0x6dd   : > { %v3755_v39 = vadd.f32 %v3754_v4, %v3666_v19  ;;  %v3579_v15 = vpop.f32.mrf.mxu0  ;;  %v3668_v45 = vpop.f32.mrf.mxu1 }
 0x6de   : > { %v3580_v54 = vadd.f32 %v3579_v15, %v7104_v47 }
 0x6df   : > { %v3844_v6 = vadd.f32 %v3843_v11, %v3755_v39 }
 0x6e0   : > { %v3669_v38 = vadd.f32 %v3668_v45, %v3580_v54 }
 0x6e1   : > { %v3883_v27 = vadd.f32 %v4905_v26, %v3844_v6 }
 0x6e3   : > { %3915 = vst [vmem:[%s7127_s15 + $0xd8] sm:$0xff] %v3883_v27 }
 0x6e4   : > { %v3757_v42 = vpop.f32.mrf.mxu2  ;;  %v3846_v1 = vpop.f32.mrf.mxu3 }
 0x6e5   : > { %v3758_v62 = vadd.f32 %v3757_v42, %v3669_v38  ;;  %v3581_v60 = vpop.f32.mrf.mxu0  ;;  %v3670_v50 = vpop.f32.mrf.mxu1 }
 0x6e6   : > { %v3582_v46 = vadd.f32 %v3581_v60, %v7107_v8 }
 0x6e7   : > { %v3847_v16 = vadd.f32 %v3846_v1, %v3758_v62 }
 0x6e8   : > { %v3671_v61 = vadd.f32 %v3670_v50, %v3582_v46 }
 0x6e9   : > { %v3884_v36 = vadd.f32 %v4906_v5, %v3847_v16 }
 0x6eb   : > { %3916 = vst [vmem:[%s7127_s15 + $0xe0] sm:$0xff] %v3884_v36 }
 0x6ec   : > { %v3759_v32 = vpop.f32.mrf.mxu2  ;;  %v3848_v47 = vpop.f32.mrf.mxu3 }
 0x6ed   : > { %v3760_v2 = vadd.f32 %v3759_v32, %v3671_v61  ;;  %v3584_v23 = vpop.f32.mrf.mxu0  ;;  %v3673_v20 = vpop.f32.mrf.mxu1 }
 0x6ee   : > { %v3585_v59 = vadd.f32 %v3584_v23, %v7114_v44 }
 0x6ef   : > { %v3849_v14 = vadd.f32 %v3848_v47, %v3760_v2 }
 0x6f0   : > { %v3674_v43 = vadd.f32 %v3673_v20, %v3585_v59 }
 0x6f1   : > { %v3885_v41 = vadd.f32 %v4907_v49, %v3849_v14 }
 0x6f3   : > { %3917 = vst [vmem:[%s7127_s15 + $0xe8] sm:$0xff] %v3885_v41 }
 0x6f4   : > { %v3762_v8 = vpop.f32.mrf.mxu2  ;;  %v3851_v24 = vpop.f32.mrf.mxu3 }
 0x6f5   : > { %v3763_v58 = vadd.f32 %v3762_v8, %v3674_v43  ;;  %v3586_v25 = vpop.f32.mrf.mxu0  ;;  %v3675_v44 = vpop.f32.mrf.mxu1 }
 0x6f6   : > { %v3587_v51 = vadd.f32 %v3586_v25, %v7116_v13 }
 0x6f7   : > { %v3852_v35 = vadd.f32 %v3851_v24, %v3763_v58 }
 0x6f8   : > { %v3676_v7 = vadd.f32 %v3675_v44, %v3587_v51 }
 0x6f9   : > { %v3886_v10 = vadd.f32 %v4908_v29, %v3852_v35 }
 0x6fb   : > { %3918 = vst [vmem:[%s7127_s15 + $0xf0] sm:$0xff] %v3886_v10 }
 0x6fc   : > { %v3764_v21 = vpop.f32.mrf.mxu2  ;;  %v3853_v0 = vpop.f32.mrf.mxu3 }
 0x6fd   : > { %v3765_v9 = vadd.f32 %v3764_v21, %v3676_v7 }
 0x6ff   : > { %v3854_v13 = vadd.f32 %v3853_v0, %v3765_v9 }
 0x701   : > { %v3887_v55 = vadd.f32 %v4909_v34, %v3854_v13 }
 0x703   : > { %3919 = vst [vmem:[%s7127_s15 + $0xf8] sm:$0xff] %v3887_v55 }
 0x704   : > { %5087 = shalt.err (!%p5084_p11)
}
 0x705   : > { %s5147_s13 = smov 128   ;;  %s5148_s18 = smov 8  }
 0x706   : > { %4729 = dma.vmem_to_hbm [thread:$0]  (%p5276_p5), %s3934_s29, 4096, %s3936_s1, %s3921_s28, %s5147_s13, %s5147_s13, %s5148_s18  }
 0x707 PF: > { %s3950_s15 = sand.u32 1, %s5122_s24   ;;  %p7602_p12 = scmp.ge.s32.totalorder %s5134_s27, 2 }
 0x708   : > { %s3951_s11 = scalar_lea.sflag [#allocation4], %s3950_s15 }
 0x709   : > { %p4749_p13 = pnand %p7602_p12, %p5224_p6 }
 0x70b   : > { %p4750_p0 = pneg %p4749_p13 }
 0x70d   : > { %5117 = dma.done.wait (%p4750_p0), %s3951_s11, 4096  }
 0x70e   : > { %5119 = vsyncadd (%p4750_p0), %s3951_s11, 4294963200  ;;  %p22_p3 = scmp.ge.s32.totalorder %s5263_s22, 4   ;;  %s7603_s24 = smov %s5126_s25 }
 0x70f   : > { %s7604_s25 = smov %s5130_s26  ;;  %s7605_s26 = smov %s5272_s21 }
 0x710   : > { %s7606_s27 = smov %s5263_s22  ;;  %24 = sbr.rel (!%p22_p3) target bundleno = 9 (0x9), region = 109 }
 0x715   :  { %3957 = vsyncpa [#allocation3], 1 }
 0x716   :  { %3959 = vsyncpa [#allocation3 + $0x1], 1 }
 0x717   :  { %3960 = vsyncpa [#allocation6], 1 }
 0x718   :  { %3961 = vsyncpa [#allocation9], 1 }
 0x719   :  { %3962 = vsyncpa [#allocation4], 1 }
 0x71a   :  { %3964 = vsyncpa [#allocation4 + $0x1], 1 }

</bundles_post_ra>
